<compile_context>
chip_gen: v7x
topology: tpu7x:2x2x1
jax: 0.10.0
libtpu: 0.0.40
codegen_flags: <defaults>
</compile_context>

<pallas_src>
import functools

import jax
import jax.numpy as jnp
from jax.experimental import pallas as pl
from jax.experimental.pallas import tpu as pltpu


_TIME_CHUNK = 32  # timesteps per hoisted input-projection chunk


# ----------------------------- Fused Pallas kernel -----------------------------

def _decoder_kernel(num_layers, B_pad, S_run, S_in, H_pad, chunk_len, *refs):
    """Fused TemporalDecoder forward.

    refs layout:
      inputs : h_t(B_pad,T), we(T,S_in*H_pad), be(1,S_in*H_pad),
               [wih(H_pad,3H_pad), whh(H_pad,3H_pad), bx(1,3H_pad), bhn(1,H_pad)] * num_layers,
               wr(H_pad,O_pad), br(1,O_pad)
      outputs: out(S_run*B_pad, O_pad)   (time-major, lane-dense)
      scratch: x_buf(S_run*B_pad, H_pad), gi_buf(chunk_len*B_pad, 3*H_pad)
    """
    h_ref, we_ref, be_ref = refs[0], refs[1], refs[2]
    pos = 3
    layers = []
    for _ in range(num_layers):
        layers.append(tuple(refs[pos:pos + 4]))
        pos += 4
    wr_ref, br_ref = refs[pos], refs[pos + 1]
    out_ref = refs[pos + 2]
    x_buf, gi_buf = refs[pos + 3], refs[pos + 4]

    cdt = we_ref.dtype  # matmul operand compute dtype (bf16 by default, f32 optional)

    # ---- fc_expand: (B_pad, T) @ (T, S_in*H_pad) + bias ------------------------------------
    expanded = (jnp.dot(h_ref[...].astype(cdt), we_ref[...],
                        preferred_element_type=jnp.float32)
                + be_ref[...])                                     # (B_pad, S_in*H_pad) f32

    # Scatter into time-major (S_run*B_pad, H_pad) slab; every column slice is lane-aligned.
    for t in range(S_run):
        rows = slice(t * B_pad, (t + 1) * B_pad)
        if t < S_in:
            x_buf[rows, :] = expanded[:, t * H_pad:(t + 1) * H_pad]
        else:
            x_buf[rows, :] = jnp.zeros((B_pad, H_pad), jnp.float32)

    num_chunks = (S_run + chunk_len - 1) // chunk_len

    # ---- GRU stack --------------------------------------------------------------------------
    # TODO(synk): inter-layer dropout (p=0.1 when num_layers>1) is training-only; identity here.
    for (wih_ref, whh_ref, bx_ref, bhn_ref) in layers:
        wih = wih_ref[...]                                         # (H_pad, 3H_pad) cdt
        whh = whh_ref[...]                                         # (H_pad, 3H_pad) cdt
        bx = bx_ref[...]                                           # (1, 3H_pad)     f32
        bhn = bhn_ref[...]                                         # (1, H_pad)      f32

        h = jnp.zeros((B_pad, H_pad), jnp.float32)
        for c in range(num_chunks):
            base = c * chunk_len
            clen = min(chunk_len, S_run - base)
            xr = slice(base * B_pad, (base + clen) * B_pad)

            # Hoisted input projection for this time chunk: one MXU matmul.
            gi_buf[0:clen * B_pad, :] = (
                jnp.dot(x_buf[xr, :].astype(cdt), wih,
                        preferred_element_type=jnp.float32) + bx)  # (clen*B_pad, 3H_pad)

            def step(t, h_prev):
                off = pl.multiple_of(t * B_pad, B_pad)             # 8-aligned sublane offset
                gi = gi_buf[pl.ds(off, B_pad), :]                  # (B_pad, 3H_pad)
                gh = jnp.dot(h_prev.astype(cdt), whh,
                             preferred_element_type=jnp.float32)   # (B_pad, 3H_pad)
                # All gate slices are 128-lane aligned (H_pad multiple of 128).
                r = jax.nn.sigmoid(gi[:, 0:H_pad] + gh[:, 0:H_pad])
                z = jax.nn.sigmoid(gi[:, H_pad:2 * H_pad] + gh[:, H_pad:2 * H_pad])
                n = jnp.tanh(gi[:, 2 * H_pad:3 * H_pad]
                             + r * (gh[:, 2 * H_pad:3 * H_pad] + bhn))
                h_new = (1.0 - z) * n + z * h_prev
                woff = pl.multiple_of(base * B_pad + t * B_pad, B_pad)
                x_buf[pl.ds(woff, B_pad), :] = h_new               # becomes next layer's input
                return h_new

            # Partial unroll so the scheduler can overlap steps; full unroll for tiny chunks.
            h = jax.lax.fori_loop(0, clen, step, h, unroll=min(clen, 8))

    # ---- fc_reconstruct on the whole sequence: single contiguous lane-dense store -----------
    out_ref[...] = (jnp.dot(x_buf[...].astype(cdt), wr_ref[...],
                            preferred_element_type=jnp.float32)
                    + br_ref[...])                                 # (S_run*B_pad, O_pad)


# ----------------------------- Parameter preparation -----------------------------

def init_temporal_decoder_params(key, temporal_dimension, hidden_dim, num_layers,
                                 output_dim, max_seq_len):
    """PyTorch-layout synthetic parameters, uniform(-1/sqrt(fan), 1/sqrt(fan))."""
    params = dict(temporal_dimension=temporal_dimension, hidden_dim=hidden_dim,
                  num_layers=num_layers, output_dim=output_dim, max_seq_len=max_seq_len)

    def uni(key, shape, fan):
        bound = 1.0 / jnp.sqrt(float(fan))
        return jax.random.uniform(key, shape, jnp.float32, -bound, bound)

    keys = jax.random.split(key, 4 + 4 * num_layers)
    params["fc_expand_w"] = uni(keys[0], (max_seq_len * hidden_dim, temporal_dimension),
                                temporal_dimension)
    params["fc_expand_b"] = uni(keys[1], (max_seq_len * hidden_dim,), temporal_dimension)
    params["fc_reconstruct_w"] = uni(keys[2], (output_dim, hidden_dim), hidden_dim)
    params["fc_reconstruct_b"] = uni(keys[3], (output_dim,), hidden_dim)
    for l in range(num_layers):
        k0, k1, k2, k3 = keys[4 + 4 * l: 8 + 4 * l]
        params[f"gru_w_ih_l{l}"] = uni(k0, (3 * hidden_dim, hidden_dim), hidden_dim)
        params[f"gru_w_hh_l{l}"] = uni(k1, (3 * hidden_dim, hidden_dim), hidden_dim)
        params[f"gru_b_ih_l{l}"] = uni(k2, (3 * hidden_dim,), hidden_dim)
        params[f"gru_b_hh_l{l}"] = uni(k3, (3 * hidden_dim,), hidden_dim)
    return params


def prepare_temporal_decoder(params, compute_dtype=jnp.bfloat16):
    """One-time packing of PyTorch-layout weights into kernel-friendly layouts.

    Matmul-operand weights are stored in `compute_dtype` (default bf16); biases stay f32.
    Each GRU gate block and the fc_expand per-timestep block are padded to H_pad = ceil(H/128)*128
    so every slice on the per-step critical path is tile-aligned.  Padded columns are zero and
    provably remain zero through the recurrence.
    """
    T = params["temporal_dimension"]
    H = params["hidden_dim"]
    L = params["num_layers"]
    O = params["output_dim"]
    S_max = params["max_seq_len"]
    H_pad = ((H + 127) // 128) * 128
    O_pad = ((O + 127) // 128) * 128

    # fc_expand: (S*H, T) -> (T, S*H_pad) with per-timestep lane padding.
    weT = jnp.transpose(params["fc_expand_w"]).reshape(T, S_max, H)
    we = jnp.pad(weT, ((0, 0), (0, 0), (0, H_pad - H))).reshape(T, S_max * H_pad)
    beS = params["fc_expand_b"].reshape(S_max, H)
    be = jnp.pad(beS, ((0, 0), (0, H_pad - H))).reshape(1, S_max * H_pad)

    arrays = {
        "we": we.astype(compute_dtype),
        "be": be.astype(jnp.float32),
    }

    def pack_gate_weight(w):                      # w: (3H, H) row blocks [r, z, n]
        wT = jnp.transpose(w)                     # (H, 3H) column blocks [r, z, n]
        gates = [wT[:, g * H:(g + 1) * H] for g in range(3)]
        gates = [jnp.pad(g, ((0, H_pad - H), (0, H_pad - H))) for g in gates]
        return jnp.concatenate(gates, axis=1).astype(compute_dtype)   # (H_pad, 3*H_pad)

    layers = []
    for l in range(L):
        w_ih = params[f"gru_w_ih_l{l}"]
        w_hh = params[f"gru_w_hh_l{l}"]
        b_ih = params[f"gru_b_ih_l{l}"]
        b_hh = params[f"gru_b_hh_l{l}"]
        wih = pack_gate_weight(w_ih)
        whh = pack_gate_weight(w_hh)
        # Fold b_ir+b_hr and b_iz+b_hz; b_hn stays separate (it sits inside r * (...)).
        bx_gates = [b_ih[0:H] + b_hh[0:H],
                    b_ih[H:2 * H] + b_hh[H:2 * H],
                    b_ih[2 * H:3 * H]]
        bx = jnp.concatenate([jnp.pad(g, (0, H_pad - H)) for g in bx_gates]
                             ).reshape(1, 3 * H_pad).astype(jnp.float32)
        bhn = jnp.pad(b_hh[2 * H:3 * H], (0, H_pad - H)).reshape(1, H_pad).astype(jnp.float32)
        layers.append((wih, whh, bx, bhn))
    arrays["layers"] = layers

    wr = jnp.transpose(params["fc_reconstruct_w"])                       # (H, O)
    arrays["wr"] = jnp.pad(wr, ((0, H_pad - H), (0, O_pad - O))).astype(compute_dtype)
    arrays["br"] = jnp.pad(params["fc_reconstruct_b"],
                           (0, O_pad - O)).reshape(1, O_pad).astype(jnp.float32)

    cfg = dict(temporal_dimension=T, hidden_dim=H, num_layers=L, output_dim=O,
               max_seq_len=S_max, hidden_dim_padded=H_pad, output_dim_padded=O_pad)
    return cfg, arrays


# ----------------------------- Forward wrapper -----------------------------

def temporal_decoder_forward(cfg, arrays, H_t, target_seq_len=None):
    """Pallas implementation of TemporalDecoder.forward (inference mode)."""
    B, T = H_t.shape
    S_max = cfg["max_seq_len"]
    L = cfg["num_layers"]
    O = cfg["output_dim"]
    H_pad = cfg["hidden_dim_padded"]
    O_pad = cfg["output_dim_padded"]
    S_run = S_max if target_seq_len is None else int(target_seq_len)
    S_in = min(S_run, S_max)            # timesteps actually produced by fc_expand
    chunk_len = min(S_run, _TIME_CHUNK)

    # Sublane-pad the batch to a multiple of 8 so every recurrent slice is tile-aligned.
    B_pad = ((B + 7) // 8) * 8
    h_pad = jnp.zeros((B_pad, T), jnp.float32).at[:B].set(H_t.astype(jnp.float32))

    # Slice fc_expand weights to the timesteps actually used (cuts HBM/VMEM/FLOPs on truncation).
    we_use = arrays["we"][:, :S_in * H_pad]
    be_use = arrays["be"][:, :S_in * H_pad]

    flat_inputs = [h_pad, we_use, be_use]
    for l in range(L):
        flat_inputs += list(arrays["layers"][l])
    flat_inputs += [arrays["wr"], arrays["br"]]

    # VMEM limit sized from actual operands + scratch + intermediates with headroom.
    operand_bytes = sum(int(a.size) * int(a.dtype.itemsize) for a in flat_inputs)
    scratch_bytes = (S_run * B_pad * H_pad + chunk_len * B_pad * 3 * H_pad) * 4
    out_bytes = S_run * B_pad * O_pad * 4
    interm_bytes = (B_pad * S_in * H_pad                      # 'expanded'
                    + S_run * B_pad * O_pad                   # fc_reconstruct value
                    + 2 * chunk_len * B_pad * 3 * H_pad) * 4  # gi chunk working set
    vmem_limit = int(1.3 * (operand_bytes + scratch_bytes + out_bytes + interm_bytes))
    vmem_limit = min(max(vmem_limit, 32 * 1024 * 1024), 100 * 1024 * 1024)

    kernel = functools.partial(_decoder_kernel, L, B_pad, S_run, S_in, H_pad, chunk_len)

    out2d = pl.pallas_call(
        kernel,
        out_shape=jax.ShapeDtypeStruct((S_run * B_pad, O_pad), jnp.float32),
        scratch_shapes=[pltpu.VMEM((S_run * B_pad, H_pad), jnp.float32),        # activations
                        pltpu.VMEM((chunk_len * B_pad, 3 * H_pad), jnp.float32)],  # gi chunk
        compiler_params=pltpu.CompilerParams(vmem_limit_bytes=vmem_limit),
    )(*flat_inputs)

    # Time-major lane-dense slab -> (B, S_run, O)
    out = out2d.reshape(S_run, B_pad, O_pad)[:, :B, :O]
    return jnp.transpose(out, (1, 0, 2))


# --------------------------- Pure-JAX reference ---------------------------

def _ref_gru_layer(x_bsh, w_ih, w_hh, b_ih, b_hh):
    B, S, H = x_bsh.shape

    def step(h, x_t):
        gi = x_t @ w_ih.T + b_ih
        gh = h @ w_hh.T + b_hh
        i_r, i_z, i_n = jnp.split(gi, 3, axis=-1)
        h_r, h_z, h_n = jnp.split(gh, 3, axis=-1)
        r = jax.nn.sigmoid(i_r + h_r)
        z = jax.nn.sigmoid(i_z + h_z)
        n = jnp.tanh(i_n + r * h_n)
        h_new = (1.0 - z) * n + z * h
        return h_new, h_new

    h0 = jnp.zeros((B, H), jnp.float32)
    _, ys = jax.lax.scan(step, h0, jnp.transpose(x_bsh, (1, 0, 2)))
    return jnp.transpose(ys, (1, 0, 2))


def _ref_forward(params, H_t, target_seq_len=None):
    B = H_t.shape[0]
    S, H, O = params["max_seq_len"], params["hidden_dim"], params["output_dim"]
    seq_len = S if target_seq_len is None else target_seq_len
    x = (H_t @ params["fc_expand_w"].T + params["fc_expand_b"]).reshape(B, S, H)
    if seq_len < S:
        x = x[:, :seq_len, :]
    elif seq_len > S:
        x = jnp.concatenate([x, jnp.zeros((B, seq_len - S, H), x.dtype)], axis=1)
    for l in range(params["num_layers"]):
        x = _ref_gru_layer(x, params[f"gru_w_ih_l{l}"], params[f"gru_w_hh_l{l}"],
                           params[f"gru_b_ih_l{l}"], params[f"gru_b_hh_l{l}"])
    y = x @ params["fc_reconstruct_w"].T + params["fc_reconstruct_b"]
    return y.reshape(B, seq_len, O)


# --------------------------------- Main -----------------------------------

if __name__ == "__main__":
    batch = 2
    temporal_dimension = 8
    hidden_dim = 32
    num_layers = 2
    output_dim = 4
    max_seq_len = 8

    key = jax.random.PRNGKey(0)
    k_params, k_input = jax.random.split(key)
    params = init_temporal_decoder_params(
        k_params, temporal_dimension, hidden_dim, num_layers, output_dim, max_seq_len)
    H_t = jax.random.normal(k_input, (batch, temporal_dimension), jnp.float32)

    ref = jax.block_until_ready(_ref_forward(params, H_t))

    # f32 matmul-operand path: tight correctness check against PyTorch-semantics reference.
    cfg32, arrays32 = prepare_temporal_decoder(params, compute_dtype=jnp.float32)
    out32 = jax.block_until_ready(temporal_decoder_forward(cfg32, arrays32, H_t))
    assert out32.shape == (batch, max_seq_len, output_dim), out32.shape
    assert jnp.allclose(out32, ref, atol=1e-3, rtol=1e-3), float(jnp.max(jnp.abs(out32 - ref)))

    # bf16 matmul-operand path (production default): looser tolerance (operand rounding only;
    # accumulation, biases and the hidden state stay f32).
    cfg16, arrays16 = prepare_temporal_decoder(params)  # compute_dtype=bf16
    out16 = jax.block_until_ready(temporal_decoder_forward(cfg16, arrays16, H_t))
    assert out16.shape == (batch, max_seq_len, output_dim), out16.shape
    assert jnp.allclose(out16, ref, atol=5e-2, rtol=5e-2), float(jnp.max(jnp.abs(out16 - ref)))

    # Truncation and zero-pad-extension paths.
    for tsl in (5, 11):
        r2 = jax.block_until_ready(_ref_forward(params, H_t, target_seq_len=tsl))
        o32 = jax.block_until_ready(
            temporal_decoder_forward(cfg32, arrays32, H_t, target_seq_len=tsl))
        assert o32.shape == (batch, tsl, output_dim), o32.shape
        assert jnp.allclose(o32, r2, atol=1e-3, rtol=1e-3), float(jnp.max(jnp.abs(o32 - r2)))
        o16 = jax.block_until_ready(
            temporal_decoder_forward(cfg16, arrays16, H_t, target_seq_len=tsl))
        assert jnp.allclose(o16, r2, atol=5e-2, rtol=5e-2), float(jnp.max(jnp.abs(o16 - r2)))

    print("KERNEL_OK")
</pallas_src>

<mosaic_0001>
module attributes {stable_mosaic.version = 11 : i64} {
  func.func @_decoder_kernel(%arg0: memref<8x8xf32, #tpu.memory_space<vmem>>, %arg1: memref<8x1024xf32, #tpu.memory_space<vmem>>, %arg2: memref<1x1024xf32, #tpu.memory_space<vmem>>, %arg3: memref<128x384xf32, #tpu.memory_space<vmem>>, %arg4: memref<128x384xf32, #tpu.memory_space<vmem>>, %arg5: memref<1x384xf32, #tpu.memory_space<vmem>>, %arg6: memref<1x128xf32, #tpu.memory_space<vmem>>, %arg7: memref<128x384xf32, #tpu.memory_space<vmem>>, %arg8: memref<128x384xf32, #tpu.memory_space<vmem>>, %arg9: memref<1x384xf32, #tpu.memory_space<vmem>>, %arg10: memref<1x128xf32, #tpu.memory_space<vmem>>, %arg11: memref<128x128xf32, #tpu.memory_space<vmem>>, %arg12: memref<1x128xf32, #tpu.memory_space<vmem>>, %arg13: memref<64x128xf32, #tpu.memory_space<vmem>>, %arg14: memref<64x128xf32, #tpu.memory_space<vmem>>, %arg15: memref<64x384xf32, #tpu.memory_space<vmem>>) attributes {dimension_semantics = [], scalar_prefetch = 0 : i64, scratch_operands = 2 : i64, tpu.core_type = #tpu.core_type<tc>} {
    %c0 = arith.constant 0 : index
    %c0_0 = arith.constant 0 : index
    %0 = vector.load %arg0[%c0, %c0_0] : memref<8x8xf32, #tpu.memory_space<vmem>>, vector<8x8xf32>
    %c0_1 = arith.constant 0 : index
    %c0_2 = arith.constant 0 : index
    %1 = vector.load %arg1[%c0_1, %c0_2] : memref<8x1024xf32, #tpu.memory_space<vmem>>, vector<8x1024xf32>
    %cst = arith.constant dense<0.000000e+00> : vector<8x1024xf32>
    %2 = tpu.matmul %0, %1, %cst {dimension_numbers = #tpu.dot_dimension_numbers<[1], [0], [0], [1], [0, 0, 1, 1], [], []>} : vector<8x8xf32>, vector<8x1024xf32>, vector<8x1024xf32> -> vector<8x1024xf32>
    %c0_3 = arith.constant 0 : index
    %c0_4 = arith.constant 0 : index
    %3 = vector.load %arg2[%c0_3, %c0_4] : memref<1x1024xf32, #tpu.memory_space<vmem>>, vector<1x1024xf32>
    %4 = vector.broadcast %3 : vector<1x1024xf32> to vector<8x1024xf32>
    %5 = arith.addf %2, %4 : vector<8x1024xf32>
    %6 = vector.extract_strided_slice %5 {offsets = [0, 0], sizes = [8, 128], strides = [1, 1]} : vector<8x1024xf32> to vector<8x128xf32>
    %c0_5 = arith.constant 0 : index
    %c0_6 = arith.constant 0 : index
    %7 = vector.load %arg14[%c0_5, %c0_6] : memref<64x128xf32, #tpu.memory_space<vmem>>, vector<8x128xf32>
    tpu.vector_store %arg14[%c0_5, %c0_6], %6 {strides = array<i32>} : memref<64x128xf32, #tpu.memory_space<vmem>>, vector<8x128xf32>,
    %8 = vector.extract_strided_slice %5 {offsets = [0, 128], sizes = [8, 128], strides = [1, 1]} : vector<8x1024xf32> to vector<8x128xf32>
    %c8 = arith.constant 8 : index
    %c0_7 = arith.constant 0 : index
    %9 = vector.load %arg14[%c8, %c0_7] : memref<64x128xf32, #tpu.memory_space<vmem>>, vector<8x128xf32>
    tpu.vector_store %arg14[%c8, %c0_7], %8 {strides = array<i32>} : memref<64x128xf32, #tpu.memory_space<vmem>>, vector<8x128xf32>,
    %10 = vector.extract_strided_slice %5 {offsets = [0, 256], sizes = [8, 128], strides = [1, 1]} : vector<8x1024xf32> to vector<8x128xf32>
    %c16 = arith.constant 16 : index
    %c0_8 = arith.constant 0 : index
    %11 = vector.load %arg14[%c16, %c0_8] : memref<64x128xf32, #tpu.memory_space<vmem>>, vector<8x128xf32>
    tpu.vector_store %arg14[%c16, %c0_8], %10 {strides = array<i32>} : memref<64x128xf32, #tpu.memory_space<vmem>>, vector<8x128xf32>,
    %12 = vector.extract_strided_slice %5 {offsets = [0, 384], sizes = [8, 128], strides = [1, 1]} : vector<8x1024xf32> to vector<8x128xf32>
    %c24 = arith.constant 24 : index
    %c0_9 = arith.constant 0 : index
    %13 = vector.load %arg14[%c24, %c0_9] : memref<64x128xf32, #tpu.memory_space<vmem>>, vector<8x128xf32>
    tpu.vector_store %arg14[%c24, %c0_9], %12 {strides = array<i32>} : memref<64x128xf32, #tpu.memory_space<vmem>>, vector<8x128xf32>,
    %14 = vector.extract_strided_slice %5 {offsets = [0, 512], sizes = [8, 128], strides = [1, 1]} : vector<8x1024xf32> to vector<8x128xf32>
    %c32 = arith.constant 32 : index
    %c0_10 = arith.constant 0 : index
    %15 = vector.load %arg14[%c32, %c0_10] : memref<64x128xf32, #tpu.memory_space<vmem>>, vector<8x128xf32>
    tpu.vector_store %arg14[%c32, %c0_10], %14 {strides = array<i32>} : memref<64x128xf32, #tpu.memory_space<vmem>>, vector<8x128xf32>,
    %16 = vector.extract_strided_slice %5 {offsets = [0, 640], sizes = [8, 128], strides = [1, 1]} : vector<8x1024xf32> to vector<8x128xf32>
    %c40 = arith.constant 40 : index
    %c0_11 = arith.constant 0 : index
    %17 = vector.load %arg14[%c40, %c0_11] : memref<64x128xf32, #tpu.memory_space<vmem>>, vector<8x128xf32>
    tpu.vector_store %arg14[%c40, %c0_11], %16 {strides = array<i32>} : memref<64x128xf32, #tpu.memory_space<vmem>>, vector<8x128xf32>,
    %18 = vector.extract_strided_slice %5 {offsets = [0, 768], sizes = [8, 128], strides = [1, 1]} : vector<8x1024xf32> to vector<8x128xf32>
    %c48 = arith.constant 48 : index
    %c0_12 = arith.constant 0 : index
    %19 = vector.load %arg14[%c48, %c0_12] : memref<64x128xf32, #tpu.memory_space<vmem>>, vector<8x128xf32>
    tpu.vector_store %arg14[%c48, %c0_12], %18 {strides = array<i32>} : memref<64x128xf32, #tpu.memory_space<vmem>>, vector<8x128xf32>,
    %20 = vector.extract_strided_slice %5 {offsets = [0, 896], sizes = [8, 128], strides = [1, 1]} : vector<8x1024xf32> to vector<8x128xf32>
    %c56 = arith.constant 56 : index
    %c0_13 = arith.constant 0 : index
    %21 = vector.load %arg14[%c56, %c0_13] : memref<64x128xf32, #tpu.memory_space<vmem>>, vector<8x128xf32>
    tpu.vector_store %arg14[%c56, %c0_13], %20 {strides = array<i32>} : memref<64x128xf32, #tpu.memory_space<vmem>>, vector<8x128xf32>,
    %c0_14 = arith.constant 0 : index
    %c0_15 = arith.constant 0 : index
    %22 = vector.load %arg3[%c0_14, %c0_15] : memref<128x384xf32, #tpu.memory_space<vmem>>, vector<128x384xf32>
    %c0_16 = arith.constant 0 : index
    %c0_17 = arith.constant 0 : index
    %23 = vector.load %arg4[%c0_16, %c0_17] : memref<128x384xf32, #tpu.memory_space<vmem>>, vector<128x384xf32>
    %c0_18 = arith.constant 0 : index
    %c0_19 = arith.constant 0 : index
    %24 = vector.load %arg5[%c0_18, %c0_19] : memref<1x384xf32, #tpu.memory_space<vmem>>, vector<1x384xf32>
    %c0_20 = arith.constant 0 : index
    %c0_21 = arith.constant 0 : index
    %25 = vector.load %arg6[%c0_20, %c0_21] : memref<1x128xf32, #tpu.memory_space<vmem>>, vector<1x128xf32>
    %cst_22 = arith.constant 0.000000e+00 : f32
    %26 = vector.broadcast %cst_22 : f32 to vector<8x128xf32>
    %c0_23 = arith.constant 0 : index
    %c0_24 = arith.constant 0 : index
    %27 = vector.load %arg14[%c0_23, %c0_24] : memref<64x128xf32, #tpu.memory_space<vmem>>, vector<64x128xf32>
    %cst_25 = arith.constant dense<0.000000e+00> : vector<64x384xf32>
    %28 = tpu.matmul %27, %22, %cst_25 {dimension_numbers = #tpu.dot_dimension_numbers<[1], [0], [0], [1], [0, 0, 1, 1], [], []>} : vector<64x128xf32>, vector<128x384xf32>, vector<64x384xf32> -> vector<64x384xf32>
    %29 = vector.broadcast %24 : vector<1x384xf32> to vector<64x384xf32>
    %30 = arith.addf %28, %29 : vector<64x384xf32>
    %c0_26 = arith.constant 0 : index
    %c0_27 = arith.constant 0 : index
    %31 = vector.load %arg15[%c0_26, %c0_27] : memref<64x384xf32, #tpu.memory_space<vmem>>, vector<64x384xf32>
    tpu.vector_store %arg15[%c0_26, %c0_27], %30 {strides = array<i32>} : memref<64x384xf32, #tpu.memory_space<vmem>>, vector<64x384xf32>,
    %c0_i32 = arith.constant 0 : i32
    %c8_i32 = arith.constant 8 : i32
    %32 = arith.muli %c0_i32, %c8_i32 : i32
    %33 = tpu.assume_multiple %32, 8 : i32
    %34 = arith.index_cast %33 : i32 to index
    %c0_28 = arith.constant 0 : index
    %35 = vector.load %arg15[%34, %c0_28] : memref<64x384xf32, #tpu.memory_space<vmem>>, vector<8x384xf32>
    %cst_29 = arith.constant dense<0.000000e+00> : vector<8x384xf32>
    %36 = tpu.matmul %26, %23, %cst_29 {dimension_numbers = #tpu.dot_dimension_numbers<[1], [0], [0], [1], [0, 0, 1, 1], [], []>} : vector<8x128xf32>, vector<128x384xf32>, vector<8x384xf32> -> vector<8x384xf32>
    %37 = vector.extract_strided_slice %35 {offsets = [0, 0], sizes = [8, 128], strides = [1, 1]} : vector<8x384xf32> to vector<8x128xf32>
    %38 = vector.extract_strided_slice %36 {offsets = [0, 0], sizes = [8, 128], strides = [1, 1]} : vector<8x384xf32> to vector<8x128xf32>
    %39 = arith.addf %37, %38 : vector<8x128xf32>
    %40 = arith.negf %39 : vector<8x128xf32>
    %41 = math.exp %40 : vector<8x128xf32>
    %cst_30 = arith.constant 1.000000e+00 : f32
    %42 = vector.broadcast %cst_30 : f32 to vector<8x128xf32>
    %43 = arith.addf %42, %41 : vector<8x128xf32>
    %44 = arith.divf %42, %43 : vector<8x128xf32>
    %45 = vector.extract_strided_slice %35 {offsets = [0, 128], sizes = [8, 128], strides = [1, 1]} : vector<8x384xf32> to vector<8x128xf32>
    %46 = vector.extract_strided_slice %36 {offsets = [0, 128], sizes = [8, 128], strides = [1, 1]} : vector<8x384xf32> to vector<8x128xf32>
    %47 = arith.addf %45, %46 : vector<8x128xf32>
    %48 = arith.negf %47 : vector<8x128xf32>
    %49 = math.exp %48 : vector<8x128xf32>
    %cst_31 = arith.constant 1.000000e+00 : f32
    %50 = vector.broadcast %cst_31 : f32 to vector<8x128xf32>
    %51 = arith.addf %50, %49 : vector<8x128xf32>
    %52 = arith.divf %50, %51 : vector<8x128xf32>
    %53 = vector.extract_strided_slice %35 {offsets = [0, 256], sizes = [8, 128], strides = [1, 1]} : vector<8x384xf32> to vector<8x128xf32>
    %54 = vector.extract_strided_slice %36 {offsets = [0, 256], sizes = [8, 128], strides = [1, 1]} : vector<8x384xf32> to vector<8x128xf32>
    %55 = vector.broadcast %25 : vector<1x128xf32> to vector<8x128xf32>
    %56 = arith.addf %54, %55 : vector<8x128xf32>
    %57 = arith.mulf %44, %56 : vector<8x128xf32>
    %58 = arith.addf %53, %57 : vector<8x128xf32>
    %59 = math.tanh %58 : vector<8x128xf32>
    %cst_32 = arith.constant 1.000000e+00 : f32
    %60 = vector.broadcast %cst_32 : f32 to vector<8x128xf32>
    %61 = arith.subf %60, %52 : vector<8x128xf32>
    %62 = arith.mulf %61, %59 : vector<8x128xf32>
    %63 = arith.mulf %52, %26 : vector<8x128xf32>
    %64 = arith.addf %62, %63 : vector<8x128xf32>
    %c8_i32_33 = arith.constant 8 : i32
    %65 = arith.muli %c0_i32, %c8_i32_33 : i32
    %c0_i32_34 = arith.constant 0 : i32
    %66 = arith.addi %c0_i32_34, %65 : i32
    %67 = tpu.assume_multiple %66, 8 : i32
    %68 = arith.index_cast %67 : i32 to index
    %c0_35 = arith.constant 0 : index
    %69 = vector.load %arg14[%68, %c0_35] : memref<64x128xf32, #tpu.memory_space<vmem>>, vector<8x128xf32>
    tpu.vector_store %arg14[%68, %c0_35], %64 {strides = array<i32>} : memref<64x128xf32, #tpu.memory_space<vmem>>, vector<8x128xf32>,
    %c1_i32 = arith.constant 1 : i32
    %c8_i32_36 = arith.constant 8 : i32
    %70 = arith.muli %c1_i32, %c8_i32_36 : i32
    %71 = tpu.assume_multiple %70, 8 : i32
    %72 = arith.index_cast %71 : i32 to index
    %c0_37 = arith.constant 0 : index
    %73 = vector.load %arg15[%72, %c0_37] : memref<64x384xf32, #tpu.memory_space<vmem>>, vector<8x384xf32>
    %cst_38 = arith.constant dense<0.000000e+00> : vector<8x384xf32>
    %74 = tpu.matmul %64, %23, %cst_38 {dimension_numbers = #tpu.dot_dimension_numbers<[1], [0], [0], [1], [0, 0, 1, 1], [], []>} : vector<8x128xf32>, vector<128x384xf32>, vector<8x384xf32> -> vector<8x384xf32>
    %75 = vector.extract_strided_slice %73 {offsets = [0, 0], sizes = [8, 128], strides = [1, 1]} : vector<8x384xf32> to vector<8x128xf32>
    %76 = vector.extract_strided_slice %74 {offsets = [0, 0], sizes = [8, 128], strides = [1, 1]} : vector<8x384xf32> to vector<8x128xf32>
    %77 = arith.addf %75, %76 : vector<8x128xf32>
    %78 = arith.negf %77 : vector<8x128xf32>
    %79 = math.exp %78 : vector<8x128xf32>
    %cst_39 = arith.constant 1.000000e+00 : f32
    %80 = vector.broadcast %cst_39 : f32 to vector<8x128xf32>
    %81 = arith.addf %80, %79 : vector<8x128xf32>
    %82 = arith.divf %80, %81 : vector<8x128xf32>
    %83 = vector.extract_strided_slice %73 {offsets = [0, 128], sizes = [8, 128], strides = [1, 1]} : vector<8x384xf32> to vector<8x128xf32>
    %84 = vector.extract_strided_slice %74 {offsets = [0, 128], sizes = [8, 128], strides = [1, 1]} : vector<8x384xf32> to vector<8x128xf32>
    %85 = arith.addf %83, %84 : vector<8x128xf32>
    %86 = arith.negf %85 : vector<8x128xf32>
    %87 = math.exp %86 : vector<8x128xf32>
    %cst_40 = arith.constant 1.000000e+00 : f32
    %88 = vector.broadcast %cst_40 : f32 to vector<8x128xf32>
    %89 = arith.addf %88, %87 : vector<8x128xf32>
    %90 = arith.divf %88, %89 : vector<8x128xf32>
    %91 = vector.extract_strided_slice %73 {offsets = [0, 256], sizes = [8, 128], strides = [1, 1]} : vector<8x384xf32> to vector<8x128xf32>
    %92 = vector.extract_strided_slice %74 {offsets = [0, 256], sizes = [8, 128], strides = [1, 1]} : vector<8x384xf32> to vector<8x128xf32>
    %93 = vector.broadcast %25 : vector<1x128xf32> to vector<8x128xf32>
    %94 = arith.addf %92, %93 : vector<8x128xf32>
    %95 = arith.mulf %82, %94 : vector<8x128xf32>
    %96 = arith.addf %91, %95 : vector<8x128xf32>
    %97 = math.tanh %96 : vector<8x128xf32>
    %cst_41 = arith.constant 1.000000e+00 : f32
    %98 = vector.broadcast %cst_41 : f32 to vector<8x128xf32>
    %99 = arith.subf %98, %90 : vector<8x128xf32>
    %100 = arith.mulf %99, %97 : vector<8x128xf32>
    %101 = arith.mulf %90, %64 : vector<8x128xf32>
    %102 = arith.addf %100, %101 : vector<8x128xf32>
    %c8_i32_42 = arith.constant 8 : i32
    %103 = arith.muli %c1_i32, %c8_i32_42 : i32
    %c0_i32_43 = arith.constant 0 : i32
    %104 = arith.addi %c0_i32_43, %103 : i32
    %105 = tpu.assume_multiple %104, 8 : i32
    %106 = arith.index_cast %105 : i32 to index
    %c0_44 = arith.constant 0 : index
    %107 = vector.load %arg14[%106, %c0_44] : memref<64x128xf32, #tpu.memory_space<vmem>>, vector<8x128xf32>
    tpu.vector_store %arg14[%106, %c0_44], %102 {strides = array<i32>} : memref<64x128xf32, #tpu.memory_space<vmem>>, vector<8x128xf32>,
    %c2_i32 = arith.constant 2 : i32
    %c8_i32_45 = arith.constant 8 : i32
    %108 = arith.muli %c2_i32, %c8_i32_45 : i32
    %109 = tpu.assume_multiple %108, 8 : i32
    %110 = arith.index_cast %109 : i32 to index
    %c0_46 = arith.constant 0 : index
    %111 = vector.load %arg15[%110, %c0_46] : memref<64x384xf32, #tpu.memory_space<vmem>>, vector<8x384xf32>
    %cst_47 = arith.constant dense<0.000000e+00> : vector<8x384xf32>
    %112 = tpu.matmul %102, %23, %cst_47 {dimension_numbers = #tpu.dot_dimension_numbers<[1], [0], [0], [1], [0, 0, 1, 1], [], []>} : vector<8x128xf32>, vector<128x384xf32>, vector<8x384xf32> -> vector<8x384xf32>
    %113 = vector.extract_strided_slice %111 {offsets = [0, 0], sizes = [8, 128], strides = [1, 1]} : vector<8x384xf32> to vector<8x128xf32>
    %114 = vector.extract_strided_slice %112 {offsets = [0, 0], sizes = [8, 128], strides = [1, 1]} : vector<8x384xf32> to vector<8x128xf32>
    %115 = arith.addf %113, %114 : vector<8x128xf32>
    %116 = arith.negf %115 : vector<8x128xf32>
    %117 = math.exp %116 : vector<8x128xf32>
    %cst_48 = arith.constant 1.000000e+00 : f32
    %118 = vector.broadcast %cst_48 : f32 to vector<8x128xf32>
    %119 = arith.addf %118, %117 : vector<8x128xf32>
    %120 = arith.divf %118, %119 : vector<8x128xf32>
    %121 = vector.extract_strided_slice %111 {offsets = [0, 128], sizes = [8, 128], strides = [1, 1]} : vector<8x384xf32> to vector<8x128xf32>
    %122 = vector.extract_strided_slice %112 {offsets = [0, 128], sizes = [8, 128], strides = [1, 1]} : vector<8x384xf32> to vector<8x128xf32>
    %123 = arith.addf %121, %122 : vector<8x128xf32>
    %124 = arith.negf %123 : vector<8x128xf32>
    %125 = math.exp %124 : vector<8x128xf32>
    %cst_49 = arith.constant 1.000000e+00 : f32
    %126 = vector.broadcast %cst_49 : f32 to vector<8x128xf32>
    %127 = arith.addf %126, %125 : vector<8x128xf32>
    %128 = arith.divf %126, %127 : vector<8x128xf32>
    %129 = vector.extract_strided_slice %111 {offsets = [0, 256], sizes = [8, 128], strides = [1, 1]} : vector<8x384xf32> to vector<8x128xf32>
    %130 = vector.extract_strided_slice %112 {offsets = [0, 256], sizes = [8, 128], strides = [1, 1]} : vector<8x384xf32> to vector<8x128xf32>
    %131 = vector.broadcast %25 : vector<1x128xf32> to vector<8x128xf32>
    %132 = arith.addf %130, %131 : vector<8x128xf32>
    %133 = arith.mulf %120, %132 : vector<8x128xf32>
    %134 = arith.addf %129, %133 : vector<8x128xf32>
    %135 = math.tanh %134 : vector<8x128xf32>
    %cst_50 = arith.constant 1.000000e+00 : f32
    %136 = vector.broadcast %cst_50 : f32 to vector<8x128xf32>
    %137 = arith.subf %136, %128 : vector<8x128xf32>
    %138 = arith.mulf %137, %135 : vector<8x128xf32>
    %139 = arith.mulf %128, %102 : vector<8x128xf32>
    %140 = arith.addf %138, %139 : vector<8x128xf32>
    %c8_i32_51 = arith.constant 8 : i32
    %141 = arith.muli %c2_i32, %c8_i32_51 : i32
    %c0_i32_52 = arith.constant 0 : i32
    %142 = arith.addi %c0_i32_52, %141 : i32
    %143 = tpu.assume_multiple %142, 8 : i32
    %144 = arith.index_cast %143 : i32 to index
    %c0_53 = arith.constant 0 : index
    %145 = vector.load %arg14[%144, %c0_53] : memref<64x128xf32, #tpu.memory_space<vmem>>, vector<8x128xf32>
    tpu.vector_store %arg14[%144, %c0_53], %140 {strides = array<i32>} : memref<64x128xf32, #tpu.memory_space<vmem>>, vector<8x128xf32>,
    %c3_i32 = arith.constant 3 : i32
    %c8_i32_54 = arith.constant 8 : i32
    %146 = arith.muli %c3_i32, %c8_i32_54 : i32
    %147 = tpu.assume_multiple %146, 8 : i32
    %148 = arith.index_cast %147 : i32 to index
    %c0_55 = arith.constant 0 : index
    %149 = vector.load %arg15[%148, %c0_55] : memref<64x384xf32, #tpu.memory_space<vmem>>, vector<8x384xf32>
    %cst_56 = arith.constant dense<0.000000e+00> : vector<8x384xf32>
    %150 = tpu.matmul %140, %23, %cst_56 {dimension_numbers = #tpu.dot_dimension_numbers<[1], [0], [0], [1], [0, 0, 1, 1], [], []>} : vector<8x128xf32>, vector<128x384xf32>, vector<8x384xf32> -> vector<8x384xf32>
    %151 = vector.extract_strided_slice %149 {offsets = [0, 0], sizes = [8, 128], strides = [1, 1]} : vector<8x384xf32> to vector<8x128xf32>
    %152 = vector.extract_strided_slice %150 {offsets = [0, 0], sizes = [8, 128], strides = [1, 1]} : vector<8x384xf32> to vector<8x128xf32>
    %153 = arith.addf %151, %152 : vector<8x128xf32>
    %154 = arith.negf %153 : vector<8x128xf32>
    %155 = math.exp %154 : vector<8x128xf32>
    %cst_57 = arith.constant 1.000000e+00 : f32
    %156 = vector.broadcast %cst_57 : f32 to vector<8x128xf32>
    %157 = arith.addf %156, %155 : vector<8x128xf32>
    %158 = arith.divf %156, %157 : vector<8x128xf32>
    %159 = vector.extract_strided_slice %149 {offsets = [0, 128], sizes = [8, 128], strides = [1, 1]} : vector<8x384xf32> to vector<8x128xf32>
    %160 = vector.extract_strided_slice %150 {offsets = [0, 128], sizes = [8, 128], strides = [1, 1]} : vector<8x384xf32> to vector<8x128xf32>
    %161 = arith.addf %159, %160 : vector<8x128xf32>
    %162 = arith.negf %161 : vector<8x128xf32>
    %163 = math.exp %162 : vector<8x128xf32>
    %cst_58 = arith.constant 1.000000e+00 : f32
    %164 = vector.broadcast %cst_58 : f32 to vector<8x128xf32>
    %165 = arith.addf %164, %163 : vector<8x128xf32>
    %166 = arith.divf %164, %165 : vector<8x128xf32>
    %167 = vector.extract_strided_slice %149 {offsets = [0, 256], sizes = [8, 128], strides = [1, 1]} : vector<8x384xf32> to vector<8x128xf32>
    %168 = vector.extract_strided_slice %150 {offsets = [0, 256], sizes = [8, 128], strides = [1, 1]} : vector<8x384xf32> to vector<8x128xf32>
    %169 = vector.broadcast %25 : vector<1x128xf32> to vector<8x128xf32>
    %170 = arith.addf %168, %169 : vector<8x128xf32>
    %171 = arith.mulf %158, %170 : vector<8x128xf32>
    %172 = arith.addf %167, %171 : vector<8x128xf32>
    %173 = math.tanh %172 : vector<8x128xf32>
    %cst_59 = arith.constant 1.000000e+00 : f32
    %174 = vector.broadcast %cst_59 : f32 to vector<8x128xf32>
    %175 = arith.subf %174, %166 : vector<8x128xf32>
    %176 = arith.mulf %175, %173 : vector<8x128xf32>
    %177 = arith.mulf %166, %140 : vector<8x128xf32>
    %178 = arith.addf %176, %177 : vector<8x128xf32>
    %c8_i32_60 = arith.constant 8 : i32
    %179 = arith.muli %c3_i32, %c8_i32_60 : i32
    %c0_i32_61 = arith.constant 0 : i32
    %180 = arith.addi %c0_i32_61, %179 : i32
    %181 = tpu.assume_multiple %180, 8 : i32
    %182 = arith.index_cast %181 : i32 to index
    %c0_62 = arith.constant 0 : index
    %183 = vector.load %arg14[%182, %c0_62] : memref<64x128xf32, #tpu.memory_space<vmem>>, vector<8x128xf32>
    tpu.vector_store %arg14[%182, %c0_62], %178 {strides = array<i32>} : memref<64x128xf32, #tpu.memory_space<vmem>>, vector<8x128xf32>,
    %c4_i32 = arith.constant 4 : i32
    %c8_i32_63 = arith.constant 8 : i32
    %184 = arith.muli %c4_i32, %c8_i32_63 : i32
    %185 = tpu.assume_multiple %184, 8 : i32
    %186 = arith.index_cast %185 : i32 to index
    %c0_64 = arith.constant 0 : index
    %187 = vector.load %arg15[%186, %c0_64] : memref<64x384xf32, #tpu.memory_space<vmem>>, vector<8x384xf32>
    %cst_65 = arith.constant dense<0.000000e+00> : vector<8x384xf32>
    %188 = tpu.matmul %178, %23, %cst_65 {dimension_numbers = #tpu.dot_dimension_numbers<[1], [0], [0], [1], [0, 0, 1, 1], [], []>} : vector<8x128xf32>, vector<128x384xf32>, vector<8x384xf32> -> vector<8x384xf32>
    %189 = vector.extract_strided_slice %187 {offsets = [0, 0], sizes = [8, 128], strides = [1, 1]} : vector<8x384xf32> to vector<8x128xf32>
    %190 = vector.extract_strided_slice %188 {offsets = [0, 0], sizes = [8, 128], strides = [1, 1]} : vector<8x384xf32> to vector<8x128xf32>
    %191 = arith.addf %189, %190 : vector<8x128xf32>
    %192 = arith.negf %191 : vector<8x128xf32>
    %193 = math.exp %192 : vector<8x128xf32>
    %cst_66 = arith.constant 1.000000e+00 : f32
    %194 = vector.broadcast %cst_66 : f32 to vector<8x128xf32>
    %195 = arith.addf %194, %193 : vector<8x128xf32>
    %196 = arith.divf %194, %195 : vector<8x128xf32>
    %197 = vector.extract_strided_slice %187 {offsets = [0, 128], sizes = [8, 128], strides = [1, 1]} : vector<8x384xf32> to vector<8x128xf32>
    %198 = vector.extract_strided_slice %188 {offsets = [0, 128], sizes = [8, 128], strides = [1, 1]} : vector<8x384xf32> to vector<8x128xf32>
    %199 = arith.addf %197, %198 : vector<8x128xf32>
    %200 = arith.negf %199 : vector<8x128xf32>
    %201 = math.exp %200 : vector<8x128xf32>
    %cst_67 = arith.constant 1.000000e+00 : f32
    %202 = vector.broadcast %cst_67 : f32 to vector<8x128xf32>
    %203 = arith.addf %202, %201 : vector<8x128xf32>
    %204 = arith.divf %202, %203 : vector<8x128xf32>
    %205 = vector.extract_strided_slice %187 {offsets = [0, 256], sizes = [8, 128], strides = [1, 1]} : vector<8x384xf32> to vector<8x128xf32>
    %206 = vector.extract_strided_slice %188 {offsets = [0, 256], sizes = [8, 128], strides = [1, 1]} : vector<8x384xf32> to vector<8x128xf32>
    %207 = vector.broadcast %25 : vector<1x128xf32> to vector<8x128xf32>
    %208 = arith.addf %206, %207 : vector<8x128xf32>
    %209 = arith.mulf %196, %208 : vector<8x128xf32>
    %210 = arith.addf %205, %209 : vector<8x128xf32>
    %211 = math.tanh %210 : vector<8x128xf32>
    %cst_68 = arith.constant 1.000000e+00 : f32
    %212 = vector.broadcast %cst_68 : f32 to vector<8x128xf32>
    %213 = arith.subf %212, %204 : vector<8x128xf32>
    %214 = arith.mulf %213, %211 : vector<8x128xf32>
    %215 = arith.mulf %204, %178 : vector<8x128xf32>
    %216 = arith.addf %214, %215 : vector<8x128xf32>
    %c8_i32_69 = arith.constant 8 : i32
    %217 = arith.muli %c4_i32, %c8_i32_69 : i32
    %c0_i32_70 = arith.constant 0 : i32
    %218 = arith.addi %c0_i32_70, %217 : i32
    %219 = tpu.assume_multiple %218, 8 : i32
    %220 = arith.index_cast %219 : i32 to index
    %c0_71 = arith.constant 0 : index
    %221 = vector.load %arg14[%220, %c0_71] : memref<64x128xf32, #tpu.memory_space<vmem>>, vector<8x128xf32>
    tpu.vector_store %arg14[%220, %c0_71], %216 {strides = array<i32>} : memref<64x128xf32, #tpu.memory_space<vmem>>, vector<8x128xf32>,
    %c5_i32 = arith.constant 5 : i32
    %c8_i32_72 = arith.constant 8 : i32
    %222 = arith.muli %c5_i32, %c8_i32_72 : i32
    %223 = tpu.assume_multiple %222, 8 : i32
    %224 = arith.index_cast %223 : i32 to index
    %c0_73 = arith.constant 0 : index
    %225 = vector.load %arg15[%224, %c0_73] : memref<64x384xf32, #tpu.memory_space<vmem>>, vector<8x384xf32>
    %cst_74 = arith.constant dense<0.000000e+00> : vector<8x384xf32>
    %226 = tpu.matmul %216, %23, %cst_74 {dimension_numbers = #tpu.dot_dimension_numbers<[1], [0], [0], [1], [0, 0, 1, 1], [], []>} : vector<8x128xf32>, vector<128x384xf32>, vector<8x384xf32> -> vector<8x384xf32>
    %227 = vector.extract_strided_slice %225 {offsets = [0, 0], sizes = [8, 128], strides = [1, 1]} : vector<8x384xf32> to vector<8x128xf32>
    %228 = vector.extract_strided_slice %226 {offsets = [0, 0], sizes = [8, 128], strides = [1, 1]} : vector<8x384xf32> to vector<8x128xf32>
    %229 = arith.addf %227, %228 : vector<8x128xf32>
    %230 = arith.negf %229 : vector<8x128xf32>
    %231 = math.exp %230 : vector<8x128xf32>
    %cst_75 = arith.constant 1.000000e+00 : f32
    %232 = vector.broadcast %cst_75 : f32 to vector<8x128xf32>
    %233 = arith.addf %232, %231 : vector<8x128xf32>
    %234 = arith.divf %232, %233 : vector<8x128xf32>
    %235 = vector.extract_strided_slice %225 {offsets = [0, 128], sizes = [8, 128], strides = [1, 1]} : vector<8x384xf32> to vector<8x128xf32>
    %236 = vector.extract_strided_slice %226 {offsets = [0, 128], sizes = [8, 128], strides = [1, 1]} : vector<8x384xf32> to vector<8x128xf32>
    %237 = arith.addf %235, %236 : vector<8x128xf32>
    %238 = arith.negf %237 : vector<8x128xf32>
    %239 = math.exp %238 : vector<8x128xf32>
    %cst_76 = arith.constant 1.000000e+00 : f32
    %240 = vector.broadcast %cst_76 : f32 to vector<8x128xf32>
    %241 = arith.addf %240, %239 : vector<8x128xf32>
    %242 = arith.divf %240, %241 : vector<8x128xf32>
    %243 = vector.extract_strided_slice %225 {offsets = [0, 256], sizes = [8, 128], strides = [1, 1]} : vector<8x384xf32> to vector<8x128xf32>
    %244 = vector.extract_strided_slice %226 {offsets = [0, 256], sizes = [8, 128], strides = [1, 1]} : vector<8x384xf32> to vector<8x128xf32>
    %245 = vector.broadcast %25 : vector<1x128xf32> to vector<8x128xf32>
    %246 = arith.addf %244, %245 : vector<8x128xf32>
    %247 = arith.mulf %234, %246 : vector<8x128xf32>
    %248 = arith.addf %243, %247 : vector<8x128xf32>
    %249 = math.tanh %248 : vector<8x128xf32>
    %cst_77 = arith.constant 1.000000e+00 : f32
    %250 = vector.broadcast %cst_77 : f32 to vector<8x128xf32>
    %251 = arith.subf %250, %242 : vector<8x128xf32>
    %252 = arith.mulf %251, %249 : vector<8x128xf32>
    %253 = arith.mulf %242, %216 : vector<8x128xf32>
    %254 = arith.addf %252, %253 : vector<8x128xf32>
    %c8_i32_78 = arith.constant 8 : i32
    %255 = arith.muli %c5_i32, %c8_i32_78 : i32
    %c0_i32_79 = arith.constant 0 : i32
    %256 = arith.addi %c0_i32_79, %255 : i32
    %257 = tpu.assume_multiple %256, 8 : i32
    %258 = arith.index_cast %257 : i32 to index
    %c0_80 = arith.constant 0 : index
    %259 = vector.load %arg14[%258, %c0_80] : memref<64x128xf32, #tpu.memory_space<vmem>>, vector<8x128xf32>
    tpu.vector_store %arg14[%258, %c0_80], %254 {strides = array<i32>} : memref<64x128xf32, #tpu.memory_space<vmem>>, vector<8x128xf32>,
    %c6_i32 = arith.constant 6 : i32
    %c8_i32_81 = arith.constant 8 : i32
    %260 = arith.muli %c6_i32, %c8_i32_81 : i32
    %261 = tpu.assume_multiple %260, 8 : i32
    %262 = arith.index_cast %261 : i32 to index
    %c0_82 = arith.constant 0 : index
    %263 = vector.load %arg15[%262, %c0_82] : memref<64x384xf32, #tpu.memory_space<vmem>>, vector<8x384xf32>
    %cst_83 = arith.constant dense<0.000000e+00> : vector<8x384xf32>
    %264 = tpu.matmul %254, %23, %cst_83 {dimension_numbers = #tpu.dot_dimension_numbers<[1], [0], [0], [1], [0, 0, 1, 1], [], []>} : vector<8x128xf32>, vector<128x384xf32>, vector<8x384xf32> -> vector<8x384xf32>
    %265 = vector.extract_strided_slice %263 {offsets = [0, 0], sizes = [8, 128], strides = [1, 1]} : vector<8x384xf32> to vector<8x128xf32>
    %266 = vector.extract_strided_slice %264 {offsets = [0, 0], sizes = [8, 128], strides = [1, 1]} : vector<8x384xf32> to vector<8x128xf32>
    %267 = arith.addf %265, %266 : vector<8x128xf32>
    %268 = arith.negf %267 : vector<8x128xf32>
    %269 = math.exp %268 : vector<8x128xf32>
    %cst_84 = arith.constant 1.000000e+00 : f32
    %270 = vector.broadcast %cst_84 : f32 to vector<8x128xf32>
    %271 = arith.addf %270, %269 : vector<8x128xf32>
    %272 = arith.divf %270, %271 : vector<8x128xf32>
    %273 = vector.extract_strided_slice %263 {offsets = [0, 128], sizes = [8, 128], strides = [1, 1]} : vector<8x384xf32> to vector<8x128xf32>
    %274 = vector.extract_strided_slice %264 {offsets = [0, 128], sizes = [8, 128], strides = [1, 1]} : vector<8x384xf32> to vector<8x128xf32>
    %275 = arith.addf %273, %274 : vector<8x128xf32>
    %276 = arith.negf %275 : vector<8x128xf32>
    %277 = math.exp %276 : vector<8x128xf32>
    %cst_85 = arith.constant 1.000000e+00 : f32
    %278 = vector.broadcast %cst_85 : f32 to vector<8x128xf32>
    %279 = arith.addf %278, %277 : vector<8x128xf32>
    %280 = arith.divf %278, %279 : vector<8x128xf32>
    %281 = vector.extract_strided_slice %263 {offsets = [0, 256], sizes = [8, 128], strides = [1, 1]} : vector<8x384xf32> to vector<8x128xf32>
    %282 = vector.extract_strided_slice %264 {offsets = [0, 256], sizes = [8, 128], strides = [1, 1]} : vector<8x384xf32> to vector<8x128xf32>
    %283 = vector.broadcast %25 : vector<1x128xf32> to vector<8x128xf32>
    %284 = arith.addf %282, %283 : vector<8x128xf32>
    %285 = arith.mulf %272, %284 : vector<8x128xf32>
    %286 = arith.addf %281, %285 : vector<8x128xf32>
    %287 = math.tanh %286 : vector<8x128xf32>
    %cst_86 = arith.constant 1.000000e+00 : f32
    %288 = vector.broadcast %cst_86 : f32 to vector<8x128xf32>
    %289 = arith.subf %288, %280 : vector<8x128xf32>
    %290 = arith.mulf %289, %287 : vector<8x128xf32>
    %291 = arith.mulf %280, %254 : vector<8x128xf32>
    %292 = arith.addf %290, %291 : vector<8x128xf32>
    %c8_i32_87 = arith.constant 8 : i32
    %293 = arith.muli %c6_i32, %c8_i32_87 : i32
    %c0_i32_88 = arith.constant 0 : i32
    %294 = arith.addi %c0_i32_88, %293 : i32
    %295 = tpu.assume_multiple %294, 8 : i32
    %296 = arith.index_cast %295 : i32 to index
    %c0_89 = arith.constant 0 : index
    %297 = vector.load %arg14[%296, %c0_89] : memref<64x128xf32, #tpu.memory_space<vmem>>, vector<8x128xf32>
    tpu.vector_store %arg14[%296, %c0_89], %292 {strides = array<i32>} : memref<64x128xf32, #tpu.memory_space<vmem>>, vector<8x128xf32>,
    %c7_i32 = arith.constant 7 : i32
    %c8_i32_90 = arith.constant 8 : i32
    %298 = arith.muli %c7_i32, %c8_i32_90 : i32
    %299 = tpu.assume_multiple %298, 8 : i32
    %300 = arith.index_cast %299 : i32 to index
    %c0_91 = arith.constant 0 : index
    %301 = vector.load %arg15[%300, %c0_91] : memref<64x384xf32, #tpu.memory_space<vmem>>, vector<8x384xf32>
    %cst_92 = arith.constant dense<0.000000e+00> : vector<8x384xf32>
    %302 = tpu.matmul %292, %23, %cst_92 {dimension_numbers = #tpu.dot_dimension_numbers<[1], [0], [0], [1], [0, 0, 1, 1], [], []>} : vector<8x128xf32>, vector<128x384xf32>, vector<8x384xf32> -> vector<8x384xf32>
    %303 = vector.extract_strided_slice %301 {offsets = [0, 0], sizes = [8, 128], strides = [1, 1]} : vector<8x384xf32> to vector<8x128xf32>
    %304 = vector.extract_strided_slice %302 {offsets = [0, 0], sizes = [8, 128], strides = [1, 1]} : vector<8x384xf32> to vector<8x128xf32>
    %305 = arith.addf %303, %304 : vector<8x128xf32>
    %306 = arith.negf %305 : vector<8x128xf32>
    %307 = math.exp %306 : vector<8x128xf32>
    %cst_93 = arith.constant 1.000000e+00 : f32
    %308 = vector.broadcast %cst_93 : f32 to vector<8x128xf32>
    %309 = arith.addf %308, %307 : vector<8x128xf32>
    %310 = arith.divf %308, %309 : vector<8x128xf32>
    %311 = vector.extract_strided_slice %301 {offsets = [0, 128], sizes = [8, 128], strides = [1, 1]} : vector<8x384xf32> to vector<8x128xf32>
    %312 = vector.extract_strided_slice %302 {offsets = [0, 128], sizes = [8, 128], strides = [1, 1]} : vector<8x384xf32> to vector<8x128xf32>
    %313 = arith.addf %311, %312 : vector<8x128xf32>
    %314 = arith.negf %313 : vector<8x128xf32>
    %315 = math.exp %314 : vector<8x128xf32>
    %cst_94 = arith.constant 1.000000e+00 : f32
    %316 = vector.broadcast %cst_94 : f32 to vector<8x128xf32>
    %317 = arith.addf %316, %315 : vector<8x128xf32>
    %318 = arith.divf %316, %317 : vector<8x128xf32>
    %319 = vector.extract_strided_slice %301 {offsets = [0, 256], sizes = [8, 128], strides = [1, 1]} : vector<8x384xf32> to vector<8x128xf32>
    %320 = vector.extract_strided_slice %302 {offsets = [0, 256], sizes = [8, 128], strides = [1, 1]} : vector<8x384xf32> to vector<8x128xf32>
    %321 = vector.broadcast %25 : vector<1x128xf32> to vector<8x128xf32>
    %322 = arith.addf %320, %321 : vector<8x128xf32>
    %323 = arith.mulf %310, %322 : vector<8x128xf32>
    %324 = arith.addf %319, %323 : vector<8x128xf32>
    %325 = math.tanh %324 : vector<8x128xf32>
    %cst_95 = arith.constant 1.000000e+00 : f32
    %326 = vector.broadcast %cst_95 : f32 to vector<8x128xf32>
    %327 = arith.subf %326, %318 : vector<8x128xf32>
    %328 = arith.mulf %327, %325 : vector<8x128xf32>
    %329 = arith.mulf %318, %292 : vector<8x128xf32>
    %330 = arith.addf %328, %329 : vector<8x128xf32>
    %c8_i32_96 = arith.constant 8 : i32
    %331 = arith.muli %c7_i32, %c8_i32_96 : i32
    %c0_i32_97 = arith.constant 0 : i32
    %332 = arith.addi %c0_i32_97, %331 : i32
    %333 = tpu.assume_multiple %332, 8 : i32
    %334 = arith.index_cast %333 : i32 to index
    %c0_98 = arith.constant 0 : index
    %335 = vector.load %arg14[%334, %c0_98] : memref<64x128xf32, #tpu.memory_space<vmem>>, vector<8x128xf32>
    tpu.vector_store %arg14[%334, %c0_98], %330 {strides = array<i32>} : memref<64x128xf32, #tpu.memory_space<vmem>>, vector<8x128xf32>,
    %c8_i32_99 = arith.constant 8 : i32
    %c0_100 = arith.constant 0 : index
    %c0_101 = arith.constant 0 : index
    %336 = vector.load %arg7[%c0_100, %c0_101] : memref<128x384xf32, #tpu.memory_space<vmem>>, vector<128x384xf32>
    %c0_102 = arith.constant 0 : index
    %c0_103 = arith.constant 0 : index
    %337 = vector.load %arg8[%c0_102, %c0_103] : memref<128x384xf32, #tpu.memory_space<vmem>>, vector<128x384xf32>
    %c0_104 = arith.constant 0 : index
    %c0_105 = arith.constant 0 : index
    %338 = vector.load %arg9[%c0_104, %c0_105] : memref<1x384xf32, #tpu.memory_space<vmem>>, vector<1x384xf32>
    %c0_106 = arith.constant 0 : index
    %c0_107 = arith.constant 0 : index
    %339 = vector.load %arg10[%c0_106, %c0_107] : memref<1x128xf32, #tpu.memory_space<vmem>>, vector<1x128xf32>
    %cst_108 = arith.constant 0.000000e+00 : f32
    %340 = vector.broadcast %cst_108 : f32 to vector<8x128xf32>
    %c0_109 = arith.constant 0 : index
    %c0_110 = arith.constant 0 : index
    %341 = vector.load %arg14[%c0_109, %c0_110] : memref<64x128xf32, #tpu.memory_space<vmem>>, vector<64x128xf32>
    %cst_111 = arith.constant dense<0.000000e+00> : vector<64x384xf32>
    %342 = tpu.matmul %341, %336, %cst_111 {dimension_numbers = #tpu.dot_dimension_numbers<[1], [0], [0], [1], [0, 0, 1, 1], [], []>} : vector<64x128xf32>, vector<128x384xf32>, vector<64x384xf32> -> vector<64x384xf32>
    %343 = vector.broadcast %338 : vector<1x384xf32> to vector<64x384xf32>
    %344 = arith.addf %342, %343 : vector<64x384xf32>
    %c0_112 = arith.constant 0 : index
    %c0_113 = arith.constant 0 : index
    %345 = vector.load %arg15[%c0_112, %c0_113] : memref<64x384xf32, #tpu.memory_space<vmem>>, vector<64x384xf32>
    tpu.vector_store %arg15[%c0_112, %c0_113], %344 {strides = array<i32>} : memref<64x384xf32, #tpu.memory_space<vmem>>, vector<64x384xf32>,
    %c0_i32_114 = arith.constant 0 : i32
    %c8_i32_115 = arith.constant 8 : i32
    %346 = arith.muli %c0_i32_114, %c8_i32_115 : i32
    %347 = tpu.assume_multiple %346, 8 : i32
    %348 = arith.index_cast %347 : i32 to index
    %c0_116 = arith.constant 0 : index
    %349 = vector.load %arg15[%348, %c0_116] : memref<64x384xf32, #tpu.memory_space<vmem>>, vector<8x384xf32>
    %cst_117 = arith.constant dense<0.000000e+00> : vector<8x384xf32>
    %350 = tpu.matmul %340, %337, %cst_117 {dimension_numbers = #tpu.dot_dimension_numbers<[1], [0], [0], [1], [0, 0, 1, 1], [], []>} : vector<8x128xf32>, vector<128x384xf32>, vector<8x384xf32> -> vector<8x384xf32>
    %351 = vector.extract_strided_slice %349 {offsets = [0, 0], sizes = [8, 128], strides = [1, 1]} : vector<8x384xf32> to vector<8x128xf32>
    %352 = vector.extract_strided_slice %350 {offsets = [0, 0], sizes = [8, 128], strides = [1, 1]} : vector<8x384xf32> to vector<8x128xf32>
    %353 = arith.addf %351, %352 : vector<8x128xf32>
    %354 = arith.negf %353 : vector<8x128xf32>
    %355 = math.exp %354 : vector<8x128xf32>
    %cst_118 = arith.constant 1.000000e+00 : f32
    %356 = vector.broadcast %cst_118 : f32 to vector<8x128xf32>
    %357 = arith.addf %356, %355 : vector<8x128xf32>
    %358 = arith.divf %356, %357 : vector<8x128xf32>
    %359 = vector.extract_strided_slice %349 {offsets = [0, 128], sizes = [8, 128], strides = [1, 1]} : vector<8x384xf32> to vector<8x128xf32>
    %360 = vector.extract_strided_slice %350 {offsets = [0, 128], sizes = [8, 128], strides = [1, 1]} : vector<8x384xf32> to vector<8x128xf32>
    %361 = arith.addf %359, %360 : vector<8x128xf32>
    %362 = arith.negf %361 : vector<8x128xf32>
    %363 = math.exp %362 : vector<8x128xf32>
    %cst_119 = arith.constant 1.000000e+00 : f32
    %364 = vector.broadcast %cst_119 : f32 to vector<8x128xf32>
    %365 = arith.addf %364, %363 : vector<8x128xf32>
    %366 = arith.divf %364, %365 : vector<8x128xf32>
    %367 = vector.extract_strided_slice %349 {offsets = [0, 256], sizes = [8, 128], strides = [1, 1]} : vector<8x384xf32> to vector<8x128xf32>
    %368 = vector.extract_strided_slice %350 {offsets = [0, 256], sizes = [8, 128], strides = [1, 1]} : vector<8x384xf32> to vector<8x128xf32>
    %369 = vector.broadcast %339 : vector<1x128xf32> to vector<8x128xf32>
    %370 = arith.addf %368, %369 : vector<8x128xf32>
    %371 = arith.mulf %358, %370 : vector<8x128xf32>
    %372 = arith.addf %367, %371 : vector<8x128xf32>
    %373 = math.tanh %372 : vector<8x128xf32>
    %cst_120 = arith.constant 1.000000e+00 : f32
    %374 = vector.broadcast %cst_120 : f32 to vector<8x128xf32>
    %375 = arith.subf %374, %366 : vector<8x128xf32>
    %376 = arith.mulf %375, %373 : vector<8x128xf32>
    %377 = arith.mulf %366, %340 : vector<8x128xf32>
    %378 = arith.addf %376, %377 : vector<8x128xf32>
    %c8_i32_121 = arith.constant 8 : i32
    %379 = arith.muli %c0_i32_114, %c8_i32_121 : i32
    %c0_i32_122 = arith.constant 0 : i32
    %380 = arith.addi %c0_i32_122, %379 : i32
    %381 = tpu.assume_multiple %380, 8 : i32
    %382 = arith.index_cast %381 : i32 to index
    %c0_123 = arith.constant 0 : index
    %383 = vector.load %arg14[%382, %c0_123] : memref<64x128xf32, #tpu.memory_space<vmem>>, vector<8x128xf32>
    tpu.vector_store %arg14[%382, %c0_123], %378 {strides = array<i32>} : memref<64x128xf32, #tpu.memory_space<vmem>>, vector<8x128xf32>,
    %c1_i32_124 = arith.constant 1 : i32
    %c8_i32_125 = arith.constant 8 : i32
    %384 = arith.muli %c1_i32_124, %c8_i32_125 : i32
    %385 = tpu.assume_multiple %384, 8 : i32
    %386 = arith.index_cast %385 : i32 to index
    %c0_126 = arith.constant 0 : index
    %387 = vector.load %arg15[%386, %c0_126] : memref<64x384xf32, #tpu.memory_space<vmem>>, vector<8x384xf32>
    %cst_127 = arith.constant dense<0.000000e+00> : vector<8x384xf32>
    %388 = tpu.matmul %378, %337, %cst_127 {dimension_numbers = #tpu.dot_dimension_numbers<[1], [0], [0], [1], [0, 0, 1, 1], [], []>} : vector<8x128xf32>, vector<128x384xf32>, vector<8x384xf32> -> vector<8x384xf32>
    %389 = vector.extract_strided_slice %387 {offsets = [0, 0], sizes = [8, 128], strides = [1, 1]} : vector<8x384xf32> to vector<8x128xf32>
    %390 = vector.extract_strided_slice %388 {offsets = [0, 0], sizes = [8, 128], strides = [1, 1]} : vector<8x384xf32> to vector<8x128xf32>
    %391 = arith.addf %389, %390 : vector<8x128xf32>
    %392 = arith.negf %391 : vector<8x128xf32>
    %393 = math.exp %392 : vector<8x128xf32>
    %cst_128 = arith.constant 1.000000e+00 : f32
    %394 = vector.broadcast %cst_128 : f32 to vector<8x128xf32>
    %395 = arith.addf %394, %393 : vector<8x128xf32>
    %396 = arith.divf %394, %395 : vector<8x128xf32>
    %397 = vector.extract_strided_slice %387 {offsets = [0, 128], sizes = [8, 128], strides = [1, 1]} : vector<8x384xf32> to vector<8x128xf32>
    %398 = vector.extract_strided_slice %388 {offsets = [0, 128], sizes = [8, 128], strides = [1, 1]} : vector<8x384xf32> to vector<8x128xf32>
    %399 = arith.addf %397, %398 : vector<8x128xf32>
    %400 = arith.negf %399 : vector<8x128xf32>
    %401 = math.exp %400 : vector<8x128xf32>
    %cst_129 = arith.constant 1.000000e+00 : f32
    %402 = vector.broadcast %cst_129 : f32 to vector<8x128xf32>
    %403 = arith.addf %402, %401 : vector<8x128xf32>
    %404 = arith.divf %402, %403 : vector<8x128xf32>
    %405 = vector.extract_strided_slice %387 {offsets = [0, 256], sizes = [8, 128], strides = [1, 1]} : vector<8x384xf32> to vector<8x128xf32>
    %406 = vector.extract_strided_slice %388 {offsets = [0, 256], sizes = [8, 128], strides = [1, 1]} : vector<8x384xf32> to vector<8x128xf32>
    %407 = vector.broadcast %339 : vector<1x128xf32> to vector<8x128xf32>
    %408 = arith.addf %406, %407 : vector<8x128xf32>
    %409 = arith.mulf %396, %408 : vector<8x128xf32>
    %410 = arith.addf %405, %409 : vector<8x128xf32>
    %411 = math.tanh %410 : vector<8x128xf32>
    %cst_130 = arith.constant 1.000000e+00 : f32
    %412 = vector.broadcast %cst_130 : f32 to vector<8x128xf32>
    %413 = arith.subf %412, %404 : vector<8x128xf32>
    %414 = arith.mulf %413, %411 : vector<8x128xf32>
    %415 = arith.mulf %404, %378 : vector<8x128xf32>
    %416 = arith.addf %414, %415 : vector<8x128xf32>
    %c8_i32_131 = arith.constant 8 : i32
    %417 = arith.muli %c1_i32_124, %c8_i32_131 : i32
    %c0_i32_132 = arith.constant 0 : i32
    %418 = arith.addi %c0_i32_132, %417 : i32
    %419 = tpu.assume_multiple %418, 8 : i32
    %420 = arith.index_cast %419 : i32 to index
    %c0_133 = arith.constant 0 : index
    %421 = vector.load %arg14[%420, %c0_133] : memref<64x128xf32, #tpu.memory_space<vmem>>, vector<8x128xf32>
    tpu.vector_store %arg14[%420, %c0_133], %416 {strides = array<i32>} : memref<64x128xf32, #tpu.memory_space<vmem>>, vector<8x128xf32>,
    %c2_i32_134 = arith.constant 2 : i32
    %c8_i32_135 = arith.constant 8 : i32
    %422 = arith.muli %c2_i32_134, %c8_i32_135 : i32
    %423 = tpu.assume_multiple %422, 8 : i32
    %424 = arith.index_cast %423 : i32 to index
    %c0_136 = arith.constant 0 : index
    %425 = vector.load %arg15[%424, %c0_136] : memref<64x384xf32, #tpu.memory_space<vmem>>, vector<8x384xf32>
    %cst_137 = arith.constant dense<0.000000e+00> : vector<8x384xf32>
    %426 = tpu.matmul %416, %337, %cst_137 {dimension_numbers = #tpu.dot_dimension_numbers<[1], [0], [0], [1], [0, 0, 1, 1], [], []>} : vector<8x128xf32>, vector<128x384xf32>, vector<8x384xf32> -> vector<8x384xf32>
    %427 = vector.extract_strided_slice %425 {offsets = [0, 0], sizes = [8, 128], strides = [1, 1]} : vector<8x384xf32> to vector<8x128xf32>
    %428 = vector.extract_strided_slice %426 {offsets = [0, 0], sizes = [8, 128], strides = [1, 1]} : vector<8x384xf32> to vector<8x128xf32>
    %429 = arith.addf %427, %428 : vector<8x128xf32>
    %430 = arith.negf %429 : vector<8x128xf32>
    %431 = math.exp %430 : vector<8x128xf32>
    %cst_138 = arith.constant 1.000000e+00 : f32
    %432 = vector.broadcast %cst_138 : f32 to vector<8x128xf32>
    %433 = arith.addf %432, %431 : vector<8x128xf32>
    %434 = arith.divf %432, %433 : vector<8x128xf32>
    %435 = vector.extract_strided_slice %425 {offsets = [0, 128], sizes = [8, 128], strides = [1, 1]} : vector<8x384xf32> to vector<8x128xf32>
    %436 = vector.extract_strided_slice %426 {offsets = [0, 128], sizes = [8, 128], strides = [1, 1]} : vector<8x384xf32> to vector<8x128xf32>
    %437 = arith.addf %435, %436 : vector<8x128xf32>
    %438 = arith.negf %437 : vector<8x128xf32>
    %439 = math.exp %438 : vector<8x128xf32>
    %cst_139 = arith.constant 1.000000e+00 : f32
    %440 = vector.broadcast %cst_139 : f32 to vector<8x128xf32>
    %441 = arith.addf %440, %439 : vector<8x128xf32>
    %442 = arith.divf %440, %441 : vector<8x128xf32>
    %443 = vector.extract_strided_slice %425 {offsets = [0, 256], sizes = [8, 128], strides = [1, 1]} : vector<8x384xf32> to vector<8x128xf32>
    %444 = vector.extract_strided_slice %426 {offsets = [0, 256], sizes = [8, 128], strides = [1, 1]} : vector<8x384xf32> to vector<8x128xf32>
    %445 = vector.broadcast %339 : vector<1x128xf32> to vector<8x128xf32>
    %446 = arith.addf %444, %445 : vector<8x128xf32>
    %447 = arith.mulf %434, %446 : vector<8x128xf32>
    %448 = arith.addf %443, %447 : vector<8x128xf32>
    %449 = math.tanh %448 : vector<8x128xf32>
    %cst_140 = arith.constant 1.000000e+00 : f32
    %450 = vector.broadcast %cst_140 : f32 to vector<8x128xf32>
    %451 = arith.subf %450, %442 : vector<8x128xf32>
    %452 = arith.mulf %451, %449 : vector<8x128xf32>
    %453 = arith.mulf %442, %416 : vector<8x128xf32>
    %454 = arith.addf %452, %453 : vector<8x128xf32>
    %c8_i32_141 = arith.constant 8 : i32
    %455 = arith.muli %c2_i32_134, %c8_i32_141 : i32
    %c0_i32_142 = arith.constant 0 : i32
    %456 = arith.addi %c0_i32_142, %455 : i32
    %457 = tpu.assume_multiple %456, 8 : i32
    %458 = arith.index_cast %457 : i32 to index
    %c0_143 = arith.constant 0 : index
    %459 = vector.load %arg14[%458, %c0_143] : memref<64x128xf32, #tpu.memory_space<vmem>>, vector<8x128xf32>
    tpu.vector_store %arg14[%458, %c0_143], %454 {strides = array<i32>} : memref<64x128xf32, #tpu.memory_space<vmem>>, vector<8x128xf32>,
    %c3_i32_144 = arith.constant 3 : i32
    %c8_i32_145 = arith.constant 8 : i32
    %460 = arith.muli %c3_i32_144, %c8_i32_145 : i32
    %461 = tpu.assume_multiple %460, 8 : i32
    %462 = arith.index_cast %461 : i32 to index
    %c0_146 = arith.constant 0 : index
    %463 = vector.load %arg15[%462, %c0_146] : memref<64x384xf32, #tpu.memory_space<vmem>>, vector<8x384xf32>
    %cst_147 = arith.constant dense<0.000000e+00> : vector<8x384xf32>
    %464 = tpu.matmul %454, %337, %cst_147 {dimension_numbers = #tpu.dot_dimension_numbers<[1], [0], [0], [1], [0, 0, 1, 1], [], []>} : vector<8x128xf32>, vector<128x384xf32>, vector<8x384xf32> -> vector<8x384xf32>
    %465 = vector.extract_strided_slice %463 {offsets = [0, 0], sizes = [8, 128], strides = [1, 1]} : vector<8x384xf32> to vector<8x128xf32>
    %466 = vector.extract_strided_slice %464 {offsets = [0, 0], sizes = [8, 128], strides = [1, 1]} : vector<8x384xf32> to vector<8x128xf32>
    %467 = arith.addf %465, %466 : vector<8x128xf32>
    %468 = arith.negf %467 : vector<8x128xf32>
    %469 = math.exp %468 : vector<8x128xf32>
    %cst_148 = arith.constant 1.000000e+00 : f32
    %470 = vector.broadcast %cst_148 : f32 to vector<8x128xf32>
    %471 = arith.addf %470, %469 : vector<8x128xf32>
    %472 = arith.divf %470, %471 : vector<8x128xf32>
    %473 = vector.extract_strided_slice %463 {offsets = [0, 128], sizes = [8, 128], strides = [1, 1]} : vector<8x384xf32> to vector<8x128xf32>
    %474 = vector.extract_strided_slice %464 {offsets = [0, 128], sizes = [8, 128], strides = [1, 1]} : vector<8x384xf32> to vector<8x128xf32>
    %475 = arith.addf %473, %474 : vector<8x128xf32>
    %476 = arith.negf %475 : vector<8x128xf32>
    %477 = math.exp %476 : vector<8x128xf32>
    %cst_149 = arith.constant 1.000000e+00 : f32
    %478 = vector.broadcast %cst_149 : f32 to vector<8x128xf32>
    %479 = arith.addf %478, %477 : vector<8x128xf32>
    %480 = arith.divf %478, %479 : vector<8x128xf32>
    %481 = vector.extract_strided_slice %463 {offsets = [0, 256], sizes = [8, 128], strides = [1, 1]} : vector<8x384xf32> to vector<8x128xf32>
    %482 = vector.extract_strided_slice %464 {offsets = [0, 256], sizes = [8, 128], strides = [1, 1]} : vector<8x384xf32> to vector<8x128xf32>
    %483 = vector.broadcast %339 : vector<1x128xf32> to vector<8x128xf32>
    %484 = arith.addf %482, %483 : vector<8x128xf32>
    %485 = arith.mulf %472, %484 : vector<8x128xf32>
    %486 = arith.addf %481, %485 : vector<8x128xf32>
    %487 = math.tanh %486 : vector<8x128xf32>
    %cst_150 = arith.constant 1.000000e+00 : f32
    %488 = vector.broadcast %cst_150 : f32 to vector<8x128xf32>
    %489 = arith.subf %488, %480 : vector<8x128xf32>
    %490 = arith.mulf %489, %487 : vector<8x128xf32>
    %491 = arith.mulf %480, %454 : vector<8x128xf32>
    %492 = arith.addf %490, %491 : vector<8x128xf32>
    %c8_i32_151 = arith.constant 8 : i32
    %493 = arith.muli %c3_i32_144, %c8_i32_151 : i32
    %c0_i32_152 = arith.constant 0 : i32
    %494 = arith.addi %c0_i32_152, %493 : i32
    %495 = tpu.assume_multiple %494, 8 : i32
    %496 = arith.index_cast %495 : i32 to index
    %c0_153 = arith.constant 0 : index
    %497 = vector.load %arg14[%496, %c0_153] : memref<64x128xf32, #tpu.memory_space<vmem>>, vector<8x128xf32>
    tpu.vector_store %arg14[%496, %c0_153], %492 {strides = array<i32>} : memref<64x128xf32, #tpu.memory_space<vmem>>, vector<8x128xf32>,
    %c4_i32_154 = arith.constant 4 : i32
    %c8_i32_155 = arith.constant 8 : i32
    %498 = arith.muli %c4_i32_154, %c8_i32_155 : i32
    %499 = tpu.assume_multiple %498, 8 : i32
    %500 = arith.index_cast %499 : i32 to index
    %c0_156 = arith.constant 0 : index
    %501 = vector.load %arg15[%500, %c0_156] : memref<64x384xf32, #tpu.memory_space<vmem>>, vector<8x384xf32>
    %cst_157 = arith.constant dense<0.000000e+00> : vector<8x384xf32>
    %502 = tpu.matmul %492, %337, %cst_157 {dimension_numbers = #tpu.dot_dimension_numbers<[1], [0], [0], [1], [0, 0, 1, 1], [], []>} : vector<8x128xf32>, vector<128x384xf32>, vector<8x384xf32> -> vector<8x384xf32>
    %503 = vector.extract_strided_slice %501 {offsets = [0, 0], sizes = [8, 128], strides = [1, 1]} : vector<8x384xf32> to vector<8x128xf32>
    %504 = vector.extract_strided_slice %502 {offsets = [0, 0], sizes = [8, 128], strides = [1, 1]} : vector<8x384xf32> to vector<8x128xf32>
    %505 = arith.addf %503, %504 : vector<8x128xf32>
    %506 = arith.negf %505 : vector<8x128xf32>
    %507 = math.exp %506 : vector<8x128xf32>
    %cst_158 = arith.constant 1.000000e+00 : f32
    %508 = vector.broadcast %cst_158 : f32 to vector<8x128xf32>
    %509 = arith.addf %508, %507 : vector<8x128xf32>
    %510 = arith.divf %508, %509 : vector<8x128xf32>
    %511 = vector.extract_strided_slice %501 {offsets = [0, 128], sizes = [8, 128], strides = [1, 1]} : vector<8x384xf32> to vector<8x128xf32>
    %512 = vector.extract_strided_slice %502 {offsets = [0, 128], sizes = [8, 128], strides = [1, 1]} : vector<8x384xf32> to vector<8x128xf32>
    %513 = arith.addf %511, %512 : vector<8x128xf32>
    %514 = arith.negf %513 : vector<8x128xf32>
    %515 = math.exp %514 : vector<8x128xf32>
    %cst_159 = arith.constant 1.000000e+00 : f32
    %516 = vector.broadcast %cst_159 : f32 to vector<8x128xf32>
    %517 = arith.addf %516, %515 : vector<8x128xf32>
    %518 = arith.divf %516, %517 : vector<8x128xf32>
    %519 = vector.extract_strided_slice %501 {offsets = [0, 256], sizes = [8, 128], strides = [1, 1]} : vector<8x384xf32> to vector<8x128xf32>
    %520 = vector.extract_strided_slice %502 {offsets = [0, 256], sizes = [8, 128], strides = [1, 1]} : vector<8x384xf32> to vector<8x128xf32>
    %521 = vector.broadcast %339 : vector<1x128xf32> to vector<8x128xf32>
    %522 = arith.addf %520, %521 : vector<8x128xf32>
    %523 = arith.mulf %510, %522 : vector<8x128xf32>
    %524 = arith.addf %519, %523 : vector<8x128xf32>
    %525 = math.tanh %524 : vector<8x128xf32>
    %cst_160 = arith.constant 1.000000e+00 : f32
    %526 = vector.broadcast %cst_160 : f32 to vector<8x128xf32>
    %527 = arith.subf %526, %518 : vector<8x128xf32>
    %528 = arith.mulf %527, %525 : vector<8x128xf32>
    %529 = arith.mulf %518, %492 : vector<8x128xf32>
    %530 = arith.addf %528, %529 : vector<8x128xf32>
    %c8_i32_161 = arith.constant 8 : i32
    %531 = arith.muli %c4_i32_154, %c8_i32_161 : i32
    %c0_i32_162 = arith.constant 0 : i32
    %532 = arith.addi %c0_i32_162, %531 : i32
    %533 = tpu.assume_multiple %532, 8 : i32
    %534 = arith.index_cast %533 : i32 to index
    %c0_163 = arith.constant 0 : index
    %535 = vector.load %arg14[%534, %c0_163] : memref<64x128xf32, #tpu.memory_space<vmem>>, vector<8x128xf32>
    tpu.vector_store %arg14[%534, %c0_163], %530 {strides = array<i32>} : memref<64x128xf32, #tpu.memory_space<vmem>>, vector<8x128xf32>,
    %c5_i32_164 = arith.constant 5 : i32
    %c8_i32_165 = arith.constant 8 : i32
    %536 = arith.muli %c5_i32_164, %c8_i32_165 : i32
    %537 = tpu.assume_multiple %536, 8 : i32
    %538 = arith.index_cast %537 : i32 to index
    %c0_166 = arith.constant 0 : index
    %539 = vector.load %arg15[%538, %c0_166] : memref<64x384xf32, #tpu.memory_space<vmem>>, vector<8x384xf32>
    %cst_167 = arith.constant dense<0.000000e+00> : vector<8x384xf32>
    %540 = tpu.matmul %530, %337, %cst_167 {dimension_numbers = #tpu.dot_dimension_numbers<[1], [0], [0], [1], [0, 0, 1, 1], [], []>} : vector<8x128xf32>, vector<128x384xf32>, vector<8x384xf32> -> vector<8x384xf32>
    %541 = vector.extract_strided_slice %539 {offsets = [0, 0], sizes = [8, 128], strides = [1, 1]} : vector<8x384xf32> to vector<8x128xf32>
    %542 = vector.extract_strided_slice %540 {offsets = [0, 0], sizes = [8, 128], strides = [1, 1]} : vector<8x384xf32> to vector<8x128xf32>
    %543 = arith.addf %541, %542 : vector<8x128xf32>
    %544 = arith.negf %543 : vector<8x128xf32>
    %545 = math.exp %544 : vector<8x128xf32>
    %cst_168 = arith.constant 1.000000e+00 : f32
    %546 = vector.broadcast %cst_168 : f32 to vector<8x128xf32>
    %547 = arith.addf %546, %545 : vector<8x128xf32>
    %548 = arith.divf %546, %547 : vector<8x128xf32>
    %549 = vector.extract_strided_slice %539 {offsets = [0, 128], sizes = [8, 128], strides = [1, 1]} : vector<8x384xf32> to vector<8x128xf32>
    %550 = vector.extract_strided_slice %540 {offsets = [0, 128], sizes = [8, 128], strides = [1, 1]} : vector<8x384xf32> to vector<8x128xf32>
    %551 = arith.addf %549, %550 : vector<8x128xf32>
    %552 = arith.negf %551 : vector<8x128xf32>
    %553 = math.exp %552 : vector<8x128xf32>
    %cst_169 = arith.constant 1.000000e+00 : f32
    %554 = vector.broadcast %cst_169 : f32 to vector<8x128xf32>
    %555 = arith.addf %554, %553 : vector<8x128xf32>
    %556 = arith.divf %554, %555 : vector<8x128xf32>
    %557 = vector.extract_strided_slice %539 {offsets = [0, 256], sizes = [8, 128], strides = [1, 1]} : vector<8x384xf32> to vector<8x128xf32>
    %558 = vector.extract_strided_slice %540 {offsets = [0, 256], sizes = [8, 128], strides = [1, 1]} : vector<8x384xf32> to vector<8x128xf32>
    %559 = vector.broadcast %339 : vector<1x128xf32> to vector<8x128xf32>
    %560 = arith.addf %558, %559 : vector<8x128xf32>
    %561 = arith.mulf %548, %560 : vector<8x128xf32>
    %562 = arith.addf %557, %561 : vector<8x128xf32>
    %563 = math.tanh %562 : vector<8x128xf32>
    %cst_170 = arith.constant 1.000000e+00 : f32
    %564 = vector.broadcast %cst_170 : f32 to vector<8x128xf32>
    %565 = arith.subf %564, %556 : vector<8x128xf32>
    %566 = arith.mulf %565, %563 : vector<8x128xf32>
    %567 = arith.mulf %556, %530 : vector<8x128xf32>
    %568 = arith.addf %566, %567 : vector<8x128xf32>
    %c8_i32_171 = arith.constant 8 : i32
    %569 = arith.muli %c5_i32_164, %c8_i32_171 : i32
    %c0_i32_172 = arith.constant 0 : i32
    %570 = arith.addi %c0_i32_172, %569 : i32
    %571 = tpu.assume_multiple %570, 8 : i32
    %572 = arith.index_cast %571 : i32 to index
    %c0_173 = arith.constant 0 : index
    %573 = vector.load %arg14[%572, %c0_173] : memref<64x128xf32, #tpu.memory_space<vmem>>, vector<8x128xf32>
    tpu.vector_store %arg14[%572, %c0_173], %568 {strides = array<i32>} : memref<64x128xf32, #tpu.memory_space<vmem>>, vector<8x128xf32>,
    %c6_i32_174 = arith.constant 6 : i32
    %c8_i32_175 = arith.constant 8 : i32
    %574 = arith.muli %c6_i32_174, %c8_i32_175 : i32
    %575 = tpu.assume_multiple %574, 8 : i32
    %576 = arith.index_cast %575 : i32 to index
    %c0_176 = arith.constant 0 : index
    %577 = vector.load %arg15[%576, %c0_176] : memref<64x384xf32, #tpu.memory_space<vmem>>, vector<8x384xf32>
    %cst_177 = arith.constant dense<0.000000e+00> : vector<8x384xf32>
    %578 = tpu.matmul %568, %337, %cst_177 {dimension_numbers = #tpu.dot_dimension_numbers<[1], [0], [0], [1], [0, 0, 1, 1], [], []>} : vector<8x128xf32>, vector<128x384xf32>, vector<8x384xf32> -> vector<8x384xf32>
    %579 = vector.extract_strided_slice %577 {offsets = [0, 0], sizes = [8, 128], strides = [1, 1]} : vector<8x384xf32> to vector<8x128xf32>
    %580 = vector.extract_strided_slice %578 {offsets = [0, 0], sizes = [8, 128], strides = [1, 1]} : vector<8x384xf32> to vector<8x128xf32>
    %581 = arith.addf %579, %580 : vector<8x128xf32>
    %582 = arith.negf %581 : vector<8x128xf32>
    %583 = math.exp %582 : vector<8x128xf32>
    %cst_178 = arith.constant 1.000000e+00 : f32
    %584 = vector.broadcast %cst_178 : f32 to vector<8x128xf32>
    %585 = arith.addf %584, %583 : vector<8x128xf32>
    %586 = arith.divf %584, %585 : vector<8x128xf32>
    %587 = vector.extract_strided_slice %577 {offsets = [0, 128], sizes = [8, 128], strides = [1, 1]} : vector<8x384xf32> to vector<8x128xf32>
    %588 = vector.extract_strided_slice %578 {offsets = [0, 128], sizes = [8, 128], strides = [1, 1]} : vector<8x384xf32> to vector<8x128xf32>
    %589 = arith.addf %587, %588 : vector<8x128xf32>
    %590 = arith.negf %589 : vector<8x128xf32>
    %591 = math.exp %590 : vector<8x128xf32>
    %cst_179 = arith.constant 1.000000e+00 : f32
    %592 = vector.broadcast %cst_179 : f32 to vector<8x128xf32>
    %593 = arith.addf %592, %591 : vector<8x128xf32>
    %594 = arith.divf %592, %593 : vector<8x128xf32>
    %595 = vector.extract_strided_slice %577 {offsets = [0, 256], sizes = [8, 128], strides = [1, 1]} : vector<8x384xf32> to vector<8x128xf32>
    %596 = vector.extract_strided_slice %578 {offsets = [0, 256], sizes = [8, 128], strides = [1, 1]} : vector<8x384xf32> to vector<8x128xf32>
    %597 = vector.broadcast %339 : vector<1x128xf32> to vector<8x128xf32>
    %598 = arith.addf %596, %597 : vector<8x128xf32>
    %599 = arith.mulf %586, %598 : vector<8x128xf32>
    %600 = arith.addf %595, %599 : vector<8x128xf32>
    %601 = math.tanh %600 : vector<8x128xf32>
    %cst_180 = arith.constant 1.000000e+00 : f32
    %602 = vector.broadcast %cst_180 : f32 to vector<8x128xf32>
    %603 = arith.subf %602, %594 : vector<8x128xf32>
    %604 = arith.mulf %603, %601 : vector<8x128xf32>
    %605 = arith.mulf %594, %568 : vector<8x128xf32>
    %606 = arith.addf %604, %605 : vector<8x128xf32>
    %c8_i32_181 = arith.constant 8 : i32
    %607 = arith.muli %c6_i32_174, %c8_i32_181 : i32
    %c0_i32_182 = arith.constant 0 : i32
    %608 = arith.addi %c0_i32_182, %607 : i32
    %609 = tpu.assume_multiple %608, 8 : i32
    %610 = arith.index_cast %609 : i32 to index
    %c0_183 = arith.constant 0 : index
    %611 = vector.load %arg14[%610, %c0_183] : memref<64x128xf32, #tpu.memory_space<vmem>>, vector<8x128xf32>
    tpu.vector_store %arg14[%610, %c0_183], %606 {strides = array<i32>} : memref<64x128xf32, #tpu.memory_space<vmem>>, vector<8x128xf32>,
    %c7_i32_184 = arith.constant 7 : i32
    %c8_i32_185 = arith.constant 8 : i32
    %612 = arith.muli %c7_i32_184, %c8_i32_185 : i32
    %613 = tpu.assume_multiple %612, 8 : i32
    %614 = arith.index_cast %613 : i32 to index
    %c0_186 = arith.constant 0 : index
    %615 = vector.load %arg15[%614, %c0_186] : memref<64x384xf32, #tpu.memory_space<vmem>>, vector<8x384xf32>
    %cst_187 = arith.constant dense<0.000000e+00> : vector<8x384xf32>
    %616 = tpu.matmul %606, %337, %cst_187 {dimension_numbers = #tpu.dot_dimension_numbers<[1], [0], [0], [1], [0, 0, 1, 1], [], []>} : vector<8x128xf32>, vector<128x384xf32>, vector<8x384xf32> -> vector<8x384xf32>
    %617 = vector.extract_strided_slice %615 {offsets = [0, 0], sizes = [8, 128], strides = [1, 1]} : vector<8x384xf32> to vector<8x128xf32>
    %618 = vector.extract_strided_slice %616 {offsets = [0, 0], sizes = [8, 128], strides = [1, 1]} : vector<8x384xf32> to vector<8x128xf32>
    %619 = arith.addf %617, %618 : vector<8x128xf32>
    %620 = arith.negf %619 : vector<8x128xf32>
    %621 = math.exp %620 : vector<8x128xf32>
    %cst_188 = arith.constant 1.000000e+00 : f32
    %622 = vector.broadcast %cst_188 : f32 to vector<8x128xf32>
    %623 = arith.addf %622, %621 : vector<8x128xf32>
    %624 = arith.divf %622, %623 : vector<8x128xf32>
    %625 = vector.extract_strided_slice %615 {offsets = [0, 128], sizes = [8, 128], strides = [1, 1]} : vector<8x384xf32> to vector<8x128xf32>
    %626 = vector.extract_strided_slice %616 {offsets = [0, 128], sizes = [8, 128], strides = [1, 1]} : vector<8x384xf32> to vector<8x128xf32>
    %627 = arith.addf %625, %626 : vector<8x128xf32>
    %628 = arith.negf %627 : vector<8x128xf32>
    %629 = math.exp %628 : vector<8x128xf32>
    %cst_189 = arith.constant 1.000000e+00 : f32
    %630 = vector.broadcast %cst_189 : f32 to vector<8x128xf32>
    %631 = arith.addf %630, %629 : vector<8x128xf32>
    %632 = arith.divf %630, %631 : vector<8x128xf32>
    %633 = vector.extract_strided_slice %615 {offsets = [0, 256], sizes = [8, 128], strides = [1, 1]} : vector<8x384xf32> to vector<8x128xf32>
    %634 = vector.extract_strided_slice %616 {offsets = [0, 256], sizes = [8, 128], strides = [1, 1]} : vector<8x384xf32> to vector<8x128xf32>
    %635 = vector.broadcast %339 : vector<1x128xf32> to vector<8x128xf32>
    %636 = arith.addf %634, %635 : vector<8x128xf32>
    %637 = arith.mulf %624, %636 : vector<8x128xf32>
    %638 = arith.addf %633, %637 : vector<8x128xf32>
    %639 = math.tanh %638 : vector<8x128xf32>
    %cst_190 = arith.constant 1.000000e+00 : f32
    %640 = vector.broadcast %cst_190 : f32 to vector<8x128xf32>
    %641 = arith.subf %640, %632 : vector<8x128xf32>
    %642 = arith.mulf %641, %639 : vector<8x128xf32>
    %643 = arith.mulf %632, %606 : vector<8x128xf32>
    %644 = arith.addf %642, %643 : vector<8x128xf32>
    %c8_i32_191 = arith.constant 8 : i32
    %645 = arith.muli %c7_i32_184, %c8_i32_191 : i32
    %c0_i32_192 = arith.constant 0 : i32
    %646 = arith.addi %c0_i32_192, %645 : i32
    %647 = tpu.assume_multiple %646, 8 : i32
    %648 = arith.index_cast %647 : i32 to index
    %c0_193 = arith.constant 0 : index
    %649 = vector.load %arg14[%648, %c0_193] : memref<64x128xf32, #tpu.memory_space<vmem>>, vector<8x128xf32>
    tpu.vector_store %arg14[%648, %c0_193], %644 {strides = array<i32>} : memref<64x128xf32, #tpu.memory_space<vmem>>, vector<8x128xf32>,
    %c8_i32_194 = arith.constant 8 : i32
    %c0_195 = arith.constant 0 : index
    %c0_196 = arith.constant 0 : index
    %650 = vector.load %arg14[%c0_195, %c0_196] : memref<64x128xf32, #tpu.memory_space<vmem>>, vector<64x128xf32>
    %c0_197 = arith.constant 0 : index
    %c0_198 = arith.constant 0 : index
    %651 = vector.load %arg11[%c0_197, %c0_198] : memref<128x128xf32, #tpu.memory_space<vmem>>, vector<128x128xf32>
    %cst_199 = arith.constant dense<0.000000e+00> : vector<64x128xf32>
    %652 = tpu.matmul %650, %651, %cst_199 {dimension_numbers = #tpu.dot_dimension_numbers<[1], [0], [0], [1], [0, 0, 1, 1], [], []>} : vector<64x128xf32>, vector<128x128xf32>, vector<64x128xf32> -> vector<64x128xf32>
    %c0_200 = arith.constant 0 : index
    %c0_201 = arith.constant 0 : index
    %653 = vector.load %arg12[%c0_200, %c0_201] : memref<1x128xf32, #tpu.memory_space<vmem>>, vector<1x128xf32>
    %654 = vector.broadcast %653 : vector<1x128xf32> to vector<64x128xf32>
    %655 = arith.addf %652, %654 : vector<64x128xf32>
    %c0_202 = arith.constant 0 : index
    %c0_203 = arith.constant 0 : index
    %656 = vector.load %arg13[%c0_202, %c0_203] : memref<64x128xf32, #tpu.memory_space<vmem>>, vector<64x128xf32>
    tpu.vector_store %arg13[%c0_202, %c0_203], %655 {strides = array<i32>} : memref<64x128xf32, #tpu.memory_space<vmem>>, vector<64x128xf32>,
    return
  }
}

</mosaic_0001>

<bundles_post_ra>
// kernel: tpu_custom_call.1
= control target key start
LH: loop header
LB: loop body
LE: loop exit
PB: predicated region body
PF: predicated region fallthrough
CT: control target
= control target key end

     0   :  { %18 = vsyncpa [#allocation5], 0  ;;  %s7907_s0 = inlined_call_operand.hbm [shape: f32[8,8], index: 0, kind: input, shape index: {}]   ;;  %s7908_s1 = inlined_call_operand.hbm [shape: f32[8,1024], index: 1, kind: input, shape index: {}]   ;;  %s7909_s2 = inlined_call_operand.hbm [shape: f32[1,1024], index: 2, kind: input, shape index: {}]   ;;  %s7910_s3 = inlined_call_operand.hbm [shape: f32[128,384], index: 3, kind: input, shape index: {}]   ;;  %s7911_s4 = inlined_call_operand.hbm [shape: f32[128,384], index: 4, kind: input, shape index: {}]   ;;  %s7912_s5 = inlined_call_operand.vmem [shape: f32[1,384], index: 5, kind: input, shape index: {}]   ;;  %s7913_s6 = inlined_call_operand.vmem [shape: f32[1,128], index: 6, kind: input, shape index: {}]   ;;  %s7914_s7 = inlined_call_operand.hbm [shape: f32[128,384], index: 7, kind: input, shape index: {}]   ;;  %s7915_s8 = inlined_call_operand.hbm [shape: f32[128,384], index: 8, kind: input, shape index: {}]   ;;  %s7916_s9 = inlined_call_operand.vmem [shape: f32[1,384], index: 9, kind: input, shape index: {}]   ;;  %s7917_s10 = inlined_call_operand.vmem [shape: f32[1,128], index: 10, kind: input, shape index: {}]   ;;  %s7918_s11 = inlined_call_operand.hbm [shape: f32[128,128], index: 11, kind: input, shape index: {}]   ;;  %s7919_s12 = inlined_call_operand.vmem [shape: f32[1,128], index: 12, kind: input, shape index: {}]   ;;  %s7920_s13 = inlined_call_operand.hbm [shape: f32[64,128], index: 13, kind: output, shape index: {}]  }
   0x1   :  { %19 = vsyncpa [#allocation8], 0 }
   0x2   :  { %20 = vsyncpa [#allocation11], 0 }
   0x3   :  { %21 = vsyncpa [#allocation14], 0 }
   0x4   :  { %22 = vsyncpa [#allocation17], 0 }
   0x5   :  { %23 = vsyncpa [#allocation6], 0  ;;  %s6692_s25 = smov [#allocation7]   ;;  %s6693_s27 = smov [#allocation10]  }
   0x6   :  { %s40_s26 = sshll.u32 %s6692_s25, 4  ;;  %s59_s28 = sshll.u32 %s6693_s27, 4  ;;  %s41_s26 = int_to_ptr.vmem [resolvable:$true] %s40_s26  ;;  %s6778_s28 = int_to_ptr.vmem [resolvable:$true] %s59_s28 }
   0x7   :  { %s6482_s14 = scalar_lea.hbm %s7908_s1, 1024 }
   0x8   :  { %p6483_p0 = scmp.ne.s32.totalorder %s7908_s1, %s6482_s14  ;;  %p6486_p1 = scmp.lt.u32.totalorder %s6482_s14, %s7908_s1 }
   0xa   :  { %p6488_p2 = pnand %p6486_p1, %p6483_p0 }
   0xc   :  { %6491 = shalt.err (!%p6488_p2)
}
   0xd   :  { %s6492_s19 = scalar_lea.vmem %s41_s26, 1024  ;;  %p6497_p4 = scmp.lt.s32.totalorder %s41_s26, %s41_s26 }
   0xe   :  { %p6493_p3 = scmp.ne.s32.totalorder %s41_s26, %s6492_s19  ;;  %p6498_p5 = scmp.lt.s32.totalorder %s6492_s19, %s6492_s19 }
  0x10   :  { %p6499_p6 = por %p6498_p5, %p6497_p4 }
  0x12   :  { %p6500_p7 = pnand %p6499_p6, %p6493_p3 }
  0x14   :  { %6503 = shalt.err (!%p6500_p7)
}
  0x15   :  { %43 = dma.hbm_to_vmem [thread:$0]  %s7908_s1, 1024, %s41_s26, [#allocation8]  }
  0x16   :  { %s6504_s24 = scalar_lea.hbm %s7910_s3, 6144 }
  0x17   :  { %p6505_p8 = scmp.ne.s32.totalorder %s7910_s3, %s6504_s24  ;;  %p6508_p9 = scmp.lt.u32.totalorder %s6504_s24, %s7910_s3 }
  0x19   :  { %p6510_p10 = pnand %p6508_p9, %p6505_p8 }
  0x1b   :  { %6513 = shalt.err (!%p6510_p10)
}
  0x1c   :  { %s6514_s14 = scalar_lea.vmem %s6778_s28, 6144  ;;  %p6519_p12 = scmp.lt.s32.totalorder %s6778_s28, %s6778_s28 }
  0x1d   :  { %p6515_p11 = scmp.ne.s32.totalorder %s6778_s28, %s6514_s14  ;;  %p6520_p13 = scmp.lt.s32.totalorder %s6514_s14, %s6514_s14 }
  0x1f   :  { %p6521_p0 = por %p6520_p13, %p6519_p12 }
  0x21   :  { %p6522_p1 = pnand %p6521_p0, %p6515_p11 }
  0x23   :  { %6525 = shalt.err (!%p6522_p1)
}
  0x24   :  { %s6694_s1 = smov 384   ;;  %s6695_s26 = smov 24  }
  0x25   :  { %65 = dma.hbm_to_vmem [thread:$0]  %s7910_s3, 6144, %s6778_s28, [#allocation11], %s6694_s1, %s6694_s1, %s6695_s26  }
  0x26   :  { %s6696_s17 = smov [#allocation13]   ;;  %s6697_s19 = smov [#allocation4]  }
  0x27   :  { %s87_s18 = sshll.u32 %s6696_s17, 4  ;;  %s30_s20 = sshll.u32 %s6697_s19, 4  ;;  %s88_s18 = int_to_ptr.vmem [resolvable:$true] %s87_s18  ;;  %s31_s20 = int_to_ptr.vmem [resolvable:$true] %s30_s20 }
  0x28   :  { %s6526_s23 = scalar_lea.hbm %s7914_s7, 6144 }
  0x29   :  { %p6527_p2 = scmp.ne.s32.totalorder %s7914_s7, %s6526_s23  ;;  %p6530_p3 = scmp.lt.u32.totalorder %s6526_s23, %s7914_s7 }
  0x2b   :  { %p6532_p4 = pnand %p6530_p3, %p6527_p2 }
  0x2d   :  { %6535 = shalt.err (!%p6532_p4)
}
  0x2e   :  { %s6536_s3 = scalar_lea.vmem %s88_s18, 6144  ;;  %p6541_p6 = scmp.lt.s32.totalorder %s88_s18, %s88_s18 }
  0x2f   :  { %p6537_p5 = scmp.ne.s32.totalorder %s88_s18, %s6536_s3  ;;  %p6542_p7 = scmp.lt.s32.totalorder %s6536_s3, %s6536_s3 }
  0x31   :  { %p6543_p8 = por %p6542_p7, %p6541_p6 }
  0x33   :  { %p6544_p9 = pnand %p6543_p8, %p6537_p5 }
  0x35   :  { %6547 = shalt.err (!%p6544_p9)
}
  0x36   :  { %93 = dma.hbm_to_vmem [thread:$0]  %s7914_s7, 6144, %s88_s18, [#allocation14], %s6694_s1, %s6694_s1, %s6695_s26  }
  0x37   :  { %s6548_s16 = scalar_lea.hbm %s7907_s0, 128 }
  0x38   :  { %p6549_p10 = scmp.ne.s32.totalorder %s7907_s0, %s6548_s16  ;;  %p6552_p11 = scmp.lt.u32.totalorder %s6548_s16, %s7907_s0 }
  0x3a   :  { %p6554_p12 = pnand %p6552_p11, %p6549_p10 }
  0x3c   :  { %6557 = shalt.err (!%p6554_p12)
}
  0x3d   :  { %s6558_s23 = scalar_lea.vmem %s31_s20, 128  ;;  %p6563_p0 = scmp.lt.s32.totalorder %s31_s20, %s31_s20 }
  0x3e   :  { %p6559_p13 = scmp.ne.s32.totalorder %s31_s20, %s6558_s23  ;;  %p6564_p1 = scmp.lt.s32.totalorder %s6558_s23, %s6558_s23 }
  0x40   :  { %p6565_p2 = por %p6564_p1, %p6563_p0 }
  0x42   :  { %p6566_p3 = pnand %p6565_p2, %p6559_p13 }
  0x44   :  { %6569 = shalt.err (!%p6566_p3)
}
  0x45   :  { %33 = dma.hbm_to_vmem [thread:$0]  %s7907_s0, 128, %s31_s20, [#allocation5]  }
  0x46   :  { %s6698_s24 = smov [#allocation9]   ;;  %s6699_s27 = smov [#allocation12]  }
  0x47   :  { %s50_s25 = sshll.u32 %s6698_s24, 4  ;;  %s71_s29 = sshll.u32 %s6699_s27, 4  ;;  %s51_s25 = int_to_ptr.vmem [resolvable:$true] %s50_s25  ;;  %s6839_s29 = int_to_ptr.vmem [resolvable:$true] %s71_s29 }
  0x48   :  { %s6570_s30 = scalar_lea.hbm %s7909_s2, 128 }
  0x49   :  { %p6571_p4 = scmp.ne.s32.totalorder %s7909_s2, %s6570_s30  ;;  %p6574_p5 = scmp.lt.u32.totalorder %s6570_s30, %s7909_s2 }
  0x4b   :  { %p6576_p6 = pnand %p6574_p5, %p6571_p4 }
  0x4d   :  { %6579 = shalt.err (!%p6576_p6)
}
  0x4e   :  { %s6580_s0 = scalar_lea.vmem %s51_s25, 128  ;;  %p6585_p8 = scmp.lt.s32.totalorder %s51_s25, %s51_s25 }
  0x4f   :  { %p6581_p7 = scmp.ne.s32.totalorder %s51_s25, %s6580_s0  ;;  %p6586_p9 = scmp.lt.s32.totalorder %s6580_s0, %s6580_s0 }
  0x51   :  { %p6587_p10 = por %p6586_p9, %p6585_p8 }
  0x53   :  { %p6588_p11 = pnand %p6587_p10, %p6581_p7 }
  0x55   :  { %6591 = shalt.err (!%p6588_p11)
}
  0x56   :  { %53 = dma.hbm_to_vmem [thread:$0]  %s7909_s2, 128, %s51_s25, [#allocation8]  }
  0x57   :  { %s6592_s23 = scalar_lea.hbm %s7911_s4, 6144 }
  0x58   :  { %p6593_p12 = scmp.ne.s32.totalorder %s7911_s4, %s6592_s23  ;;  %p6596_p13 = scmp.lt.u32.totalorder %s6592_s23, %s7911_s4 }
  0x5a   :  { %p6598_p0 = pnand %p6596_p13, %p6593_p12 }
  0x5c   :  { %6601 = shalt.err (!%p6598_p0)
}
  0x5d   :  { %s6602_s3 = scalar_lea.vmem %s6839_s29, 6144  ;;  %p6607_p2 = scmp.lt.s32.totalorder %s6839_s29, %s6839_s29 }
  0x5e   :  { %p6603_p1 = scmp.ne.s32.totalorder %s6839_s29, %s6602_s3  ;;  %p6608_p3 = scmp.lt.s32.totalorder %s6602_s3, %s6602_s3 }
  0x60   :  { %p6609_p4 = por %p6608_p3, %p6607_p2 }
  0x62   :  { %p6610_p5 = pnand %p6609_p4, %p6603_p1 }
  0x64   :  { %6613 = shalt.err (!%p6610_p5)
}
  0x65   :  { %77 = dma.hbm_to_vmem [thread:$0]  %s7911_s4, 6144, %s6839_s29, [#allocation11], %s6694_s1, %s6694_s1, %s6695_s26  }
  0x66   :  { %s6700_s28 = smov [#allocation15]   ;;  %s6701_s14 = smov [#allocation16]  }
  0x67   :  { %s99_s30 = sshll.u32 %s6700_s28, 4  ;;  %s115_s15 = sshll.u32 %s6701_s14, 4  ;;  %s100_s30 = int_to_ptr.vmem [resolvable:$true] %s99_s30  ;;  %s6873_s15 = int_to_ptr.vmem [resolvable:$true] %s115_s15 }
  0x68   :  { %s6614_s0 = scalar_lea.hbm %s7915_s8, 6144 }
  0x69   :  { %p6615_p6 = scmp.ne.s32.totalorder %s7915_s8, %s6614_s0  ;;  %p6618_p7 = scmp.lt.u32.totalorder %s6614_s0, %s7915_s8 }
  0x6b   :  { %p6620_p8 = pnand %p6618_p7, %p6615_p6 }
  0x6d   :  { %6623 = shalt.err (!%p6620_p8)
}
  0x6e   :  { %s6624_s4 = scalar_lea.vmem %s100_s30, 6144  ;;  %p6629_p10 = scmp.lt.s32.totalorder %s100_s30, %s100_s30 }
  0x6f   :  { %p6625_p9 = scmp.ne.s32.totalorder %s100_s30, %s6624_s4  ;;  %p6630_p11 = scmp.lt.s32.totalorder %s6624_s4, %s6624_s4 }
  0x71   :  { %p6631_p12 = por %p6630_p11, %p6629_p10 }
  0x73   :  { %p6632_p13 = pnand %p6631_p12, %p6625_p9 }
  0x75   :  { %6635 = shalt.err (!%p6632_p13)
}
  0x76   :  { %105 = dma.hbm_to_vmem [thread:$0]  %s7915_s8, 6144, %s100_s30, [#allocation14], %s6694_s1, %s6694_s1, %s6695_s26  }
  0x77   :  { %s6636_s24 = scalar_lea.hbm %s7918_s11, 2048 }
  0x78   :  { %p6637_p0 = scmp.ne.s32.totalorder %s7918_s11, %s6636_s24  ;;  %p6640_p1 = scmp.lt.u32.totalorder %s6636_s24, %s7918_s11 }
  0x7a   :  { %p6642_p2 = pnand %p6640_p1, %p6637_p0 }
  0x7c   :  { %6645 = shalt.err (!%p6642_p2)
}
  0x7d   :  { %s6646_s28 = scalar_lea.vmem %s6873_s15, 2048  ;;  %p6651_p4 = scmp.lt.s32.totalorder %s6873_s15, %s6873_s15 }
  0x7e   :  { %p6647_p3 = scmp.ne.s32.totalorder %s6873_s15, %s6646_s28  ;;  %p6652_p5 = scmp.lt.s32.totalorder %s6646_s28, %s6646_s28 }
  0x80   :  { %p6653_p6 = por %p6652_p5, %p6651_p4 }
  0x82   :  { %p6654_p7 = pnand %p6653_p6, %p6647_p3 }
  0x84   :  { %6657 = shalt.err (!%p6654_p7)
}
  0x85   :  { %s6702_s8 = smov 128   ;;  %s6703_s1 = smov 8  }
  0x86   :  { %121 = dma.hbm_to_vmem [thread:$0]  %s7918_s11, 2048, %s6873_s15, [#allocation17], %s6702_s8, %s6702_s8, %s6703_s1  }
  0x87   :  { %6680 = dma.done.wait [#allocation5], 128  }
  0x88   :  { %6681 = vsyncadd [#allocation5], 4294967168 }
  0x89   :  { %6682 = dma.done.wait [#allocation8], 1152  }
  0x8a   :  { %6683 = vsyncadd [#allocation8], 4294966144 }
  0x8b   :  { %6684 = dma.done.wait [#allocation11], 12288  }
  0x8c   :  { %6685 = vsyncadd [#allocation11], 4294955008 }
  0x8d   :  { %6686 = dma.done.wait [#allocation14], 12288  }
  0x8e   :  { %6687 = vsyncadd [#allocation14], 4294955008 }
  0x8f   :  { %6688 = dma.done.wait [#allocation17], 2048  }
  0x90   :  { %6689 = vsyncadd [#allocation17], 4294965248  ;;  %v7921_v0 = vmov 0.0   ;;  %v150_v1 = vld [vmem:[#allocation7 + $0x8] sm:$0xff]  ;;  %v149_v2 = vld [vmem:[#allocation7] sm:$0xff]  ;;  %vm199_vm0 = vcmask 64512  }
  0x91   :  { %267 = vmatprep.mubr.f32.mxu0 %v7921_v0  ;;  %681 = vmatprep.mubr.f32.mxu1 %v7921_v0  ;;  %v6912_v3 = vld [vmem:[#allocation4] sm:$0xff]  ;;  %v151_v5 = vld [vmem:[#allocation7 + $0x10] sm:$0xff]  ;;  %v154_v6 = vld [vmem:[#allocation7 + $0x28] sm:$0xff]  ;;  %vm6706_vm1 = vmmov 0  }
  0x92   :  { %203 = vmatprep.subr.mxu0 %v150_v1  ;;  %v152_v4 = vld [vmem:[#allocation7 + $0x18] sm:$0xff]  ;;  %v496_v7 = vld [vmem:[#allocation10 + $0x8] sm:$0xff]  ;;  %v499_v8 = vld [vmem:[#allocation10 + $0x20] sm:$0xff] }
  0x93   :  { %204 = vmatpush1.msra.mxu0 %v149_v2  ;;  %v495_v9 = vld [vmem:[#allocation10] sm:$0xff]  ;;  %v153_v10 = vld [vmem:[#allocation7 + $0x20] sm:$0xff]  ;;  %v156_v11 = vld [vmem:[#allocation7 + $0x38] sm:$0xff]  ;;  %v5185_v12 = vpack.c.bf16 %v499_v8, %v496_v7 }
  0x94   :  { %4110 = vmatmul.mubr.msk.f32.vlgmr.msra.gmra.mrb[0].mxu0 %vm199_vm0, %v6912_v3  ;;  %274 = vmatprep.subr.mxu0 %v152_v4  ;;  %v498_v13 = vld [vmem:[#allocation10 + $0x18] sm:$0xff]  ;;  %v544_v15 = vld [vmem:[#allocation12 + $0x8] sm:$0xff]  ;;  %v505_v17 = vld [vmem:[#allocation10 + $0x50] sm:$0xff] }
  0x95   :  { %275 = vmatpush1.msra.mxu0 %v151_v5  ;;  %338 = vmatprep.mubr.f32.mxu0 %v7921_v0  ;;  %v5187_v14 = vpack.c.bf16 %v498_v13, %v495_v9  ;;  %v502_v16 = vld [vmem:[#allocation10 + $0x38] sm:$0xff]  ;;  %v547_v18 = vld [vmem:[#allocation12 + $0x20] sm:$0xff]  ;;  %v501_v20 = vld [vmem:[#allocation10 + $0x30] sm:$0xff] }
  0x96   :  { %345 = vmatprep.subr.mxu0 %v154_v6  ;;  %5186 = vmatprep.subr.bf16.mxu1 %v5185_v12  ;;  %v5189_v19 = vpack.c.bf16 %v505_v17, %v502_v16  ;;  %v504_v21 = vld [vmem:[#allocation10 + $0x48] sm:$0xff]  ;;  %v543_v25 = vld [vmem:[#allocation12] sm:$0xff]  ;;  %v546_v26 = vld [vmem:[#allocation12 + $0x18] sm:$0xff]  ;;  %v6920_v28 = vpack.c.bf16 %v547_v18, %v544_v15 }
  0x97   :  { %v155_v22 = vld [vmem:[#allocation7 + $0x30] sm:$0xff]  ;;  %5188 = vmatpush1.bf16.msra.mxu1 %v5187_v14  ;;  %v5191_v23 = vpack.c.bf16 %v504_v21, %v501_v20  ;;  %v511_v27 = vld [vmem:[#allocation10 + $0x80] sm:$0xff]  ;;  %v550_v29 = vld [vmem:[#allocation12 + $0x38] sm:$0xff]  ;;  %v6925_v37 = vpack.c.bf16 %v546_v26, %v543_v25 }
  0x98   :  { %4111 = vmatmul.mubr.msk.f32.vlgmr.msra.gmra.mrb[2].mxu0 %vm199_vm0, %v6912_v3  ;;  %v508_v24 = vld [vmem:[#allocation10 + $0x68] sm:$0xff]  ;;  %5190 = vmatprep.subr.bf16.mxu1 %v5189_v19  ;;  %v507_v31 = vld [vmem:[#allocation10 + $0x60] sm:$0xff]  ;;  %v510_v32 = vld [vmem:[#allocation10 + $0x78] sm:$0xff] }
  0x99   :  { %346 = vmatpush1.msra.mxu0 %v153_v10  ;;  %409 = vmatprep.mubr.f32.mxu0 %v7921_v0  ;;  %v5193_v30 = vpack.c.bf16 %v511_v27, %v508_v24  ;;  %v553_v33 = vld [vmem:[#allocation12 + $0x50] sm:$0xff]  ;;  %v514_v34 = vld [vmem:[#allocation10 + $0x98] sm:$0xff]  ;;  %v5195_v36 = vpack.c.bf16 %v510_v32, %v507_v31  ;;  %v516_v41 = vld [vmem:[#allocation10 + $0xa8] sm:$0xff] }
  0x9a   :  { %416 = vmatprep.subr.mxu0 %v156_v11  ;;  %v517_v35 = vld [vmem:[#allocation10 + $0xb0] sm:$0xff]  ;;  %v6928_v42 = vpack.c.bf16 %v553_v33, %v550_v29  ;;  %v552_v43 = vld [vmem:[#allocation12 + $0x48] sm:$0xff]  ;;  %v523_v45 = vld [vmem:[#allocation10 + $0xe0] sm:$0xff] }
  0x9b   :  { %5192 = vmatpush1.bf16.msra.mxu1 %v5191_v23  ;;  %v549_v38 = vld [vmem:[#allocation12 + $0x30] sm:$0xff]  ;;  %v5197_v39 = vpack.c.bf16 %v517_v35, %v514_v34  ;;  %v520_v44 = vld [vmem:[#allocation10 + $0xc8] sm:$0xff]  ;;  %v559_v47 = vld [vmem:[#allocation12 + $0x80] sm:$0xff] }
  0x9c   :  { %4112 = vmatmul.mubr.msk.f32.vlgmr.msra.gmra.mrb[4].mxu0 %vm199_vm0, %v6912_v3  ;;  %v513_v40 = vld [vmem:[#allocation10 + $0x90] sm:$0xff]  ;;  %5194 = vmatprep.subr.bf16.mxu1 %v5193_v30  ;;  %v556_v46 = vld [vmem:[#allocation12 + $0x68] sm:$0xff]  ;;  %v6933_v49 = vpack.c.bf16 %v552_v43, %v549_v38  ;;  %v555_v50 = vld [vmem:[#allocation12 + $0x60] sm:$0xff]  ;;  %v5201_v51 = vpack.c.bf16 %v523_v45, %v520_v44 }
  0x9d   :  { %417 = vmatpush1.msra.mxu0 %v155_v22  ;;  %480 = vmatprep.mubr.f32.mxu0 %v7921_v0  ;;  %v5199_v48 = vpack.c.bf16 %v516_v41, %v513_v40  ;;  %v519_v52 = vld [vmem:[#allocation10 + $0xc0] sm:$0xff]  ;;  %v522_v53 = vld [vmem:[#allocation10 + $0xd8] sm:$0xff]  ;;  %v6936_v54 = vpack.c.bf16 %v559_v47, %v556_v46  ;;  %v529_v57 = vld [vmem:[#allocation10 + $0x110] sm:$0xff] }
  0x9e   :  { %5250 = vmatprep.subr.bf16.mxu0 %v6920_v28  ;;  %v558_v55 = vld [vmem:[#allocation12 + $0x78] sm:$0xff]  ;;  %v565_v59 = vld [vmem:[#allocation12 + $0xb0] sm:$0xff]  ;;  %v5203_v60 = vpack.c.bf16 %v522_v53, %v519_v52  ;;  %v528_v2 = vld [vmem:[#allocation10 + $0x108] sm:$0xff] }
  0x9f   :  { %5196 = vmatpush1.bf16.msra.mxu1 %v5195_v36  ;;  %v526_v56 = vld [vmem:[#allocation10 + $0xf8] sm:$0xff]  ;;  %v6940_v61 = vpack.c.bf16 %v558_v55, %v555_v50  ;;  %v561_v62 = vld [vmem:[#allocation12 + $0x90] sm:$0xff]  ;;  %v564_v4 = vld [vmem:[#allocation12 + $0xa8] sm:$0xff]  ;;  %v159_v50 = vlaneseq }
  0xa0   :  { %4113 = vmatmul.mubr.msk.f32.vlgmr.msra.gmra.mrb[6].mxu0 %vm199_vm0, %v6912_v3  ;;  %5198 = vmatprep.subr.bf16.mxu1 %v5197_v39  ;;  %v562_v58 = vld [vmem:[#allocation12 + $0x98] sm:$0xff]  ;;  %v5205_v63 = vpack.c.bf16 %v529_v57, %v526_v56  ;;  %v525_v1 = vld [vmem:[#allocation10 + $0xf0] sm:$0xff]  ;;  %v532_v5 = vld [vmem:[#allocation10 + $0x128] sm:$0xff]  ;;  %v6946_v10 = vpack.c.bf16 %v564_v4, %v561_v62 }
  0xa1   :  { %5252 = vmatpush1.bf16.msra.mxu0 %v6925_v37  ;;  %929 = vmatprep.mubr.f32.mxu0 %v7921_v0  ;;  %v6943_v3 = vpack.c.bf16 %v565_v59, %v562_v58  ;;  %v535_v6 = vld [vmem:[#allocation10 + $0x140] sm:$0xff]  ;;  %v568_v7 = vld [vmem:[#allocation12 + $0xc8] sm:$0xff]  ;;  %v5207_v9 = vpack.c.bf16 %v528_v2, %v525_v1  ;;  %v534_v14 = vld [vmem:[#allocation10 + $0x138] sm:$0xff] }
  0xa2   :  { %5254 = vmatprep.subr.bf16.mxu0 %v6928_v42  ;;  %v571_v8 = vld [vmem:[#allocation12 + $0xe0] sm:$0xff]  ;;  %v5209_v12 = vpack.c.bf16 %v535_v6, %v532_v5  ;;  %v570_v16 = vld [vmem:[#allocation12 + $0xd8] sm:$0xff]  ;;  %v541_v18 = vld [vmem:[#allocation10 + $0x170] sm:$0xff] }
  0xa3   :  { %5200 = vmatpush1.bf16.msra.mxu1 %v5199_v48  ;;  %v567_v11 = vld [vmem:[#allocation12 + $0xc0] sm:$0xff]  ;;  %v6949_v15 = vpack.c.bf16 %v571_v8, %v568_v7  ;;  %v538_v17 = vld [vmem:[#allocation10 + $0x158] sm:$0xff]  ;;  %v577_v20 = vld [vmem:[#allocation12 + $0x110] sm:$0xff] }
  0xa4   :  { %5202 = vmatprep.subr.bf16.mxu1 %v5201_v51  ;;  %v531_v13 = vld [vmem:[#allocation10 + $0x120] sm:$0xff]  ;;  %v574_v19 = vld [vmem:[#allocation12 + $0xf8] sm:$0xff]  ;;  %v6952_v22 = vpack.c.bf16 %v570_v16, %v567_v11  ;;  %v5213_v23 = vpack.c.bf16 %v541_v18, %v538_v17  ;;  %v537_v24 = vld [vmem:[#allocation10 + $0x150] sm:$0xff]  ;;  %v6993_v51 = vshrl.u32 %v159_v50, 7 }
  0xa5   :  { %5256 = vmatpush1.bf16.msra.mxu0 %v6933_v49  ;;  %v5211_v21 = vpack.c.bf16 %v534_v14, %v531_v13  ;;  %v540_v25 = vld [vmem:[#allocation10 + $0x168] sm:$0xff]  ;;  %v6955_v26 = vpack.c.bf16 %v577_v20, %v574_v19  ;;  %v573_v27 = vld [vmem:[#allocation12 + $0xf0] sm:$0xff]  ;;  %v583_v31 = vld [vmem:[#allocation12 + $0x140] sm:$0xff] }
  0xa6   :  { %5258 = vmatprep.subr.bf16.mxu0 %v6936_v54  ;;  %v576_v29 = vld [vmem:[#allocation12 + $0x108] sm:$0xff]  ;;  %v5215_v32 = vpack.c.bf16 %v540_v25, %v537_v24  ;;  %v579_v35 = vld [vmem:[#allocation12 + $0x120] sm:$0xff]  ;;  %v582_v36 = vld [vmem:[#allocation12 + $0x138] sm:$0xff]  ;;  %v6996_v52 = vsub.s32 0, %v6993_v51  ;;  %v7003_v56 = vsub.s32 1, %v6993_v51  ;;  %v7006_v59 = vsub.s32 2, %v6993_v51 }
  0xa7   :  { %5204 = vmatpush1.bf16.msra.mxu1 %v5203_v60  ;;  %v580_v30 = vld [vmem:[#allocation12 + $0x128] sm:$0xff]  ;;  %v6958_v33 = vpack.c.bf16 %v576_v29, %v573_v27  ;;  %v6964_v38 = vpack.c.bf16 %v582_v36, %v579_v35  ;;  %v586_v39 = vld [vmem:[#allocation12 + $0x158] sm:$0xff]  ;;  %v589_v40 = vld [vmem:[#allocation12 + $0x170] sm:$0xff]  ;;  %v177_v17 = vsub.s32 4, %v6993_v51 }
  0xa8   :  { %5206 = vmatprep.subr.bf16.mxu1 %v5205_v63  ;;  %v6961_v34 = vpack.c.bf16 %v583_v31, %v580_v30  ;;  %v6968_v41 = vpack.c.bf16 %v589_v40, %v586_v39  ;;  %v497_v43 = vld [vmem:[#allocation10 + $0x10] sm:$0xff]  ;;  %v500_v44 = vld [vmem:[#allocation10 + $0x28] sm:$0xff]  ;;  %7928 = vst [vmem:[#allocation25_spill] sm:$0xff] %v6996_v52  ;;  %v6998_v53 = vld [vmem:[#allocation9] sm:$0xff]  ;;  %v181_v30 = vsub.s32 5, %v6993_v51  ;;  %v185_v40 = vsub.s32 6, %v6993_v51 }
  0xa9   :  { %5260 = vmatpush1.bf16.msra.mxu0 %v6940_v61  ;;  %v585_v45 = vld [vmem:[#allocation12 + $0x150] sm:$0xff]  ;;  %v5217_v46 = vpack.c.bf16 %v500_v44, %v497_v43  ;;  %v588_v47 = vld [vmem:[#allocation12 + $0x168] sm:$0xff]  ;;  %v162_v55 = vrot.slane %v6998_v53, %v6996_v52  ;;  %7929 = vst [vmem:[#allocation26_spill] sm:$0xff] %v7003_v56  ;;  %v503_v57 = vld [vmem:[#allocation10 + $0x40] sm:$0xff]  ;;  %v166_v63 = vrot.slane %v6998_v53, %v7003_v56 }
  0xaa   :  { %5262 = vmatprep.subr.bf16.mxu0 %v6943_v3  ;;  %v6971_v48 = vpack.c.bf16 %v588_v47, %v585_v45  ;;  %v506_v58 = vld [vmem:[#allocation10 + $0x58] sm:$0xff]  ;;  %7930 = vst [vmem:[#allocation27_spill] sm:$0xff] %v7006_v59  ;;  %v509_v4 = vld [vmem:[#allocation10 + $0x70] sm:$0xff]  ;;  %v512_v5 = vld [vmem:[#allocation10 + $0x88] sm:$0xff]  ;;  %v170_v6 = vrot.slane %v6998_v53, %v7006_v59  ;;  %v178_v25 = vrot.slane %v6998_v53, %v177_v17 }
  0xab   :  { %5208 = vmatpush1.bf16.msra.mxu1 %v5207_v9  ;;  %v5221_v2 = vpack.c.bf16 %v506_v58, %v503_v57  ;;  %v173_v9 = vsub.s32 3, %v6993_v51  ;;  %v515_v13 = vld [vmem:[#allocation10 + $0xa0] sm:$0xff]  ;;  %v518_v14 = vld [vmem:[#allocation10 + $0xb8] sm:$0xff]  ;;  %v524_v24 = vld [vmem:[#allocation10 + $0xe8] sm:$0xff]  ;;  %v182_v43 = vrot.slane %v6998_v53, %v181_v30  ;;  %v186_v47 = vrot.slane %v6998_v53, %v185_v40 }
  0xac   :  { %5210 = vmatprep.subr.bf16.mxu1 %v5209_v12  ;;  %v5225_v12 = vpack.c.bf16 %v512_v5, %v509_v4  ;;  %v5229_v20 = vpack.c.bf16 %v518_v14, %v515_v13  ;;  %v527_v35 = vld [vmem:[#allocation10 + $0x100] sm:$0xff]  ;;  %v530_v36 = vld [vmem:[#allocation10 + $0x118] sm:$0xff]  ;;  %v533_v45 = vld [vmem:[#allocation10 + $0x130] sm:$0xff] }
  0xad   :  { %5264 = vmatpush1.bf16.msra.mxu0 %v6946_v10  ;;  %v174_v19 = vrot.slane %v6998_v53, %v173_v9  ;;  %v5237_v44 = vpack.c.bf16 %v530_v36, %v527_v35  ;;  %v539_v58 = vld [vmem:[#allocation10 + $0x160] sm:$0xff]  ;;  %v545_v5 = vld [vmem:[#allocation12 + $0x10] sm:$0xff]  ;;  %v554_v9 = vld [vmem:[#allocation12 + $0x58] sm:$0xff] }
  0xae   :  { %5266 = vmatprep.subr.bf16.mxu0 %v6949_v15  ;;  %v560_v13 = vld [vmem:[#allocation12 + $0x88] sm:$0xff]  ;;  %v563_v14 = vld [vmem:[#allocation12 + $0xa0] sm:$0xff]  ;;  %v569_v17 = vld [vmem:[#allocation12 + $0xd0] sm:$0xff] }
  0xaf   :  { %5212 = vmatpush1.bf16.msra.mxu1 %v5211_v21  ;;  %v590_v30 = vld [vmem:[#allocation12 + $0x178] sm:$0xff]  ;;  %v591_v36 = vld [vmem:[%s7912_s5] sm:$0x7] }
  0xb0   :  { %5214 = vmatprep.subr.bf16.mxu1 %v5213_v23  ;;  %v521_v23 = vld [vmem:[#allocation10 + $0xd0] sm:$0xff]  ;;  %v609_v40 = vrot.slane %v591_v36, %v7003_v56 }
  0xb1   :  { %5268 = vmatpush1.bf16.msra.mxu0 %v6952_v22  ;;  %v5233_v31 = vpack.c.bf16 %v524_v24, %v521_v23  ;;  %v581_v24 = vld [vmem:[#allocation12 + $0x130] sm:$0xff] }
  0xb2   :  { %5270 = vmatprep.subr.bf16.mxu0 %v6955_v26 }
  0xb3   :  { %5216 = vmatpush1.bf16.msra.mxu1 %v5215_v32 }
  0xb4   :  { %5218 = vmatprep.subr.bf16.mxu1 %v5217_v46 }
  0xb5   :  { %5272 = vmatpush1.bf16.msra.mxu0 %v6958_v33 }
  0xb6   :  { %5274 = vmatprep.subr.bf16.mxu0 %v6961_v34 }
  0xb9   :  { %5276 = vmatpush1.bf16.msra.mxu0 %v6964_v38 }
  0xba   :  { %5278 = vmatprep.subr.bf16.mxu0 %v6968_v41 }
  0xbd   :  { %5280 = vmatpush1.bf16.msra.mxu0 %v6971_v48 }
  0xbe   :  { %5306 = vmatprep.subr.bf16.mxu0 %v6920_v28 }
  0xc0   :  { %930 = vmatmul.mubr.f32.vlgmr.msra.gmra.mrb[8].mxu0 %v7921_v0 }
  0xc1   :  { %5308 = vmatpush1.bf16.msra.mxu0 %v6925_v37  ;;  %1105 = vmatprep.mubr.f32.mxu0 %v7921_v0 }
  0xc2   :  { %5310 = vmatprep.subr.bf16.mxu0 %v6928_v42 }
  0xc5   :  { %5312 = vmatpush1.bf16.msra.mxu0 %v6933_v49 }
  0xc6   :  { %5314 = vmatprep.subr.bf16.mxu0 %v6936_v54 }
  0xc9   :  { %5316 = vmatpush1.bf16.msra.mxu0 %v6940_v61 }
  0xca   :  { %5318 = vmatprep.subr.bf16.mxu0 %v6943_v3 }
  0xcd   :  { %5320 = vmatpush1.bf16.msra.mxu0 %v6946_v10 }
  0xce   :  { %5322 = vmatprep.subr.bf16.mxu0 %v6949_v15 }
  0xd1   :  { %5324 = vmatpush1.bf16.msra.mxu0 %v6952_v22 }
  0xd2   :  { %5326 = vmatprep.subr.bf16.mxu0 %v6955_v26 }
  0xd5   :  { %5328 = vmatpush1.bf16.msra.mxu0 %v6958_v33 }
  0xd6   :  { %5330 = vmatprep.subr.bf16.mxu0 %v6961_v34 }
  0xd9   :  { %5332 = vmatpush1.bf16.msra.mxu0 %v6964_v38 }
  0xda   :  { %5334 = vmatprep.subr.bf16.mxu0 %v6968_v41 }
  0xdd   :  { %5336 = vmatpush1.bf16.msra.mxu0 %v6971_v48 }
  0xde   :  { %5362 = vmatprep.subr.bf16.mxu0 %v6920_v28 }
 0x167   :  { %v269_v60 = vpop.f32.mrb[0].mxu0 }
 0x168   :  { %v7008_v62 = vadd.f32 %v269_v60, %v162_v55  ;;  %v271_v1 = vpop.f32.mrb[1].mxu0  ;;  %v189_v55 = vsub.s32 7, %v6993_v51  ;;  %v542_v60 = vld [vmem:[#allocation10 + $0x178] sm:$0xff]  ;;  %v548_v51 = vld [vmem:[#allocation12 + $0x28] sm:$0xff] }
 0x169   :  { %v7016_v8 = vadd.f32 %v271_v1, %v166_v63 }
 0x16a   :  { %682 = vmatmul.mubr.f32.vlgmr.msra.gmra.mrb[0].mxu1 %v7008_v62  ;;  %v190_v1 = vrot.slane %v6998_v53, %v189_v55  ;;  %v551_v53 = vld [vmem:[#allocation12 + $0x40] sm:$0xff] }
 0x16b   :  { %5220 = vmatpush3.bf16.msra.mxu1 %v5217_v46  ;;  %687 = vmatprep.mubr.f32.mxu1 %v7921_v0  ;;  %v340_v7 = vpop.f32.mrb[2].mxu0  ;;  %v536_v46 = vld [vmem:[#allocation10 + $0x148] sm:$0xff] }
 0x16c   :  { %5222 = vmatprep.subr.bf16.mxu1 %v5221_v2  ;;  %v342_v11 = vpop.f32.mrb[3].mxu0  ;;  %v7019_v16 = vadd.f32 %v340_v7, %v170_v6  ;;  %v5241_v57 = vpack.c.bf16 %v536_v46, %v533_v45  ;;  %v7039_v6 = vpack.c.bf16 %v548_v51, %v545_v5  ;;  %v7923_v7 = vmov 0.0|0.0  }
 0x16d   :  { %v343_v29 = vadd.f32 %v342_v11, %v174_v19  ;;  %v7045_v11 = vpack.c.bf16 %v554_v9, %v551_v53 }
 0x16e   :  { %688 = vmatmul.mubr.f32.gmra.mrb[2].mxu1 %v7016_v8 }
 0x16f   :  { %5224 = vmatpush3.bf16.msra.mxu1 %v5221_v2  ;;  %693 = vmatprep.mubr.f32.mxu1 %v7921_v0  ;;  %v411_v18 = vpop.f32.mrb[4].mxu0  ;;  %v5245_v2 = vpack.c.bf16 %v542_v60, %v539_v58 }
 0x170   :  { %5226 = vmatprep.subr.bf16.mxu1 %v5225_v12  ;;  %v413_v21 = vpop.f32.mrb[5].mxu0  ;;  %v412_v39 = vadd.f32 %v411_v18, %v178_v25  ;;  %v572_v18 = vld [vmem:[#allocation12 + $0xe8] sm:$0xff] }
 0x171   :  { %v414_v50 = vadd.f32 %v413_v21, %v182_v43  ;;  %v7057_v19 = vpack.c.bf16 %v572_v18, %v569_v17  ;;  %v578_v21 = vld [vmem:[#allocation12 + $0x118] sm:$0xff]  ;;  %v584_v25 = vld [vmem:[#allocation12 + $0x148] sm:$0xff] }
 0x172   :  { %694 = vmatmul.mubr.f32.gmra.mrb[4].mxu1 %v7019_v16 }
 0x173   :  { %5228 = vmatpush3.bf16.msra.mxu1 %v5225_v12  ;;  %699 = vmatprep.mubr.f32.mxu1 %v7921_v0  ;;  %v482_v27 = vpop.f32.mrb[6].mxu0  ;;  %v557_v12 = vld [vmem:[#allocation12 + $0x70] sm:$0xff] }
 0x174   :  { %5230 = vmatprep.subr.bf16.mxu1 %v5229_v20  ;;  %v484_v32 = vpop.f32.mrb[7].mxu0  ;;  %v483_v63 = vadd.f32 %v482_v27, %v186_v47  ;;  %v7067_v27 = vpack.c.bf16 %v584_v25, %v581_v24 }
 0x175   :  { %v485_v4 = vadd.f32 %v484_v32, %v190_v1 }
 0x176   :  { %700 = vmatmul.mubr.f32.gmra.mrb[6].mxu1 %v343_v29 }
 0x177   :  { %5232 = vmatpush3.bf16.msra.mxu1 %v5229_v20  ;;  %705 = vmatprep.mubr.f32.mxu1 %v7921_v0  ;;  %v575_v20 = vld [vmem:[#allocation12 + $0x100] sm:$0xff] }
 0x178   :  { %5234 = vmatprep.subr.bf16.mxu1 %v5233_v31  ;;  %v7063_v23 = vpack.c.bf16 %v578_v21, %v575_v20 }
 0x17a   :  { %706 = vmatmul.mubr.f32.gmra.mrb[8].mxu1 %v412_v39 }
 0x17b   :  { %5236 = vmatpush3.bf16.msra.mxu1 %v5233_v31  ;;  %711 = vmatprep.mubr.f32.mxu1 %v7921_v0 }
 0x17c   :  { %5238 = vmatprep.subr.bf16.mxu1 %v5237_v44 }
 0x17e   :  { %712 = vmatmul.mubr.f32.gmra.mrb[10].mxu1 %v414_v50 }
 0x17f   :  { %5240 = vmatpush3.bf16.msra.mxu1 %v5237_v44  ;;  %717 = vmatprep.mubr.f32.mxu1 %v7921_v0 }
 0x180   :  { %5242 = vmatprep.subr.bf16.mxu1 %v5241_v57 }
 0x182   :  { %718 = vmatmul.mubr.f32.gmra.mrb[12].mxu1 %v483_v63 }
 0x183   :  { %5244 = vmatpush3.bf16.msra.mxu1 %v5241_v57  ;;  %723 = vmatprep.mubr.f32.mxu1 %v7921_v0 }
 0x184   :  { %5246 = vmatprep.subr.bf16.mxu1 %v5245_v2 }
 0x186   :  { %724 = vmatmul.mubr.f32.gmra.mrb[14].mxu1 %v485_v4 }
 0x187   :  { %5248 = vmatpush3.bf16.msra.mxu1 %v5245_v2  ;;  %4525 = vmatprep.mubr.f32.mxu1 %v7008_v62  ;;  %v7049_v62 = vpack.c.bf16 %v560_v13, %v557_v12 }
 0x188   :  { %5281 = vmatprep.subr.bf16.mxu1 %v7923_v7 }
 0x18a   :  { %4526 = vmatmul.mubr.f32.vlgmr.msra.gmra.mrb[16].mxu1 %v7016_v8  ;;  %v566_v8 = vld [vmem:[#allocation12 + $0xb8] sm:$0xff] }
 0x18b   :  { %5283 = vmatpush3.bf16.msra.mxu1 %v7039_v6  ;;  %4528 = vmatprep.mubr.f32.mxu1 %v7019_v16  ;;  %v7053_v16 = vpack.c.bf16 %v566_v8, %v563_v14 }
 0x18c   :  { %5284 = vmatprep.subr.bf16.mxu1 %v7923_v7 }
 0x18e   :  { %4529 = vmatmul.mubr.f32.gmra.mrb[18].mxu1 %v343_v29  ;;  %v587_v29 = vld [vmem:[#allocation12 + $0x160] sm:$0xff] }
 0x18f   :  { %5286 = vmatpush3.bf16.msra.mxu1 %v7045_v11  ;;  %4531 = vmatprep.mubr.f32.mxu1 %v412_v39  ;;  %v7071_v31 = vpack.c.bf16 %v590_v30, %v587_v29  ;;  %v605_v39 = vrot.slane %v591_v36, %v6996_v52 }
 0x190   :  { %5287 = vmatprep.subr.bf16.mxu1 %v7923_v7 }
 0x192   :  { %4532 = vmatmul.mubr.f32.gmra.mrb[20].mxu1 %v414_v50 }
 0x193   :  { %5289 = vmatpush3.bf16.msra.mxu1 %v7049_v62  ;;  %4534 = vmatprep.mubr.f32.mxu1 %v483_v63  ;;  %v931_v32 = vpop.f32.mrb[8].mxu0 }
 0x194   :  { %5290 = vmatprep.subr.bf16.mxu1 %v7923_v7  ;;  %v933_v35 = vpop.f32.mrb[9].mxu0 }
 0x196   :  { %4535 = vmatmul.mubr.f32.gmra.mrb[22].mxu1 %v485_v4 }
 0x197   :  { %5292 = vmatpush3.bf16.msra.mxu1 %v7053_v16  ;;  %4569 = vmatprep.mubr.msk.f32.mxu1 %vm6706_vm1, %v7921_v0 }
 0x198   :  { %5293 = vmatprep.subr.bf16.mxu1 %v7923_v7 }
 0x19b   :  { %5295 = vmatpush3.bf16.msra.mxu1 %v7057_v19 }
 0x19c   :  { %5296 = vmatprep.subr.bf16.mxu1 %v7923_v7 }
 0x19f   :  { %5298 = vmatpush3.bf16.msra.mxu1 %v7063_v23 }
 0x1a0   :  { %5299 = vmatprep.subr.bf16.mxu1 %v7923_v7 }
 0x1a3   :  { %5301 = vmatpush3.bf16.msra.mxu1 %v7067_v27 }
 0x1a4   :  { %5302 = vmatprep.subr.bf16.mxu1 %v7923_v7 }
 0x1a7   :  { %5304 = vmatpush3.bf16.msra.mxu1 %v7071_v31 }
 0x1a8   :  { %5337 = vmatprep.subr.bf16.mxu1 %v7923_v7 }
 0x1aa   :  { %4570 = vmatmul.mubr.f32.vlgmr.msra.gmra.mrb[24].mxu1 %v7921_v0 }
 0x1ab   :  { %5339 = vmatpush3.bf16.msra.mxu1 %v7039_v6  ;;  %4604 = vmatprep.mubr.msk.f32.mxu1 %vm6706_vm1, %v7921_v0 }
 0x1ac   :  { %5340 = vmatprep.subr.bf16.mxu1 %v7923_v7 }
 0x1af   :  { %5342 = vmatpush3.bf16.msra.mxu1 %v7045_v11 }
 0x1b0   :  { %5343 = vmatprep.subr.bf16.mxu1 %v7923_v7 }
 0x1b3   :  { %5345 = vmatpush3.bf16.msra.mxu1 %v7049_v62 }
 0x1b4   :  { %5346 = vmatprep.subr.bf16.mxu1 %v7923_v7 }
 0x1b7   :  { %5348 = vmatpush3.bf16.msra.mxu1 %v7053_v16 }
 0x1b8   :  { %5349 = vmatprep.subr.bf16.mxu1 %v7923_v7 }
 0x1bb   :  { %5351 = vmatpush3.bf16.msra.mxu1 %v7057_v19 }
 0x1bc   :  { %5352 = vmatprep.subr.bf16.mxu1 %v7923_v7 }
 0x1bf   :  { %5354 = vmatpush3.bf16.msra.mxu1 %v7063_v23 }
 0x1c0   :  { %5355 = vmatprep.subr.bf16.mxu1 %v7923_v7 }
 0x1c3   :  { %5357 = vmatpush3.bf16.msra.mxu1 %v7067_v27 }
 0x1c4   :  { %5358 = vmatprep.subr.bf16.mxu1 %v7923_v7 }
 0x1c7   :  { %5360 = vmatpush3.bf16.msra.mxu1 %v7071_v31 }
 0x1c8   :  { %5393 = vmatprep.subr.bf16.mxu1 %v7923_v7 }
 0x23d   :  { %v683_v43 = vpop.f32.mrb[0].mxu1 }
 0x23e   :  { %v684_v44 = vadd.f32 %v683_v43, %v605_v39  ;;  %v685_v45 = vpop.f32.mrb[1].mxu1 }
 0x23f   :  { %v686_v46 = vadd.f32 %v685_v45, %v609_v40 }
 0x240   :  { %v1006_v47 = vadd.f32 %v931_v32, %v684_v44 }
 0x241   :  { %v1013_v50 = vadd.f32 %v933_v35, %v686_v46  ;;  %v689_v55 = vpop.f32.mrb[2].mxu1  ;;  %v613_v35 = vrot.slane %v591_v36, %v7006_v59 }
 0x242   :  { %v7100_v57 = vadd.f32 %v689_v55, %v605_v39  ;;  %v691_v58 = vpop.f32.mrb[3].mxu1 }
 0x243   :  { %v7102_v60 = vadd.f32 %v691_v58, %v609_v40 }
 0x245   :  { %v695_v63 = vpop.f32.mrb[4].mxu1 }
 0x246   :  { %v7104_v1 = vadd.f32 %v695_v63, %v605_v39  ;;  %v697_v2 = vpop.f32.mrb[5].mxu1 }
 0x247   :  { %v7106_v4 = vadd.f32 %v697_v2, %v609_v40  ;;  %v4114_v2 = vmul.f32 -1.442695, %v1006_v47 }
 0x249   :  { %v701_v5 = vpop.f32.mrb[6].mxu1  ;;  %6321 = vpow2.f32 %v4114_v2  ;;  %v7146_v2 = vld [vmem:[%s7913_s6] ss:$0 sm:$0xff] }
 0x24a   :  { %v7108_v51 = vadd.f32 %v701_v5, %v605_v39  ;;  %v703_v53 = vpop.f32.mrb[7].mxu1 }
 0x24b   :  { %v7110_v9 = vadd.f32 %v703_v53, %v609_v40 }
 0x24d   :  { %v707_v12 = vpop.f32.mrb[8].mxu1 }
 0x24e   :  { %v7112_v13 = vadd.f32 %v707_v12, %v605_v39  ;;  %v709_v14 = vpop.f32.mrb[9].mxu1 }
 0x24f   :  { %v7114_v8 = vadd.f32 %v709_v14, %v609_v40 }
 0x251   :  { %v713_v17 = vpop.f32.mrb[10].mxu1 }
 0x252   :  { %v7116_v18 = vadd.f32 %v713_v17, %v605_v39  ;;  %v715_v20 = vpop.f32.mrb[11].mxu1 }
 0x253   :  { %v7118_v21 = vadd.f32 %v715_v20, %v609_v40  ;;  %v6322_v47 = vpop.eup %6321 }
 0x255   :  { %v719_v24 = vpop.f32.mrb[12].mxu1 }
 0x256   :  { %v7120_v25 = vadd.f32 %v719_v24, %v605_v39  ;;  %v721_v29 = vpop.f32.mrb[13].mxu1 }
 0x257   :  { %v7122_v30 = vadd.f32 %v721_v29, %v609_v40 }
 0x259   :  { %v725_v32 = vpop.f32.mrb[14].mxu1 }
 0x25a   :  { %v7125_v43 = vadd.f32 %v725_v32, %v605_v39  ;;  %v727_v44 = vpop.f32.mrb[15].mxu1  ;;  %v4115_v32 = vmul.f32 -1.442695, %v1013_v50 }
 0x25b   :  { %v7127_v45 = vadd.f32 %v727_v44, %v609_v40 }
 0x25c   :  { %6323 = vpow2.f32 %v4115_v32 }
 0x25d   :  { %v4527_v46 = vpop.f32.mrb[16].mxu1 }
 0x25e   :  { %v7129_v55 = vadd.f32 %v4527_v46, %v613_v35  ;;  %v796_v58 = vpop.f32.mrb[17].mxu1  ;;  %v1010_v46 = vadd.f32 1.0, %v6322_v47 }
 0x25f   :  { %v797_v63 = vadd.f32 %v796_v58, %v613_v35 }
 0x260   :  { %6325 = vrcp.f32 %v1010_v46 }
 0x261   :  { %v4530_v5 = vpop.f32.mrb[18].mxu1 }
 0x262   :  { %v7131_v53 = vadd.f32 %v4530_v5, %v613_v35  ;;  %v806_v12 = vpop.f32.mrb[19].mxu1 }
 0x263   :  { %v7133_v14 = vadd.f32 %v806_v12, %v613_v35 }
 0x265   :  { %v4533_v17 = vpop.f32.mrb[20].mxu1 }
 0x266   :  { %v7135_v36 = vadd.f32 %v4533_v17, %v613_v35  ;;  %v816_v39 = vpop.f32.mrb[21].mxu1  ;;  %v6324_v58 = vpop.eup %6323 }
 0x267   :  { %v7137_v20 = vadd.f32 %v816_v39, %v613_v35  ;;  %v1017_v5 = vadd.f32 1.0, %v6324_v58  ;;  %v7931_v58 = vmov 0.0|0.0  }
 0x269   :  { %v4536_v40 = vpop.f32.mrb[22].mxu1  ;;  %6327 = vrcp.f32 %v1017_v5 }
 0x26a   :  { %v7139_v24 = vadd.f32 %v4536_v40, %v613_v35  ;;  %v826_v29 = vpop.f32.mrb[23].mxu1  ;;  %v6326_v40 = vpop.eup %6325 }
 0x26b   :  { %v7141_v44 = vadd.f32 %v826_v29, %v613_v35 }
 0x273   :  { %v6328_v29 = vpop.eup %6327 }
 0x274   :  { %v1030_v32 = vsub.f32 1.0, %v6328_v29  ;;  %v1032_v0 = vmul.f32 0.0, %v6328_v29 }
 0x27d   :  { %v1002_v12 = vpop.f32.mrb[24].mxu1 }
 0x27e   :  { %v1026_v17 = vadd.f32 %v7146_v2, %v1002_v12  ;;  %v4571_v39 = vpop.f32.mrb[25].mxu1 }
 0x280   :  { %v1027_v50 = vmul.f32 %v6326_v40, %v1026_v17 }
 0x282   :  { %v1028_v35 = vadd.f32 %v1027_v50, %v797_v63  ;;  %v7932_v63 = vmov 0.0  }
 0x284   :  { %6329 = vtanh.f32 %v1028_v35 }
 0x28e   :  { %v6330_v47 = vpop.eup %6329 }
 0x28f   :  { %v1031_v46 = vmul.f32 %v6330_v47, %v1030_v32 }
 0x291   :  { %v7149_v7 = vadd.f32 %v1032_v0, %v1031_v46 }
 0x293   :  { %1106 = vmatmul.mubr.f32.vlgmr.msra.gmra.mrb[10].mxu0 %v7149_v7  ;;  %4605 = vmatmul.mubr.f32.vlgmr.msra.gmra.mrb[26].mxu1 %v7149_v7 }
 0x294   :  { %5364 = vmatpush1.bf16.msra.mxu0 %v6925_v37  ;;  %5395 = vmatpush3.bf16.msra.mxu1 %v7039_v6 }
 0x295   :  { %5366 = vmatprep.subr.bf16.mxu0 %v6928_v42  ;;  %5396 = vmatprep.subr.bf16.mxu1 %v7931_v58 }
 0x296   :  { %1276 = vmatprep.mubr.f32.mxu0 %v7932_v63  ;;  %4639 = vmatprep.mubr.msk.f32.mxu1 %vm6706_vm1, %v7932_v63 }
 0x298   :  { %5368 = vmatpush1.bf16.msra.mxu0 %v6933_v49  ;;  %5398 = vmatpush3.bf16.msra.mxu1 %v7045_v11 }
 0x299   :  { %5370 = vmatprep.subr.bf16.mxu0 %v6936_v54  ;;  %5399 = vmatprep.subr.bf16.mxu1 %v7931_v58 }
 0x29c   :  { %5372 = vmatpush1.bf16.msra.mxu0 %v6940_v61  ;;  %5401 = vmatpush3.bf16.msra.mxu1 %v7049_v62 }
 0x29d   :  { %5374 = vmatprep.subr.bf16.mxu0 %v6943_v3  ;;  %5402 = vmatprep.subr.bf16.mxu1 %v7931_v58 }
 0x2a0   :  { %5376 = vmatpush1.bf16.msra.mxu0 %v6946_v10  ;;  %5404 = vmatpush3.bf16.msra.mxu1 %v7053_v16 }
 0x2a1   :  { %5378 = vmatprep.subr.bf16.mxu0 %v6949_v15  ;;  %5405 = vmatprep.subr.bf16.mxu1 %v7931_v58 }
 0x2a4   :  { %5380 = vmatpush1.bf16.msra.mxu0 %v6952_v22  ;;  %5407 = vmatpush3.bf16.msra.mxu1 %v7057_v19 }
 0x2a5   :  { %5382 = vmatprep.subr.bf16.mxu0 %v6955_v26  ;;  %5408 = vmatprep.subr.bf16.mxu1 %v7931_v58 }
 0x2a8   :  { %5384 = vmatpush1.bf16.msra.mxu0 %v6958_v33  ;;  %5410 = vmatpush3.bf16.msra.mxu1 %v7063_v23 }
 0x2a9   :  { %5386 = vmatprep.subr.bf16.mxu0 %v6961_v34  ;;  %5411 = vmatprep.subr.bf16.mxu1 %v7931_v58 }
 0x2ac   :  { %5388 = vmatpush1.bf16.msra.mxu0 %v6964_v38  ;;  %5413 = vmatpush3.bf16.msra.mxu1 %v7067_v27 }
 0x2ad   :  { %5390 = vmatprep.subr.bf16.mxu0 %v6968_v41  ;;  %5414 = vmatprep.subr.bf16.mxu1 %v7931_v58 }
 0x2b0   :  { %5392 = vmatpush1.bf16.msra.mxu0 %v6971_v48  ;;  %5416 = vmatpush3.bf16.msra.mxu1 %v7071_v31 }
 0x2b1   :  { %5418 = vmatprep.subr.bf16.mxu0 %v6920_v28  ;;  %5449 = vmatprep.subr.bf16.mxu1 %v7931_v58 }
 0x366   :  { %v1107_v0 = vpop.f32.mrb[10].mxu0  ;;  %v1178_v5 = vpop.f32.mrb[26].mxu1 }
 0x367   :  { %v1182_v12 = vadd.f32 %v1107_v0, %v7100_v57  ;;  %v1109_v17 = vpop.f32.mrb[11].mxu0  ;;  %v4606_v39 = vpop.f32.mrb[27].mxu1  ;;  %v1196_v59 = vadd.f32 %v7146_v2, %v1178_v5 }
 0x368   :  { %v1189_v40 = vadd.f32 %v1109_v17, %v7102_v60 }
 0x369   :  { %v4117_v50 = vmul.f32 -1.442695, %v1182_v12 }
 0x36a   :  { %v4118_v35 = vmul.f32 -1.442695, %v1189_v40 }
 0x36b   :  { %6331 = vpow2.f32 %v4117_v50 }
 0x36c   :  { %6333 = vpow2.f32 %v4118_v35 }
 0x375   :  { %v6332_v29 = vpop.eup %6331 }
 0x376   :  { %v1186_v32 = vadd.f32 1.0, %v6332_v29  ;;  %v6334_v47 = vpop.eup %6333 }
 0x377   :  { %v1193_v46 = vadd.f32 1.0, %v6334_v47 }
 0x378   :  { %6335 = vrcp.f32 %v1186_v32 }
 0x379   :  { %6337 = vrcp.f32 %v1193_v46 }
 0x382   :  { %v6336_v56 = vpop.eup %6335 }
 0x383   :  { %v1197_v52 = vmul.f32 %v6336_v56, %v1196_v59  ;;  %v6338_v0 = vpop.eup %6337 }
 0x384   :  { %v1200_v39 = vsub.f32 1.0, %v6338_v0  ;;  %v1202_v17 = vmul.f32 %v6338_v0, %v7149_v7 }
 0x385   :  { %v1198_v57 = vadd.f32 %v1197_v52, %v7129_v55 }
 0x387   :  { %6339 = vtanh.f32 %v1198_v57 }
 0x391   :  { %v6340_v60 = vpop.eup %6339 }
 0x392   :  { %v1201_v12 = vmul.f32 %v6340_v60, %v1200_v39 }
 0x394   :  { %v7193_v40 = vadd.f32 %v1202_v17, %v1201_v12 }
 0x396   :  { %1277 = vmatmul.mubr.f32.vlgmr.msra.gmra.mrb[12].mxu0 %v7193_v40  ;;  %4640 = vmatmul.mubr.f32.vlgmr.msra.gmra.mrb[28].mxu1 %v7193_v40 }
 0x397   :  { %5420 = vmatpush1.bf16.msra.mxu0 %v6925_v37  ;;  %5451 = vmatpush3.bf16.msra.mxu1 %v7039_v6 }
 0x398   :  { %5422 = vmatprep.subr.bf16.mxu0 %v6928_v42  ;;  %5452 = vmatprep.subr.bf16.mxu1 %v7931_v58 }
 0x399   :  { %1447 = vmatprep.mubr.f32.mxu0 %v7932_v63  ;;  %4674 = vmatprep.mubr.msk.f32.mxu1 %vm6706_vm1, %v7932_v63 }
 0x39b   :  { %5424 = vmatpush1.bf16.msra.mxu0 %v6933_v49  ;;  %5454 = vmatpush3.bf16.msra.mxu1 %v7045_v11 }
 0x39c   :  { %5426 = vmatprep.subr.bf16.mxu0 %v6936_v54  ;;  %5455 = vmatprep.subr.bf16.mxu1 %v7931_v58 }
 0x39f   :  { %5428 = vmatpush1.bf16.msra.mxu0 %v6940_v61  ;;  %5457 = vmatpush3.bf16.msra.mxu1 %v7049_v62 }
 0x3a0   :  { %5430 = vmatprep.subr.bf16.mxu0 %v6943_v3  ;;  %5458 = vmatprep.subr.bf16.mxu1 %v7931_v58 }
 0x3a3   :  { %5432 = vmatpush1.bf16.msra.mxu0 %v6946_v10  ;;  %5460 = vmatpush3.bf16.msra.mxu1 %v7053_v16 }
 0x3a4   :  { %5434 = vmatprep.subr.bf16.mxu0 %v6949_v15  ;;  %5461 = vmatprep.subr.bf16.mxu1 %v7931_v58 }
 0x3a7   :  { %5436 = vmatpush1.bf16.msra.mxu0 %v6952_v22  ;;  %5463 = vmatpush3.bf16.msra.mxu1 %v7057_v19 }
 0x3a8   :  { %5438 = vmatprep.subr.bf16.mxu0 %v6955_v26  ;;  %5464 = vmatprep.subr.bf16.mxu1 %v7931_v58 }
 0x3ab   :  { %5440 = vmatpush1.bf16.msra.mxu0 %v6958_v33  ;;  %5466 = vmatpush3.bf16.msra.mxu1 %v7063_v23 }
 0x3ac   :  { %5442 = vmatprep.subr.bf16.mxu0 %v6961_v34  ;;  %5467 = vmatprep.subr.bf16.mxu1 %v7931_v58 }
 0x3af   :  { %5444 = vmatpush1.bf16.msra.mxu0 %v6964_v38  ;;  %5469 = vmatpush3.bf16.msra.mxu1 %v7067_v27 }
 0x3b0   :  { %5446 = vmatprep.subr.bf16.mxu0 %v6968_v41  ;;  %5470 = vmatprep.subr.bf16.mxu1 %v7931_v58 }
 0x3b3   :  { %5448 = vmatpush1.bf16.msra.mxu0 %v6971_v48  ;;  %5472 = vmatpush3.bf16.msra.mxu1 %v7071_v31 }
 0x3b4   :  { %5474 = vmatprep.subr.bf16.mxu0 %v6920_v28  ;;  %5505 = vmatprep.subr.bf16.mxu1 %v7931_v58 }
 0x469   :  { %v1278_v52 = vpop.f32.mrb[12].mxu0  ;;  %v1349_v56 = vpop.f32.mrb[28].mxu1 }
 0x46a   :  { %v1353_v59 = vadd.f32 %v1278_v52, %v7104_v1  ;;  %v1280_v55 = vpop.f32.mrb[13].mxu0  ;;  %v4641_v5 = vpop.f32.mrb[29].mxu1  ;;  %v1367_v0 = vadd.f32 %v7146_v2, %v1349_v56 }
 0x46b   :  { %v1360_v50 = vadd.f32 %v1280_v55, %v7106_v4 }
 0x46c   :  { %v4119_v35 = vmul.f32 -1.442695, %v1353_v59 }
 0x46d   :  { %v4120_v29 = vmul.f32 -1.442695, %v1360_v50 }
 0x46e   :  { %6341 = vpow2.f32 %v4119_v35 }
 0x46f   :  { %6343 = vpow2.f32 %v4120_v29 }
 0x478   :  { %v6342_v32 = vpop.eup %6341 }
 0x479   :  { %v1357_v47 = vadd.f32 1.0, %v6342_v32  ;;  %v6344_v46 = vpop.eup %6343 }
 0x47a   :  { %v1364_v57 = vadd.f32 1.0, %v6344_v46 }
 0x47b   :  { %6345 = vrcp.f32 %v1357_v47 }
 0x47c   :  { %6347 = vrcp.f32 %v1364_v57 }
 0x485   :  { %v6346_v39 = vpop.eup %6345 }
 0x486   :  { %v1368_v60 = vmul.f32 %v6346_v39, %v1367_v0  ;;  %v6348_v12 = vpop.eup %6347 }
 0x487   :  { %v1371_v17 = vsub.f32 1.0, %v6348_v12  ;;  %v1373_v59 = vmul.f32 %v6348_v12, %v7193_v40 }
 0x488   :  { %v1369_v1 = vadd.f32 %v1368_v60, %v7133_v14 }
 0x48a   :  { %6349 = vtanh.f32 %v1369_v1 }
 0x494   :  { %v6350_v4 = vpop.eup %6349 }
 0x495   :  { %v1372_v52 = vmul.f32 %v6350_v4, %v1371_v17 }
 0x497   :  { %v7237_v55 = vadd.f32 %v1373_v59, %v1372_v52 }
 0x499   :  { %1448 = vmatmul.mubr.f32.vlgmr.msra.gmra.mrb[14].mxu0 %v7237_v55  ;;  %4675 = vmatmul.mubr.f32.vlgmr.msra.gmra.mrb[30].mxu1 %v7237_v55 }
 0x49a   :  { %5476 = vmatpush1.bf16.msra.mxu0 %v6925_v37  ;;  %5507 = vmatpush3.bf16.msra.mxu1 %v7039_v6 }
 0x49b   :  { %5478 = vmatprep.subr.bf16.mxu0 %v6928_v42  ;;  %5508 = vmatprep.subr.bf16.mxu1 %v7931_v58 }
 0x49c   :  { %1618 = vmatprep.mubr.f32.mxu0 %v7932_v63  ;;  %4709 = vmatprep.mubr.msk.f32.mxu1 %vm6706_vm1, %v7932_v63 }
 0x49e   :  { %5480 = vmatpush1.bf16.msra.mxu0 %v6933_v49  ;;  %5510 = vmatpush3.bf16.msra.mxu1 %v7045_v11 }
 0x49f   :  { %5482 = vmatprep.subr.bf16.mxu0 %v6936_v54  ;;  %5511 = vmatprep.subr.bf16.mxu1 %v7931_v58 }
 0x4a2   :  { %5484 = vmatpush1.bf16.msra.mxu0 %v6940_v61  ;;  %5513 = vmatpush3.bf16.msra.mxu1 %v7049_v62 }
 0x4a3   :  { %5486 = vmatprep.subr.bf16.mxu0 %v6943_v3  ;;  %5514 = vmatprep.subr.bf16.mxu1 %v7931_v58 }
 0x4a6   :  { %5488 = vmatpush1.bf16.msra.mxu0 %v6946_v10  ;;  %5516 = vmatpush3.bf16.msra.mxu1 %v7053_v16 }
 0x4a7   :  { %5490 = vmatprep.subr.bf16.mxu0 %v6949_v15  ;;  %5517 = vmatprep.subr.bf16.mxu1 %v7931_v58 }
 0x4aa   :  { %5492 = vmatpush1.bf16.msra.mxu0 %v6952_v22  ;;  %5519 = vmatpush3.bf16.msra.mxu1 %v7057_v19 }
 0x4ab   :  { %5494 = vmatprep.subr.bf16.mxu0 %v6955_v26  ;;  %5520 = vmatprep.subr.bf16.mxu1 %v7931_v58 }
 0x4ae   :  { %5496 = vmatpush1.bf16.msra.mxu0 %v6958_v33  ;;  %5522 = vmatpush3.bf16.msra.mxu1 %v7063_v23 }
 0x4af   :  { %5498 = vmatprep.subr.bf16.mxu0 %v6961_v34  ;;  %5523 = vmatprep.subr.bf16.mxu1 %v7931_v58 }
 0x4b2   :  { %5500 = vmatpush1.bf16.msra.mxu0 %v6964_v38  ;;  %5525 = vmatpush3.bf16.msra.mxu1 %v7067_v27 }
 0x4b3   :  { %5502 = vmatprep.subr.bf16.mxu0 %v6968_v41  ;;  %5526 = vmatprep.subr.bf16.mxu1 %v7931_v58 }
 0x4b6   :  { %5504 = vmatpush1.bf16.msra.mxu0 %v6971_v48  ;;  %5528 = vmatpush3.bf16.msra.mxu1 %v7071_v31 }
 0x4b7   :  { %5530 = vmatprep.subr.bf16.mxu0 %v6920_v28  ;;  %5561 = vmatprep.subr.bf16.mxu1 %v7931_v58 }
 0x56c   :  { %v1449_v14 = vpop.f32.mrb[14].mxu0  ;;  %v1520_v56 = vpop.f32.mrb[30].mxu1 }
 0x56d   :  { %v1524_v5 = vadd.f32 %v1449_v14, %v7108_v51  ;;  %v1451_v50 = vpop.f32.mrb[15].mxu0  ;;  %v4676_v35 = vpop.f32.mrb[31].mxu1  ;;  %v1538_v60 = vadd.f32 %v7146_v2, %v1520_v56 }
 0x56e   :  { %v1531_v29 = vadd.f32 %v1451_v50, %v7110_v9 }
 0x56f   :  { %v4121_v32 = vmul.f32 -1.442695, %v1524_v5 }
 0x570   :  { %v4122_v47 = vmul.f32 -1.442695, %v1531_v29 }
 0x571   :  { %6351 = vpow2.f32 %v4121_v32 }
 0x572   :  { %6353 = vpow2.f32 %v4122_v47 }
 0x57b   :  { %v6352_v46 = vpop.eup %6351 }
 0x57c   :  { %v1528_v57 = vadd.f32 1.0, %v6352_v46  ;;  %v6354_v0 = vpop.eup %6353 }
 0x57d   :  { %v1535_v39 = vadd.f32 1.0, %v6354_v0 }
 0x57e   :  { %6355 = vrcp.f32 %v1528_v57 }
 0x57f   :  { %6357 = vrcp.f32 %v1535_v39 }
 0x588   :  { %v6356_v1 = vpop.eup %6355 }
 0x589   :  { %v1539_v12 = vmul.f32 %v6356_v1, %v1538_v60  ;;  %v6358_v17 = vpop.eup %6357 }
 0x58a   :  { %v1542_v4 = vsub.f32 1.0, %v6358_v17  ;;  %v1544_v59 = vmul.f32 %v6358_v17, %v7237_v55 }
 0x58b   :  { %v1540_v51 = vadd.f32 %v1539_v12, %v7131_v53 }
 0x58d   :  { %6359 = vtanh.f32 %v1540_v51 }
 0x597   :  { %v6360_v9 = vpop.eup %6359 }
 0x598   :  { %v1543_v52 = vmul.f32 %v6360_v9, %v1542_v4 }
 0x59a   :  { %v7281_v14 = vadd.f32 %v1544_v59, %v1543_v52 }
 0x59c   :  { %1619 = vmatmul.mubr.f32.vlgmr.msra.gmra.mrb[16].mxu0 %v7281_v14  ;;  %4710 = vmatmul.mubr.f32.vlgmr.msra.gmra.mrb[32].mxu1 %v7281_v14 }
 0x59d   :  { %5532 = vmatpush1.bf16.msra.mxu0 %v6925_v37  ;;  %5563 = vmatpush3.bf16.msra.mxu1 %v7039_v6 }
 0x59e   :  { %5534 = vmatprep.subr.bf16.mxu0 %v6928_v42  ;;  %5564 = vmatprep.subr.bf16.mxu1 %v7931_v58 }
 0x59f   :  { %1789 = vmatprep.mubr.f32.mxu0 %v7932_v63  ;;  %4744 = vmatprep.mubr.msk.f32.mxu1 %vm6706_vm1, %v7932_v63 }
 0x5a1   :  { %5536 = vmatpush1.bf16.msra.mxu0 %v6933_v49  ;;  %5566 = vmatpush3.bf16.msra.mxu1 %v7045_v11 }
 0x5a2   :  { %5538 = vmatprep.subr.bf16.mxu0 %v6936_v54  ;;  %5567 = vmatprep.subr.bf16.mxu1 %v7931_v58 }
 0x5a5   :  { %5540 = vmatpush1.bf16.msra.mxu0 %v6940_v61  ;;  %5569 = vmatpush3.bf16.msra.mxu1 %v7049_v62 }
 0x5a6   :  { %5542 = vmatprep.subr.bf16.mxu0 %v6943_v3  ;;  %5570 = vmatprep.subr.bf16.mxu1 %v7931_v58 }
 0x5a9   :  { %5544 = vmatpush1.bf16.msra.mxu0 %v6946_v10  ;;  %5572 = vmatpush3.bf16.msra.mxu1 %v7053_v16 }
 0x5aa   :  { %5546 = vmatprep.subr.bf16.mxu0 %v6949_v15  ;;  %5573 = vmatprep.subr.bf16.mxu1 %v7931_v58 }
 0x5ad   :  { %5548 = vmatpush1.bf16.msra.mxu0 %v6952_v22  ;;  %5575 = vmatpush3.bf16.msra.mxu1 %v7057_v19 }
 0x5ae   :  { %5550 = vmatprep.subr.bf16.mxu0 %v6955_v26  ;;  %5576 = vmatprep.subr.bf16.mxu1 %v7931_v58 }
 0x5b1   :  { %5552 = vmatpush1.bf16.msra.mxu0 %v6958_v33  ;;  %5578 = vmatpush3.bf16.msra.mxu1 %v7063_v23 }
 0x5b2   :  { %5554 = vmatprep.subr.bf16.mxu0 %v6961_v34  ;;  %5579 = vmatprep.subr.bf16.mxu1 %v7931_v58 }
 0x5b5   :  { %5556 = vmatpush1.bf16.msra.mxu0 %v6964_v38  ;;  %5581 = vmatpush3.bf16.msra.mxu1 %v7067_v27 }
 0x5b6   :  { %5558 = vmatprep.subr.bf16.mxu0 %v6968_v41  ;;  %5582 = vmatprep.subr.bf16.mxu1 %v7931_v58 }
 0x5b9   :  { %5560 = vmatpush1.bf16.msra.mxu0 %v6971_v48  ;;  %5584 = vmatpush3.bf16.msra.mxu1 %v7071_v31 }
 0x5ba   :  { %5586 = vmatprep.subr.bf16.mxu0 %v6920_v28  ;;  %5617 = vmatprep.subr.bf16.mxu1 %v7931_v58 }
 0x66f   :  { %v1620_v53 = vpop.f32.mrb[16].mxu0  ;;  %v1691_v56 = vpop.f32.mrb[32].mxu1 }
 0x670   :  { %v1695_v5 = vadd.f32 %v1620_v53, %v7112_v13  ;;  %v1622_v50 = vpop.f32.mrb[17].mxu0  ;;  %v4711_v35 = vpop.f32.mrb[33].mxu1  ;;  %v1709_v60 = vadd.f32 %v7146_v2, %v1691_v56 }
 0x671   :  { %v1702_v29 = vadd.f32 %v1622_v50, %v7114_v8 }
 0x672   :  { %v4123_v32 = vmul.f32 -1.442695, %v1695_v5 }
 0x673   :  { %v4124_v47 = vmul.f32 -1.442695, %v1702_v29 }
 0x674   :  { %6361 = vpow2.f32 %v4123_v32 }
 0x675   :  { %6363 = vpow2.f32 %v4124_v47 }
 0x67e   :  { %v6362_v46 = vpop.eup %6361 }
 0x67f   :  { %v1699_v57 = vadd.f32 1.0, %v6362_v46  ;;  %v6364_v0 = vpop.eup %6363 }
 0x680   :  { %v1706_v39 = vadd.f32 1.0, %v6364_v0 }
 0x681   :  { %6365 = vrcp.f32 %v1699_v57 }
 0x682   :  { %6367 = vrcp.f32 %v1706_v39 }
 0x68b   :  { %v6366_v1 = vpop.eup %6365 }
 0x68c   :  { %v1710_v12 = vmul.f32 %v6366_v1, %v1709_v60  ;;  %v6368_v51 = vpop.eup %6367 }
 0x68d   :  { %v1713_v17 = vsub.f32 1.0, %v6368_v51  ;;  %v1715_v9 = vmul.f32 %v6368_v51, %v7281_v14 }
 0x68e   :  { %v1711_v13 = vadd.f32 %v1710_v12, %v7137_v20 }
 0x690   :  { %6369 = vtanh.f32 %v1711_v13 }
 0x69a   :  { %v6370_v8 = vpop.eup %6369 }
 0x69b   :  { %v1714_v4 = vmul.f32 %v6370_v8, %v1713_v17  ;;  %v2239_v8 = vld [vmem:[#allocation13 + $0x38] sm:$0xff] }
 0x69d   :  { %v7325_v52 = vadd.f32 %v1715_v9, %v1714_v4  ;;  %v2242_v4 = vld [vmem:[#allocation13 + $0x50] sm:$0xff] }
 0x69f   :  { %1790 = vmatmul.mubr.f32.vlgmr.msra.gmra.mrb[18].mxu0 %v7325_v52  ;;  %4745 = vmatmul.mubr.f32.vlgmr.msra.gmra.mrb[34].mxu1 %v7325_v52 }
 0x6a0   :  { %5588 = vmatpush1.bf16.msra.mxu0 %v6925_v37  ;;  %5619 = vmatpush3.bf16.msra.mxu1 %v7039_v6 }
 0x6a1   :  { %5590 = vmatprep.subr.bf16.mxu0 %v6928_v42  ;;  %5620 = vmatprep.subr.bf16.mxu1 %v7931_v58 }
 0x6a2   :  { %1960 = vmatprep.mubr.f32.mxu0 %v7932_v63  ;;  %4779 = vmatprep.mubr.msk.f32.mxu1 %vm6706_vm1, %v7932_v63 }
 0x6a4   :  { %5592 = vmatpush1.bf16.msra.mxu0 %v6933_v49  ;;  %5622 = vmatpush3.bf16.msra.mxu1 %v7045_v11 }
 0x6a5   :  { %5594 = vmatprep.subr.bf16.mxu0 %v6936_v54  ;;  %5623 = vmatprep.subr.bf16.mxu1 %v7931_v58 }
 0x6a8   :  { %5596 = vmatpush1.bf16.msra.mxu0 %v6940_v61  ;;  %5625 = vmatpush3.bf16.msra.mxu1 %v7049_v62 }
 0x6a9   :  { %5598 = vmatprep.subr.bf16.mxu0 %v6943_v3  ;;  %5626 = vmatprep.subr.bf16.mxu1 %v7931_v58 }
 0x6ac   :  { %5600 = vmatpush1.bf16.msra.mxu0 %v6946_v10  ;;  %5628 = vmatpush3.bf16.msra.mxu1 %v7053_v16 }
 0x6ad   :  { %5602 = vmatprep.subr.bf16.mxu0 %v6949_v15  ;;  %5629 = vmatprep.subr.bf16.mxu1 %v7931_v58 }
 0x6b0   :  { %5604 = vmatpush1.bf16.msra.mxu0 %v6952_v22  ;;  %5631 = vmatpush3.bf16.msra.mxu1 %v7057_v19 }
 0x6b1   :  { %5606 = vmatprep.subr.bf16.mxu0 %v6955_v26  ;;  %5632 = vmatprep.subr.bf16.mxu1 %v7931_v58 }
 0x6b4   :  { %5608 = vmatpush1.bf16.msra.mxu0 %v6958_v33  ;;  %5634 = vmatpush3.bf16.msra.mxu1 %v7063_v23 }
 0x6b5   :  { %5610 = vmatprep.subr.bf16.mxu0 %v6961_v34  ;;  %5635 = vmatprep.subr.bf16.mxu1 %v7931_v58 }
 0x6b8   :  { %5612 = vmatpush1.bf16.msra.mxu0 %v6964_v38  ;;  %5637 = vmatpush3.bf16.msra.mxu1 %v7067_v27 }
 0x6b9   :  { %5614 = vmatprep.subr.bf16.mxu0 %v6968_v41  ;;  %5638 = vmatprep.subr.bf16.mxu1 %v7931_v58 }
 0x6bc   :  { %5616 = vmatpush1.bf16.msra.mxu0 %v6971_v48  ;;  %5640 = vmatpush3.bf16.msra.mxu1 %v7071_v31 }
 0x6bd   :  { %5642 = vmatprep.subr.bf16.mxu0 %v6920_v28  ;;  %5673 = vmatprep.subr.bf16.mxu1 %v7931_v58 }
 0x772   :  { %v1791_v20 = vpop.f32.mrb[18].mxu0  ;;  %v1862_v59 = vpop.f32.mrb[34].mxu1 }
 0x773   :  { %v1866_v53 = vadd.f32 %v1791_v20, %v7116_v18  ;;  %v1793_v56 = vpop.f32.mrb[19].mxu0  ;;  %v4746_v5 = vpop.f32.mrb[35].mxu1  ;;  %v1880_v28 = vadd.f32 %v7146_v2, %v1862_v59  ;;  %v2240_v59 = vld [vmem:[#allocation13 + $0x40] sm:$0xff] }
 0x774   :  { %v1873_v50 = vadd.f32 %v1793_v56, %v7118_v21  ;;  %v5701_v5 = vpack.c.bf16 %v2242_v4, %v2239_v8 }
 0x775   :  { %v4125_v35 = vmul.f32 -1.442695, %v1866_v53  ;;  %v2243_v53 = vld [vmem:[#allocation13 + $0x58] sm:$0xff] }
 0x776   :  { %v4126_v29 = vmul.f32 -1.442695, %v1873_v50  ;;  %v2238_v50 = vld [vmem:[#allocation13 + $0x30] sm:$0xff] }
 0x777   :  { %6371 = vpow2.f32 %v4125_v35  ;;  %v2241_v35 = vld [vmem:[#allocation13 + $0x48] sm:$0xff] }
 0x778   :  { %6373 = vpow2.f32 %v4126_v29  ;;  %v5733_v29 = vpack.c.bf16 %v2243_v53, %v2240_v59  ;;  %v2275_v59 = vld [vmem:[#allocation13 + $0x158] sm:$0xff]  ;;  %v2278_v53 = vld [vmem:[#allocation13 + $0x170] sm:$0xff] }
 0x781   :  { %v6372_v32 = vpop.eup %6371 }
 0x782   :  { %v1870_v47 = vadd.f32 1.0, %v6372_v32  ;;  %v6374_v46 = vpop.eup %6373  ;;  %v2248_v32 = vld [vmem:[#allocation13 + $0x80] sm:$0xff] }
 0x783   :  { %v1877_v57 = vadd.f32 1.0, %v6374_v46  ;;  %v2249_v46 = vld [vmem:[#allocation13 + $0x88] sm:$0xff] }
 0x784   :  { %6375 = vrcp.f32 %v1870_v47  ;;  %v2246_v47 = vld [vmem:[#allocation13 + $0x70] sm:$0xff] }
 0x785   :  { %6377 = vrcp.f32 %v1877_v57  ;;  %v5703_v57 = vpack.c.bf16 %v2241_v35, %v2238_v50  ;;  %v5725_v35 = vpack.c.bf16 %v2278_v53, %v2275_v59  ;;  %v2322_v59 = vld [vmem:[#allocation15 + $0x150] sm:$0xff]  ;;  %v2325_v53 = vld [vmem:[#allocation15 + $0x168] sm:$0xff] }
 0x78e   :  { %v6376_v0 = vpop.eup %6375 }
 0x78f   :  { %v1881_v39 = vmul.f32 %v6376_v0, %v1880_v28  ;;  %v6378_v60 = vpop.eup %6377  ;;  %v5737_v0 = vpack.c.bf16 %v2249_v46, %v2246_v47  ;;  %v2280_v46 = vld [vmem:[#allocation15] sm:$0xff] }
 0x790   :  { %v1884_v1 = vsub.f32 1.0, %v6378_v60  ;;  %v1886_v13 = vmul.f32 %v6378_v60, %v7325_v52  ;;  %v2251_v60 = vld [vmem:[#allocation13 + $0x98] sm:$0xff] }
 0x791   :  { %v1882_v18 = vadd.f32 %v1881_v39, %v7135_v36  ;;  %v2235_v36 = vld [vmem:[#allocation13 + $0x18] sm:$0xff]  ;;  %v2244_v39 = vld [vmem:[#allocation13 + $0x60] sm:$0xff] }
 0x793   :  { %6379 = vtanh.f32 %v1882_v18  ;;  %v2247_v18 = vld [vmem:[#allocation13 + $0x78] sm:$0xff] }
 0x79d   :  { %v6380_v21 = vpop.eup %6379 }
 0x79e   :  { %v1885_v12 = vmul.f32 %v6380_v21, %v1884_v1  ;;  %v2254_v1 = vld [vmem:[#allocation13 + $0xb0] sm:$0xff]  ;;  %v2252_v21 = vld [vmem:[#allocation13 + $0xa0] sm:$0xff] }
 0x7a0   :  { %v7369_v51 = vadd.f32 %v1886_v13, %v1885_v12  ;;  %v2255_v12 = vld [vmem:[#allocation13 + $0xb8] sm:$0xff]  ;;  %v5707_v13 = vpack.c.bf16 %v2247_v18, %v2244_v39  ;;  %v2289_v39 = vld [vmem:[#allocation15 + $0x48] sm:$0xff] }
 0x7a2   :  { %1961 = vmatmul.mubr.f32.vlgmr.msra.gmra.mrb[20].mxu0 %v7369_v51  ;;  %4780 = vmatmul.mubr.f32.vlgmr.msra.gmra.mrb[36].mxu1 %v7369_v51 }
 0x7a3   :  { %5644 = vmatpush1.bf16.msra.mxu0 %v6925_v37  ;;  %5675 = vmatpush3.bf16.msra.mxu1 %v7039_v6  ;;  %v2233_v37 = vld [vmem:[#allocation13 + $0x8] sm:$0xff] }
 0x7a4   :  { %5646 = vmatprep.subr.bf16.mxu0 %v6928_v42  ;;  %5676 = vmatprep.subr.bf16.mxu1 %v7931_v58  ;;  %v2236_v42 = vld [vmem:[#allocation13 + $0x20] sm:$0xff] }
 0x7a5   :  { %2131 = vmatprep.mubr.f32.mxu0 %v7932_v63  ;;  %4814 = vmatprep.mubr.msk.f32.mxu1 %vm6706_vm1, %v7932_v63 }
 0x7a7   :  { %5648 = vmatpush1.bf16.msra.mxu0 %v6933_v49  ;;  %5678 = vmatpush3.bf16.msra.mxu1 %v7045_v11  ;;  %v2234_v49 = vld [vmem:[#allocation13 + $0x10] sm:$0xff] }
 0x7a8   :  { %5650 = vmatprep.subr.bf16.mxu0 %v6936_v54  ;;  %5679 = vmatprep.subr.bf16.mxu1 %v7931_v58  ;;  %v5697_v54 = vpack.c.bf16 %v2236_v42, %v2233_v37  ;;  %v5709_v37 = vpack.c.bf16 %v2254_v1, %v2251_v60  ;;  %v5741_v42 = vpack.c.bf16 %v2255_v12, %v2252_v21  ;;  %v2293_v60 = vld [vmem:[#allocation15 + $0x68] sm:$0xff]  ;;  %v2296_v1 = vld [vmem:[#allocation15 + $0x80] sm:$0xff] }
 0x7a9   :  { %v7450_v21 = vpack.c.bf16 %v2296_v1, %v2293_v60  ;;  %v2292_v12 = vld [vmem:[#allocation15 + $0x60] sm:$0xff]  ;;  %v2318_v60 = vld [vmem:[#allocation15 + $0x130] sm:$0xff]  ;;  %v2321_v1 = vld [vmem:[#allocation15 + $0x148] sm:$0xff] }
 0x7ab   :  { %5652 = vmatpush1.bf16.msra.mxu0 %v6940_v61  ;;  %5681 = vmatpush3.bf16.msra.mxu1 %v7049_v62  ;;  %v2237_v61 = vld [vmem:[#allocation13 + $0x28] sm:$0xff] }
 0x7ac   :  { %5654 = vmatprep.subr.bf16.mxu0 %v6943_v3  ;;  %5682 = vmatprep.subr.bf16.mxu1 %v7931_v58  ;;  %v5729_v3 = vpack.c.bf16 %v2237_v61, %v2234_v49  ;;  %v2250_v49 = vld [vmem:[#allocation13 + $0x90] sm:$0xff]  ;;  %v2257_v61 = vld [vmem:[#allocation13 + $0xc8] sm:$0xff] }
 0x7af   :  { %5656 = vmatpush1.bf16.msra.mxu0 %v6946_v10  ;;  %5684 = vmatpush3.bf16.msra.mxu1 %v7053_v16 }
 0x7b0   :  { %5658 = vmatprep.subr.bf16.mxu0 %v6949_v15  ;;  %5685 = vmatprep.subr.bf16.mxu1 %v7931_v58 }
 0x7b3   :  { %5660 = vmatpush1.bf16.msra.mxu0 %v6952_v22  ;;  %5687 = vmatpush3.bf16.msra.mxu1 %v7057_v19 }
 0x7b4   :  { %5662 = vmatprep.subr.bf16.mxu0 %v6955_v26  ;;  %5688 = vmatprep.subr.bf16.mxu1 %v7931_v58 }
 0x7b7   :  { %5664 = vmatpush1.bf16.msra.mxu0 %v6958_v33  ;;  %5690 = vmatpush3.bf16.msra.mxu1 %v7063_v23 }
 0x7b8   :  { %5666 = vmatprep.subr.bf16.mxu0 %v6961_v34  ;;  %5691 = vmatprep.subr.bf16.mxu1 %v7931_v58 }
 0x7bb   :  { %5668 = vmatpush1.bf16.msra.mxu0 %v6964_v38  ;;  %5693 = vmatpush3.bf16.msra.mxu1 %v7067_v27 }
 0x7bc   :  { %5670 = vmatprep.subr.bf16.mxu0 %v6968_v41  ;;  %5694 = vmatprep.subr.bf16.mxu1 %v7931_v58 }
 0x7bf   :  { %5672 = vmatpush1.bf16.msra.mxu0 %v6971_v48  ;;  %5696 = vmatpush3.bf16.msra.mxu1 %v7071_v31 }
 0x7c0   :  { %5698 = vmatprep.subr.bf16.mxu0 %v5697_v54  ;;  %5730 = vmatprep.subr.bf16.mxu1 %v5729_v3  ;;  %v2253_v54 = vld [vmem:[#allocation13 + $0xa8] sm:$0xff] }
 0x875   :  { %v1962_v10 = vpop.f32.mrb[20].mxu0  ;;  %v2033_v15 = vpop.f32.mrb[36].mxu1 }
 0x876   :  { %v2037_v22 = vadd.f32 %v1962_v10, %v7120_v25  ;;  %v1964_v26 = vpop.f32.mrb[21].mxu0  ;;  %v4781_v33 = vpop.f32.mrb[37].mxu1  ;;  %v2051_v16 = vadd.f32 %v7146_v2, %v2033_v15  ;;  %v2258_v10 = vld [vmem:[#allocation13 + $0xd0] sm:$0xff]  ;;  %v2261_v15 = vld [vmem:[#allocation13 + $0xe8] sm:$0xff] }
 0x877   :  { %v2044_v34 = vadd.f32 %v1964_v26, %v7122_v30  ;;  %v2232_v30 = vld [vmem:[#allocation13] sm:$0xff]  ;;  %v5745_v33 = vpack.c.bf16 %v2261_v15, %v2258_v10  ;;  %v2305_v15 = vld [vmem:[#allocation15 + $0xc8] sm:$0xff] }
 0x878   :  { %v4127_v38 = vmul.f32 -1.442695, %v2037_v22  ;;  %v5699_v56 = vpack.c.bf16 %v2235_v36, %v2232_v30  ;;  %v5711_v22 = vpack.c.bf16 %v2253_v54, %v2250_v49  ;;  %v2270_v30 = vld [vmem:[#allocation13 + $0x130] sm:$0xff]  ;;  %v2273_v36 = vld [vmem:[#allocation13 + $0x148] sm:$0xff] }
 0x879   :  { %v4128_v41 = vmul.f32 -1.442695, %v2044_v34  ;;  %v2256_v34 = vld [vmem:[#allocation13 + $0xc0] sm:$0xff]  ;;  %v5753_v4 = vpack.c.bf16 %v2273_v36, %v2270_v30  ;;  %v2302_v49 = vld [vmem:[#allocation15 + $0xb0] sm:$0xff]  ;;  %v2285_v36 = vld [vmem:[#allocation15 + $0x28] sm:$0xff] }
 0x87a   :  { %6381 = vpow2.f32 %v4127_v38  ;;  %v2259_v38 = vld [vmem:[#allocation13 + $0xd8] sm:$0xff]  ;;  %v2282_v30 = vld [vmem:[#allocation15 + $0x10] sm:$0xff] }
 0x87b   :  { %6383 = vpow2.f32 %v4128_v41  ;;  %v2263_v41 = vld [vmem:[#allocation13 + $0xf8] sm:$0xff] }
 0x884   :  { %v6382_v48 = vpop.eup %6381 }
 0x885   :  { %v2041_v6 = vadd.f32 1.0, %v6382_v48  ;;  %v6384_v11 = vpop.eup %6383  ;;  %v2266_v48 = vld [vmem:[#allocation13 + $0x110] sm:$0xff] }
 0x886   :  { %v2048_v62 = vadd.f32 1.0, %v6384_v11  ;;  %v2267_v11 = vld [vmem:[#allocation13 + $0x118] sm:$0xff] }
 0x887   :  { %6385 = vrcp.f32 %v2041_v6  ;;  %v2264_v6 = vld [vmem:[#allocation13 + $0x100] sm:$0xff] }
 0x888   :  { %6387 = vrcp.f32 %v2048_v62  ;;  %v5715_v62 = vpack.c.bf16 %v2259_v38, %v2256_v34  ;;  %v2307_v34 = vld [vmem:[#allocation15 + $0xd8] sm:$0xff] }
 0x891   :  { %v6386_v19 = vpop.eup %6385 }
 0x892   :  { %v2052_v23 = vmul.f32 %v6386_v19, %v2051_v16  ;;  %v6388_v31 = vpop.eup %6387  ;;  %v5717_v16 = vpack.c.bf16 %v2266_v48, %v2263_v41  ;;  %v5749_v19 = vpack.c.bf16 %v2267_v11, %v2264_v6  ;;  %v2311_v41 = vld [vmem:[#allocation15 + $0xf8] sm:$0xff]  ;;  %v2314_v48 = vld [vmem:[#allocation15 + $0x110] sm:$0xff] }
 0x893   :  { %v2055_v25 = vsub.f32 1.0, %v6388_v31  ;;  %v2057_v20 = vmul.f32 %v6388_v31, %v7369_v51  ;;  %v2269_v31 = vld [vmem:[#allocation13 + $0x128] sm:$0xff]  ;;  %v7468_v6 = vpack.c.bf16 %v2314_v48, %v2311_v41  ;;  %v2310_v11 = vld [vmem:[#allocation15 + $0xf0] sm:$0xff] }
 0x894   :  { %v2053_v27 = vadd.f32 %v2052_v23, %v7141_v44  ;;  %v2245_v44 = vld [vmem:[#allocation13 + $0x68] sm:$0xff]  ;;  %v2262_v23 = vld [vmem:[#allocation13 + $0xf0] sm:$0xff] }
 0x895   :  { %v5705_v28 = vpack.c.bf16 %v2248_v32, %v2245_v44  ;;  %v2277_v32 = vld [vmem:[#allocation13 + $0x168] sm:$0xff] }
 0x896   :  { %6389 = vtanh.f32 %v2053_v27  ;;  %v2265_v27 = vld [vmem:[#allocation13 + $0x108] sm:$0xff] }
 0x8a0   :  { %v6390_v17 = vpop.eup %6389 }
 0x8a1   :  { %v2056_v9 = vmul.f32 %v6390_v17, %v2055_v25  ;;  %v2272_v25 = vld [vmem:[#allocation13 + $0x140] sm:$0xff]  ;;  %v5719_v17 = vpack.c.bf16 %v2265_v27, %v2262_v23 }
 0x8a2   :  { %v5721_v8 = vpack.c.bf16 %v2272_v25, %v2269_v31  ;;  %v2320_v23 = vld [vmem:[#allocation15 + $0x140] sm:$0xff]  ;;  %v2319_v25 = vld [vmem:[#allocation15 + $0x138] sm:$0xff] }
 0x8a3   :  { %v7411_v2 = vadd.f32 %v2057_v20, %v2056_v9  ;;  %v2268_v9 = vld [vmem:[#allocation13 + $0x120] sm:$0xff]  ;;  %v2271_v20 = vld [vmem:[#allocation13 + $0x138] sm:$0xff] }
 0x8a4   :  { %v5723_v50 = vpack.c.bf16 %v2271_v20, %v2268_v9  ;;  %v2316_v27 = vld [vmem:[#allocation15 + $0x120] sm:$0xff]  ;;  %v2326_v9 = vld [vmem:[#allocation15 + $0x170] sm:$0xff] }
 0x8a5   :  { %2132 = vmatmul.mubr.f32.vlgmr.msra.gmra.mrb[22].mxu0 %v7411_v2  ;;  %4815 = vmatmul.mubr.f32.vlgmr.msra.gmra.mrb[38].mxu1 %v7411_v2 }
 0x8a6   :  { %5700 = vmatpush1.bf16.msra.mxu0 %v5699_v56  ;;  %5732 = vmatpush3.bf16.msra.mxu1 %v5729_v3  ;;  %v2260_v3 = vld [vmem:[#allocation13 + $0xe0] sm:$0xff] }
 0x8a7   :  { %4849 = vmatprep.mubr.f32.mxu1 %v7149_v7  ;;  %5702 = vmatprep.subr.bf16.mxu0 %v5701_v5  ;;  %v5713_v26 = vpack.c.bf16 %v2260_v3, %v2257_v61  ;;  %v2276_v56 = vld [vmem:[#allocation13 + $0x160] sm:$0xff]  ;;  %v2279_v5 = vld [vmem:[#allocation13 + $0x178] sm:$0xff]  ;;  %v2298_v61 = vld [vmem:[#allocation15 + $0x90] sm:$0xff] }
 0x8a8   :  { %5734 = vmatprep.subr.bf16.mxu1 %v5733_v29  ;;  %2418 = vmatprep.mubr.f32.mxu0 %v7932_v63  ;;  %v5757_v44 = vpack.c.bf16 %v2279_v5, %v2276_v56  ;;  %v2301_v3 = vld [vmem:[#allocation15 + $0xa8] sm:$0xff]  ;;  %v7487_v56 = vpack.c.bf16 %v2325_v53, %v2322_v59  ;;  %v2288_v5 = vld [vmem:[#allocation15 + $0x40] sm:$0xff] }
 0x8a9   :  { %v7458_v10 = vpack.c.bf16 %v2301_v3, %v2298_v61 }
 0x8aa   :  { %5704 = vmatpush1.bf16.msra.mxu0 %v5703_v57  ;;  %5736 = vmatpush3.bf16.msra.mxu1 %v5733_v29  ;;  %v2274_v29 = vld [vmem:[#allocation13 + $0x150] sm:$0xff] }
 0x8ab   :  { %5706 = vmatprep.subr.bf16.mxu0 %v5705_v28  ;;  %5738 = vmatprep.subr.bf16.mxu1 %v5737_v0  ;;  %v5727_v47 = vpack.c.bf16 %v2277_v32, %v2274_v29  ;;  %v2297_v29 = vld [vmem:[#allocation15 + $0x88] sm:$0xff]  ;;  %v2300_v32 = vld [vmem:[#allocation15 + $0xa0] sm:$0xff] }
 0x8ae   :  { %5708 = vmatpush1.bf16.msra.mxu0 %v5707_v13  ;;  %5740 = vmatpush3.bf16.msra.mxu1 %v5737_v0  ;;  %v2286_v0 = vld [vmem:[#allocation15 + $0x30] sm:$0xff]  ;;  %v2295_v13 = vld [vmem:[#allocation15 + $0x78] sm:$0xff] }
 0x8af   :  { %5710 = vmatprep.subr.bf16.mxu0 %v5709_v37  ;;  %5742 = vmatprep.subr.bf16.mxu1 %v5741_v42  ;;  %v7446_v18 = vpack.c.bf16 %v2289_v39, %v2286_v0  ;;  %v7452_v37 = vpack.c.bf16 %v2295_v13, %v2292_v12  ;;  %v2315_v0 = vld [vmem:[#allocation15 + $0x118] sm:$0xff]  ;;  %v7510_v12 = vpack.c.bf16 %v2321_v1, %v2318_v60  ;;  %v2324_v13 = vld [vmem:[#allocation15 + $0x160] sm:$0xff]  ;;  %v7934_v60 = vld [vmem:[#allocation26_spill] sm:$0xff] }
 0x8b2   :  { %5712 = vmatpush1.bf16.msra.mxu0 %v5711_v22  ;;  %5744 = vmatpush3.bf16.msra.mxu1 %v5741_v42  ;;  %v2299_v42 = vld [vmem:[#allocation15 + $0x98] sm:$0xff]  ;;  %v2308_v22 = vld [vmem:[#allocation15 + $0xe0] sm:$0xff] }
 0x8b3   :  { %5714 = vmatprep.subr.bf16.mxu0 %v5713_v26  ;;  %5746 = vmatprep.subr.bf16.mxu1 %v5745_v33  ;;  %v7456_v54 = vpack.c.bf16 %v2302_v49, %v2299_v42  ;;  %v7462_v26 = vpack.c.bf16 %v2308_v22, %v2305_v15  ;;  %v2327_v42 = vld [vmem:[#allocation15 + $0x178] sm:$0xff] }
 0x8b4   :  { %v7514_v49 = vpack.c.bf16 %v2327_v42, %v2324_v13 }
 0x8b6   :  { %5716 = vmatpush1.bf16.msra.mxu0 %v5715_v62  ;;  %5748 = vmatpush3.bf16.msra.mxu1 %v5745_v33  ;;  %v2304_v33 = vld [vmem:[#allocation15 + $0xc0] sm:$0xff]  ;;  %v2313_v62 = vld [vmem:[#allocation15 + $0x108] sm:$0xff] }
 0x8b7   :  { %5718 = vmatprep.subr.bf16.mxu0 %v5717_v16  ;;  %5750 = vmatprep.subr.bf16.mxu1 %v5749_v19  ;;  %v7464_v38 = vpack.c.bf16 %v2307_v34, %v2304_v33  ;;  %v7470_v16 = vpack.c.bf16 %v2313_v62, %v2310_v11 }
 0x8ba   :  { %5720 = vmatpush1.bf16.msra.mxu0 %v5719_v17  ;;  %5752 = vmatpush3.bf16.msra.mxu1 %v5749_v19  ;;  %v2317_v19 = vld [vmem:[#allocation15 + $0x128] sm:$0xff]  ;;  %v7476_v17 = vpack.c.bf16 %v2319_v25, %v2316_v27  ;;  %v6481_v27 = vld [vmem:[%s7913_s6] ss:$0 sm:$0xff] }
 0x8bb   :  { %5722 = vmatprep.subr.bf16.mxu0 %v5721_v8  ;;  %5754 = vmatprep.subr.bf16.mxu1 %v5753_v4  ;;  %v7474_v31 = vpack.c.bf16 %v2320_v23, %v2317_v19  ;;  %v7478_v8 = vpack.c.bf16 %v2285_v36, %v2282_v30 }
 0x8be   :  { %5724 = vmatpush1.bf16.msra.mxu0 %v5723_v50  ;;  %5756 = vmatpush3.bf16.msra.mxu1 %v5753_v4  ;;  %v2323_v4 = vld [vmem:[#allocation15 + $0x158] sm:$0xff] }
 0x8bf   :  { %5726 = vmatprep.subr.bf16.mxu0 %v5725_v35  ;;  %5758 = vmatprep.subr.bf16.mxu1 %v5757_v44  ;;  %v7481_v20 = vpack.c.bf16 %v2326_v9, %v2323_v4  ;;  %v2291_v50 = vld [vmem:[#allocation15 + $0x58] sm:$0xff] }
 0x8c0   :  { %v7489_v35 = vpack.c.bf16 %v2291_v50, %v2288_v5 }
 0x8c2   :  { %5728 = vmatpush1.bf16.msra.mxu0 %v5727_v47  ;;  %5760 = vmatpush3.bf16.msra.mxu1 %v5757_v44  ;;  %v2294_v44 = vld [vmem:[#allocation15 + $0x70] sm:$0xff] }
 0x8c3   :  { %5793 = vmatprep.subr.bf16.mxu1 %v7931_v58  ;;  %v7495_v47 = vpack.c.bf16 %v2297_v29, %v2294_v44 }
 0x8c5   :  { %2419 = vmatmul.mubr.f32.vlgmr.msra.gmra.mrb[24].mxu0 %v7149_v7  ;;  %4850 = vmatmul.mubr.f32.vlgmr.msra.gmra.mrb[40].mxu1 %v7193_v40  ;;  %v2281_v7 = vld [vmem:[#allocation15 + $0x8] sm:$0xff] }
 0x8c6   :  { %4852 = vmatprep.mubr.f32.mxu1 %v7237_v55  ;;  %2424 = vmatprep.mubr.f32.mxu0 %v7932_v63 }
 0x8c7   :  { %5795 = vmatpush3.bf16.msra.mxu1 %v7478_v8 }
 0x8c8   :  { %5796 = vmatprep.subr.bf16.mxu1 %v7931_v58 }
 0x8c9   :  { %2425 = vmatmul.mubr.f32.gmra.mrb[26].mxu0 %v7193_v40  ;;  %4853 = vmatmul.mubr.f32.gmra.mrb[42].mxu1 %v7281_v14  ;;  %v2284_v40 = vld [vmem:[#allocation15 + $0x20] sm:$0xff] }
 0x8ca   :  { %4855 = vmatprep.mubr.f32.mxu1 %v7325_v52  ;;  %2430 = vmatprep.mubr.f32.mxu0 %v7932_v63 }
 0x8cb   :  { %5798 = vmatpush3.bf16.msra.mxu1 %v7489_v35 }
 0x8cc   :  { %5799 = vmatprep.subr.bf16.mxu1 %v7931_v58 }
 0x8cd   :  { %2431 = vmatmul.mubr.f32.gmra.mrb[28].mxu0 %v7237_v55  ;;  %4856 = vmatmul.mubr.f32.gmra.mrb[44].mxu1 %v7369_v51  ;;  %v7438_v55 = vpack.c.bf16 %v2284_v40, %v2281_v7  ;;  %v2303_v7 = vld [vmem:[#allocation15 + $0xb8] sm:$0xff] }
 0x8ce   :  { %4858 = vmatprep.mubr.f32.mxu1 %v7411_v2  ;;  %2436 = vmatprep.mubr.f32.mxu0 %v7932_v63  ;;  %v7498_v40 = vpack.c.bf16 %v2303_v7, %v2300_v32 }
 0x8cf   :  { %5762 = vmatprep.subr.bf16.mxu0 %v7438_v55  ;;  %5801 = vmatpush3.bf16.msra.mxu1 %v7495_v47 }
 0x8d0   :  { %5802 = vmatprep.subr.bf16.mxu1 %v7931_v58 }
 0x8d1   :  { %2437 = vmatmul.mubr.f32.gmra.mrb[30].mxu0 %v7281_v14  ;;  %v2283_v14 = vld [vmem:[#allocation15 + $0x18] sm:$0xff] }
 0x8d2   :  { %2442 = vmatprep.mubr.f32.mxu0 %v7932_v63  ;;  %v7440_v57 = vpack.c.bf16 %v2283_v14, %v2280_v46  ;;  %v2306_v46 = vld [vmem:[#allocation15 + $0xd0] sm:$0xff]  ;;  %v2309_v14 = vld [vmem:[#allocation15 + $0xe8] sm:$0xff] }
 0x8d3   :  { %5804 = vmatpush3.bf16.msra.mxu1 %v7498_v40 }
 0x8d4   :  { %5764 = vmatpush1.bf16.msra.mxu0 %v7440_v57  ;;  %5805 = vmatprep.subr.bf16.mxu1 %v7931_v58 }
 0x8d5   :  { %2443 = vmatmul.mubr.f32.gmra.mrb[32].mxu0 %v7325_v52  ;;  %v2287_v52 = vld [vmem:[#allocation15 + $0x38] sm:$0xff] }
 0x8d6   :  { %2448 = vmatprep.mubr.f32.mxu0 %v7932_v63 }
 0x8d9   :  { %2449 = vmatmul.mubr.f32.gmra.mrb[34].mxu0 %v7369_v51  ;;  %v2290_v51 = vld [vmem:[#allocation15 + $0x50] sm:$0xff] }
 0x8da   :  { %2454 = vmatprep.mubr.f32.mxu0 %v7932_v63  ;;  %v7444_v28 = vpack.c.bf16 %v2290_v51, %v2287_v52  ;;  %v7502_v52 = vpack.c.bf16 %v2309_v14, %v2306_v46  ;;  %v2312_v51 = vld [vmem:[#allocation15 + $0x100] sm:$0xff] }
 0x8db   :  { %v7506_v39 = vpack.c.bf16 %v2315_v0, %v2312_v51  ;;  %v7933_v14 = vld [vmem:[#allocation25_spill] sm:$0xff] }
 0x8dc   :  { %5766 = vmatprep.subr.bf16.mxu0 %v7444_v28  ;;  %5807 = vmatpush3.bf16.msra.mxu1 %v7502_v52 }
 0x8dd   :  { %2455 = vmatmul.mubr.f32.gmra.mrb[36].mxu0 %v7411_v2  ;;  %5808 = vmatprep.subr.bf16.mxu1 %v7931_v58 }
 0x8de   :  { %2460 = vmatprep.mubr.f32.mxu0 %v7932_v63  ;;  %5768 = vmatpush1.bf16.msra.mxu0 %v7446_v18 }
 0x8df   :  { %5770 = vmatprep.subr.bf16.mxu0 %v7450_v21 }
 0x8e0   :  { %5810 = vmatpush3.bf16.msra.mxu1 %v7506_v39 }
 0x8e1   :  { %5811 = vmatprep.subr.bf16.mxu1 %v7931_v58 }
 0x8e2   :  { %5772 = vmatpush1.bf16.msra.mxu0 %v7452_v37 }
 0x8e3   :  { %5774 = vmatprep.subr.bf16.mxu0 %v7456_v54 }
 0x8e4   :  { %5813 = vmatpush3.bf16.msra.mxu1 %v7510_v12 }
 0x8e5   :  { %5814 = vmatprep.subr.bf16.mxu1 %v7931_v58 }
 0x8e6   :  { %5776 = vmatpush1.bf16.msra.mxu0 %v7458_v10 }
 0x8e7   :  { %5778 = vmatprep.subr.bf16.mxu0 %v7462_v26 }
 0x8e8   :  { %5816 = vmatpush3.bf16.msra.mxu1 %v7514_v49 }
 0x8e9   :  { %5849 = vmatprep.subr.bf16.mxu1 %v7931_v58 }
 0x8ea   :  { %5780 = vmatpush1.bf16.msra.mxu0 %v7464_v38 }
 0x8eb   :  { %5782 = vmatprep.subr.bf16.mxu0 %v7468_v6 }
 0x8ee   :  { %5784 = vmatpush1.bf16.msra.mxu0 %v7470_v16 }
 0x8ef   :  { %5786 = vmatprep.subr.bf16.mxu0 %v7474_v31 }
 0x8f2   :  { %5788 = vmatpush1.bf16.msra.mxu0 %v7476_v17 }
 0x8f3   :  { %5790 = vmatprep.subr.bf16.mxu0 %v7481_v20 }
 0x8f6   :  { %5792 = vmatpush1.bf16.msra.mxu0 %v7487_v56 }
 0x8f7   :  { %5818 = vmatprep.subr.bf16.mxu0 %v7438_v55 }
 0x978   :  { %v2133_v61 = vpop.f32.mrb[22].mxu0  ;;  %v2204_v3 = vpop.f32.mrb[38].mxu1 }
 0x979   :  { %v2208_v15 = vadd.f32 %v2133_v61, %v7125_v43  ;;  %v2135_v22 = vpop.f32.mrb[23].mxu0  ;;  %v4816_v33 = vpop.f32.mrb[39].mxu1  ;;  %v2222_v25 = vadd.f32 %v6481_v27, %v2204_v3 }
 0x97a   :  { %v2215_v34 = vadd.f32 %v2135_v22, %v7127_v45 }
 0x97b   :  { %v4129_v41 = vmul.f32 -1.442695, %v2208_v15 }
 0x97c   :  { %v4130_v48 = vmul.f32 -1.442695, %v2215_v34 }
 0x97d   :  { %6391 = vpow2.f32 %v4129_v41 }
 0x97e   :  { %6393 = vpow2.f32 %v4130_v48 }
 0x987   :  { %v6392_v11 = vpop.eup %6391 }
 0x988   :  { %v2212_v62 = vadd.f32 1.0, %v6392_v11  ;;  %v6394_v19 = vpop.eup %6393 }
 0x989   :  { %v2219_v23 = vadd.f32 1.0, %v6394_v19  ;;  %v7935_v19 = vld [vmem:[#allocation27_spill] sm:$0xff] }
 0x98a   :  { %6395 = vrcp.f32 %v2212_v62  ;;  %v7596_v62 = vld [vmem:[%s7917_s10] ss:$0 sm:$0xff] }
 0x98b   :  { %6397 = vrcp.f32 %v2219_v23 }
 0x994   :  { %v6396_v30 = vpop.eup %6395 }
 0x995   :  { %v2223_v43 = vmul.f32 %v6396_v30, %v2222_v25  ;;  %v6398_v53 = vpop.eup %6397 }
 0x996   :  { %v2226_v44 = vsub.f32 1.0, %v6398_v53  ;;  %v2228_v7 = vmul.f32 %v6398_v53, %v7411_v2  ;;  %v2328_v2 = vld [vmem:[%s7916_s9] sm:$0x7] }
 0x997   :  { %v2224_v36 = vadd.f32 %v2223_v43, %v7139_v24  ;;  %v7584_v51 = vrot.slane %v2328_v2, %v7933_v14  ;;  %v7589_v1 = vrot.slane %v2328_v2, %v7934_v60  ;;  %v7599_v23 = vrot.slane %v2328_v2, %v7935_v19 }
 0x998   :  { %v7525_v45 = vpop.f32.mrb[40].mxu1 }
 0x999   :  { %6399 = vtanh.f32 %v2224_v36  ;;  %v7527_v4 = vpop.f32.mrb[41].mxu1  ;;  %v2539_v19 = vadd.f32 %v7525_v45, %v7599_v23 }
 0x99a   :  { %v2534_v43 = vadd.f32 %v7527_v4, %v7599_v23 }
 0x99c   :  { %v7529_v9 = vpop.f32.mrb[42].mxu1 }
 0x99d   :  { %v7531_v59 = vpop.f32.mrb[43].mxu1 }
 0x9a0   :  { %v7533_v5 = vpop.f32.mrb[44].mxu1 }
 0x9a1   :  { %v7535_v50 = vpop.f32.mrb[45].mxu1 }
 0x9a3   :  { %v6400_v29 = vpop.eup %6399 }
 0x9a4   :  { %v2227_v32 = vmul.f32 %v6400_v29, %v2226_v44 }
 0x9a6   :  { %v2229_v24 = vadd.f32 %v2228_v7, %v2227_v32 }
 0x9a8   :  { %2461 = vmatmul.mubr.f32.gmra.mrb[38].mxu0 %v2229_v24  ;;  %4859 = vmatmul.mubr.f32.gmra.mrb[46].mxu1 %v2229_v24 }
 0x9a9   :  { %2663 = vmatprep.mubr.f32.mxu0 %v7932_v63  ;;  %4893 = vmatprep.mubr.msk.f32.mxu1 %vm6706_vm1, %v7932_v63 }
 0x9ac   :  { %2664 = vmatmul.mubr.f32.vlgmr.msra.gmra.mrb[24].mxu0 %v7932_v63  ;;  %4894 = vmatmul.mubr.f32.vlgmr.msra.gmra.mrb[48].mxu1 %v7932_v63 }
 0x9ad   :  { %5820 = vmatpush1.bf16.msra.mxu0 %v7440_v57  ;;  %5851 = vmatpush3.bf16.msra.mxu1 %v7478_v8 }
 0x9ae   :  { %5822 = vmatprep.subr.bf16.mxu0 %v7444_v28  ;;  %5852 = vmatprep.subr.bf16.mxu1 %v7931_v58 }
 0x9af   :  { %2836 = vmatprep.mubr.f32.mxu0 %v7932_v63  ;;  %4928 = vmatprep.mubr.msk.f32.mxu1 %vm6706_vm1, %v7932_v63 }
 0x9b1   :  { %5824 = vmatpush1.bf16.msra.mxu0 %v7446_v18  ;;  %5854 = vmatpush3.bf16.msra.mxu1 %v7489_v35 }
 0x9b2   :  { %5826 = vmatprep.subr.bf16.mxu0 %v7450_v21  ;;  %5855 = vmatprep.subr.bf16.mxu1 %v7931_v58 }
 0x9b5   :  { %5828 = vmatpush1.bf16.msra.mxu0 %v7452_v37  ;;  %5857 = vmatpush3.bf16.msra.mxu1 %v7495_v47 }
 0x9b6   :  { %5830 = vmatprep.subr.bf16.mxu0 %v7456_v54  ;;  %5858 = vmatprep.subr.bf16.mxu1 %v7931_v58 }
 0x9b9   :  { %5832 = vmatpush1.bf16.msra.mxu0 %v7458_v10  ;;  %5860 = vmatpush3.bf16.msra.mxu1 %v7498_v40 }
 0x9ba   :  { %5834 = vmatprep.subr.bf16.mxu0 %v7462_v26  ;;  %5861 = vmatprep.subr.bf16.mxu1 %v7931_v58 }
 0x9bd   :  { %5836 = vmatpush1.bf16.msra.mxu0 %v7464_v38  ;;  %5863 = vmatpush3.bf16.msra.mxu1 %v7502_v52 }
 0x9be   :  { %5838 = vmatprep.subr.bf16.mxu0 %v7468_v6  ;;  %5864 = vmatprep.subr.bf16.mxu1 %v7931_v58 }
 0x9c1   :  { %5840 = vmatpush1.bf16.msra.mxu0 %v7470_v16  ;;  %5866 = vmatpush3.bf16.msra.mxu1 %v7506_v39 }
 0x9c2   :  { %5842 = vmatprep.subr.bf16.mxu0 %v7474_v31  ;;  %5867 = vmatprep.subr.bf16.mxu1 %v7931_v58 }
 0x9c5   :  { %5844 = vmatpush1.bf16.msra.mxu0 %v7476_v17  ;;  %5869 = vmatpush3.bf16.msra.mxu1 %v7510_v12 }
 0x9c6   :  { %5846 = vmatprep.subr.bf16.mxu0 %v7481_v20  ;;  %5870 = vmatprep.subr.bf16.mxu1 %v7931_v58 }
 0x9c9   :  { %5848 = vmatpush1.bf16.msra.mxu0 %v7487_v56  ;;  %5872 = vmatpush3.bf16.msra.mxu1 %v7514_v49 }
 0x9ca   :  { %5874 = vmatprep.subr.bf16.mxu0 %v7438_v55  ;;  %5905 = vmatprep.subr.bf16.mxu1 %v7931_v58 }
 0xa7b   :  { %v7581_v46 = vpop.f32.mrb[46].mxu1 }
 0xa7c   :  { %v7586_v0 = vpop.f32.mrb[47].mxu1 }
 0xa7f   :  { %v2665_v13 = vpop.f32.mrb[24].mxu0  ;;  %v2736_v42 = vpop.f32.mrb[48].mxu1 }
 0xa80   :  { %v6273_v61 = vadd.f32 %v2665_v13, %v7584_v51  ;;  %v2667_v3 = vpop.f32.mrb[25].mxu0  ;;  %v4895_v15 = vpop.f32.mrb[49].mxu1  ;;  %v2760_v25 = vadd.f32 %v7596_v62, %v2736_v42 }
 0xa81   :  { %v6274_v33 = vadd.f32 %v2667_v3, %v7589_v1 }
 0xa82   :  { %v4131_v22 = vmul.f32 -1.442695, %v6273_v61 }
 0xa83   :  { %v4132_v34 = vmul.f32 -1.442695, %v6274_v33 }
 0xa84   :  { %6401 = vpow2.f32 %v4131_v22 }
 0xa85   :  { %6403 = vpow2.f32 %v4132_v34 }
 0xa8e   :  { %v6402_v41 = vpop.eup %6401 }
 0xa8f   :  { %v2744_v48 = vadd.f32 1.0, %v6402_v41  ;;  %v6404_v11 = vpop.eup %6403 }
 0xa90   :  { %v2751_v27 = vadd.f32 1.0, %v6404_v11 }
 0xa91   :  { %6405 = vrcp.f32 %v2744_v48 }
 0xa92   :  { %6407 = vrcp.f32 %v2751_v27 }
 0xa9b   :  { %v6406_v30 = vpop.eup %6405 }
 0xa9c   :  { %v2761_v36 = vmul.f32 %v6406_v30, %v2760_v25  ;;  %v6408_v44 = vpop.eup %6407 }
 0xa9d   :  { %v2764_v29 = vsub.f32 1.0, %v6408_v44  ;;  %v2766_v24 = vmul.f32 0.0, %v6408_v44 }
 0xa9e   :  { %v2762_v53 = vadd.f32 %v2761_v36, %v2534_v43 }
 0xaa0   :  { %6409 = vtanh.f32 %v2762_v53 }
 0xaaa   :  { %v6410_v32 = vpop.eup %6409 }
 0xaab   :  { %v2765_v7 = vmul.f32 %v6410_v32, %v2764_v29 }
 0xaad   :  { %v7604_v14 = vadd.f32 %v2766_v24, %v2765_v7 }
 0xaaf   :  { %2837 = vmatmul.mubr.f32.vlgmr.msra.gmra.mrb[26].mxu0 %v7604_v14  ;;  %4929 = vmatmul.mubr.f32.vlgmr.msra.gmra.mrb[50].mxu1 %v7604_v14 }
 0xab0   :  { %5876 = vmatpush1.bf16.msra.mxu0 %v7440_v57  ;;  %5907 = vmatpush3.bf16.msra.mxu1 %v7478_v8 }
 0xab1   :  { %5878 = vmatprep.subr.bf16.mxu0 %v7444_v28  ;;  %5908 = vmatprep.subr.bf16.mxu1 %v7931_v58 }
 0xab2   :  { %3003 = vmatprep.mubr.f32.mxu0 %v7932_v63  ;;  %4963 = vmatprep.mubr.msk.f32.mxu1 %vm6706_vm1, %v7932_v63 }
 0xab4   :  { %5880 = vmatpush1.bf16.msra.mxu0 %v7446_v18  ;;  %5910 = vmatpush3.bf16.msra.mxu1 %v7489_v35 }
 0xab5   :  { %5882 = vmatprep.subr.bf16.mxu0 %v7450_v21  ;;  %5911 = vmatprep.subr.bf16.mxu1 %v7931_v58 }
 0xab8   :  { %5884 = vmatpush1.bf16.msra.mxu0 %v7452_v37  ;;  %5913 = vmatpush3.bf16.msra.mxu1 %v7495_v47 }
 0xab9   :  { %5886 = vmatprep.subr.bf16.mxu0 %v7456_v54  ;;  %5914 = vmatprep.subr.bf16.mxu1 %v7931_v58 }
 0xabc   :  { %5888 = vmatpush1.bf16.msra.mxu0 %v7458_v10  ;;  %5916 = vmatpush3.bf16.msra.mxu1 %v7498_v40 }
 0xabd   :  { %5890 = vmatprep.subr.bf16.mxu0 %v7462_v26  ;;  %5917 = vmatprep.subr.bf16.mxu1 %v7931_v58 }
 0xac0   :  { %5892 = vmatpush1.bf16.msra.mxu0 %v7464_v38  ;;  %5919 = vmatpush3.bf16.msra.mxu1 %v7502_v52 }
 0xac1   :  { %5894 = vmatprep.subr.bf16.mxu0 %v7468_v6  ;;  %5920 = vmatprep.subr.bf16.mxu1 %v7931_v58 }
 0xac4   :  { %5896 = vmatpush1.bf16.msra.mxu0 %v7470_v16  ;;  %5922 = vmatpush3.bf16.msra.mxu1 %v7506_v39 }
 0xac5   :  { %5898 = vmatprep.subr.bf16.mxu0 %v7474_v31  ;;  %5923 = vmatprep.subr.bf16.mxu1 %v7931_v58 }
 0xac8   :  { %5900 = vmatpush1.bf16.msra.mxu0 %v7476_v17  ;;  %5925 = vmatpush3.bf16.msra.mxu1 %v7510_v12 }
 0xac9   :  { %5902 = vmatprep.subr.bf16.mxu0 %v7481_v20  ;;  %5926 = vmatprep.subr.bf16.mxu1 %v7931_v58 }
 0xacc   :  { %5904 = vmatpush1.bf16.msra.mxu0 %v7487_v56  ;;  %5928 = vmatpush3.bf16.msra.mxu1 %v7514_v49 }
 0xacd   :  { %5930 = vmatprep.subr.bf16.mxu0 %v7438_v55  ;;  %5961 = vmatprep.subr.bf16.mxu1 %v7931_v58 }
 0xb82   :  { %v2838_v4 = vpop.f32.mrb[26].mxu0  ;;  %v2909_v2 = vpop.f32.mrb[50].mxu1 }
 0xb83   :  { %v6275_v60 = vadd.f32 %v2838_v4, %v7584_v51  ;;  %v2840_v13 = vpop.f32.mrb[27].mxu0  ;;  %v4930_v42 = vpop.f32.mrb[51].mxu1  ;;  %v2927_v48 = vadd.f32 %v7596_v62, %v2909_v2 }
 0xb84   :  { %v6276_v3 = vadd.f32 %v2840_v13, %v7589_v1 }
 0xb85   :  { %v4134_v61 = vmul.f32 -1.442695, %v6275_v60 }
 0xb86   :  { %v4135_v15 = vmul.f32 -1.442695, %v6276_v3 }
 0xb87   :  { %6411 = vpow2.f32 %v4134_v61 }
 0xb88   :  { %6413 = vpow2.f32 %v4135_v15 }
 0xb91   :  { %v6412_v22 = vpop.eup %6411 }
 0xb92   :  { %v2917_v33 = vadd.f32 1.0, %v6412_v22  ;;  %v6414_v34 = vpop.eup %6413 }
 0xb93   :  { %v2924_v41 = vadd.f32 1.0, %v6414_v34  ;;  %v2544_v34 = vadd.f32 %v7531_v59, %v7599_v23 }
 0xb94   :  { %6415 = vrcp.f32 %v2917_v33 }
 0xb95   :  { %6417 = vrcp.f32 %v2924_v41 }
 0xb9e   :  { %v6416_v11 = vpop.eup %6415 }
 0xb9f   :  { %v2928_v27 = vmul.f32 %v6416_v11, %v2927_v48  ;;  %v6418_v30 = vpop.eup %6417 }
 0xba0   :  { %v2931_v43 = vsub.f32 1.0, %v6418_v30  ;;  %v2933_v44 = vmul.f32 %v6418_v30, %v7604_v14 }
 0xba1   :  { %v2929_v25 = vadd.f32 %v2928_v27, %v2539_v19 }
 0xba3   :  { %6419 = vtanh.f32 %v2929_v25 }
 0xbad   :  { %v6420_v36 = vpop.eup %6419 }
 0xbae   :  { %v2932_v53 = vmul.f32 %v6420_v36, %v2931_v43 }
 0xbb0   :  { %v7649_v29 = vadd.f32 %v2933_v44, %v2932_v53 }
 0xbb2   :  { %3004 = vmatmul.mubr.f32.vlgmr.msra.gmra.mrb[28].mxu0 %v7649_v29  ;;  %4964 = vmatmul.mubr.f32.vlgmr.msra.gmra.mrb[52].mxu1 %v7649_v29 }
 0xbb3   :  { %5932 = vmatpush1.bf16.msra.mxu0 %v7440_v57  ;;  %5963 = vmatpush3.bf16.msra.mxu1 %v7478_v8 }
 0xbb4   :  { %5934 = vmatprep.subr.bf16.mxu0 %v7444_v28  ;;  %5964 = vmatprep.subr.bf16.mxu1 %v7931_v58 }
 0xbb5   :  { %3170 = vmatprep.mubr.f32.mxu0 %v7932_v63  ;;  %4998 = vmatprep.mubr.msk.f32.mxu1 %vm6706_vm1, %v7932_v63 }
 0xbb7   :  { %5936 = vmatpush1.bf16.msra.mxu0 %v7446_v18  ;;  %5966 = vmatpush3.bf16.msra.mxu1 %v7489_v35 }
 0xbb8   :  { %5938 = vmatprep.subr.bf16.mxu0 %v7450_v21  ;;  %5967 = vmatprep.subr.bf16.mxu1 %v7931_v58 }
 0xbbb   :  { %5940 = vmatpush1.bf16.msra.mxu0 %v7452_v37  ;;  %5969 = vmatpush3.bf16.msra.mxu1 %v7495_v47 }
 0xbbc   :  { %5942 = vmatprep.subr.bf16.mxu0 %v7456_v54  ;;  %5970 = vmatprep.subr.bf16.mxu1 %v7931_v58 }
 0xbbf   :  { %5944 = vmatpush1.bf16.msra.mxu0 %v7458_v10  ;;  %5972 = vmatpush3.bf16.msra.mxu1 %v7498_v40 }
 0xbc0   :  { %5946 = vmatprep.subr.bf16.mxu0 %v7462_v26  ;;  %5973 = vmatprep.subr.bf16.mxu1 %v7931_v58 }
 0xbc3   :  { %5948 = vmatpush1.bf16.msra.mxu0 %v7464_v38  ;;  %5975 = vmatpush3.bf16.msra.mxu1 %v7502_v52 }
 0xbc4   :  { %5950 = vmatprep.subr.bf16.mxu0 %v7468_v6  ;;  %5976 = vmatprep.subr.bf16.mxu1 %v7931_v58 }
 0xbc7   :  { %5952 = vmatpush1.bf16.msra.mxu0 %v7470_v16  ;;  %5978 = vmatpush3.bf16.msra.mxu1 %v7506_v39 }
 0xbc8   :  { %5954 = vmatprep.subr.bf16.mxu0 %v7474_v31  ;;  %5979 = vmatprep.subr.bf16.mxu1 %v7931_v58 }
 0xbcb   :  { %5956 = vmatpush1.bf16.msra.mxu0 %v7476_v17  ;;  %5981 = vmatpush3.bf16.msra.mxu1 %v7510_v12 }
 0xbcc   :  { %5958 = vmatprep.subr.bf16.mxu0 %v7481_v20  ;;  %5982 = vmatprep.subr.bf16.mxu1 %v7931_v58 }
 0xbcf   :  { %5960 = vmatpush1.bf16.msra.mxu0 %v7487_v56  ;;  %5984 = vmatpush3.bf16.msra.mxu1 %v7514_v49 }
 0xbd0   :  { %5986 = vmatprep.subr.bf16.mxu0 %v7438_v55  ;;  %6017 = vmatprep.subr.bf16.mxu1 %v7931_v58 }
 0xc85   :  { %v3005_v45 = vpop.f32.mrb[28].mxu0  ;;  %v3076_v32 = vpop.f32.mrb[52].mxu1 }
 0xc86   :  { %v6277_v7 = vadd.f32 %v3005_v45, %v7584_v51  ;;  %v3007_v24 = vpop.f32.mrb[29].mxu0  ;;  %v4965_v4 = vpop.f32.mrb[53].mxu1  ;;  %v3094_v22 = vadd.f32 %v7596_v62, %v3076_v32 }
 0xc87   :  { %v6278_v60 = vadd.f32 %v3007_v24, %v7589_v1 }
 0xc88   :  { %v4136_v2 = vmul.f32 -1.442695, %v6277_v7 }
 0xc89   :  { %v4137_v13 = vmul.f32 -1.442695, %v6278_v60 }
 0xc8a   :  { %6421 = vpow2.f32 %v4136_v2 }
 0xc8b   :  { %6423 = vpow2.f32 %v4137_v13 }
 0xc94   :  { %v6422_v42 = vpop.eup %6421 }
 0xc95   :  { %v3084_v61 = vadd.f32 1.0, %v6422_v42  ;;  %v6424_v3 = vpop.eup %6423 }
 0xc96   :  { %v3091_v15 = vadd.f32 1.0, %v6424_v3  ;;  %v2549_v3 = vadd.f32 %v7529_v9, %v7599_v23 }
 0xc97   :  { %6425 = vrcp.f32 %v3084_v61 }
 0xc98   :  { %6427 = vrcp.f32 %v3091_v15 }
 0xca1   :  { %v6426_v33 = vpop.eup %6425 }
 0xca2   :  { %v3095_v41 = vmul.f32 %v6426_v33, %v3094_v22  ;;  %v6428_v11 = vpop.eup %6427 }
 0xca3   :  { %v3098_v19 = vsub.f32 1.0, %v6428_v11  ;;  %v3100_v30 = vmul.f32 %v6428_v11, %v7649_v29 }
 0xca4   :  { %v3096_v48 = vadd.f32 %v3095_v41, %v2544_v34 }
 0xca6   :  { %6429 = vtanh.f32 %v3096_v48 }
 0xcb0   :  { %v6430_v27 = vpop.eup %6429 }
 0xcb1   :  { %v3099_v25 = vmul.f32 %v6430_v27, %v3098_v19 }
 0xcb3   :  { %v7694_v43 = vadd.f32 %v3100_v30, %v3099_v25 }
 0xcb5   :  { %3171 = vmatmul.mubr.f32.vlgmr.msra.gmra.mrb[30].mxu0 %v7694_v43  ;;  %4999 = vmatmul.mubr.f32.vlgmr.msra.gmra.mrb[54].mxu1 %v7694_v43 }
 0xcb6   :  { %5988 = vmatpush1.bf16.msra.mxu0 %v7440_v57  ;;  %6019 = vmatpush3.bf16.msra.mxu1 %v7478_v8 }
 0xcb7   :  { %5990 = vmatprep.subr.bf16.mxu0 %v7444_v28  ;;  %6020 = vmatprep.subr.bf16.mxu1 %v7931_v58 }
 0xcb8   :  { %3337 = vmatprep.mubr.f32.mxu0 %v7932_v63  ;;  %5033 = vmatprep.mubr.msk.f32.mxu1 %vm6706_vm1, %v7932_v63 }
 0xcba   :  { %5992 = vmatpush1.bf16.msra.mxu0 %v7446_v18  ;;  %6022 = vmatpush3.bf16.msra.mxu1 %v7489_v35 }
 0xcbb   :  { %5994 = vmatprep.subr.bf16.mxu0 %v7450_v21  ;;  %6023 = vmatprep.subr.bf16.mxu1 %v7931_v58 }
 0xcbe   :  { %5996 = vmatpush1.bf16.msra.mxu0 %v7452_v37  ;;  %6025 = vmatpush3.bf16.msra.mxu1 %v7495_v47 }
 0xcbf   :  { %5998 = vmatprep.subr.bf16.mxu0 %v7456_v54  ;;  %6026 = vmatprep.subr.bf16.mxu1 %v7931_v58 }
 0xcc2   :  { %6000 = vmatpush1.bf16.msra.mxu0 %v7458_v10  ;;  %6028 = vmatpush3.bf16.msra.mxu1 %v7498_v40 }
 0xcc3   :  { %6002 = vmatprep.subr.bf16.mxu0 %v7462_v26  ;;  %6029 = vmatprep.subr.bf16.mxu1 %v7931_v58 }
 0xcc6   :  { %6004 = vmatpush1.bf16.msra.mxu0 %v7464_v38  ;;  %6031 = vmatpush3.bf16.msra.mxu1 %v7502_v52 }
 0xcc7   :  { %6006 = vmatprep.subr.bf16.mxu0 %v7468_v6  ;;  %6032 = vmatprep.subr.bf16.mxu1 %v7931_v58 }
 0xcca   :  { %6008 = vmatpush1.bf16.msra.mxu0 %v7470_v16  ;;  %6034 = vmatpush3.bf16.msra.mxu1 %v7506_v39 }
 0xccb   :  { %6010 = vmatprep.subr.bf16.mxu0 %v7474_v31  ;;  %6035 = vmatprep.subr.bf16.mxu1 %v7931_v58 }
 0xcce   :  { %6012 = vmatpush1.bf16.msra.mxu0 %v7476_v17  ;;  %6037 = vmatpush3.bf16.msra.mxu1 %v7510_v12 }
 0xccf   :  { %6014 = vmatprep.subr.bf16.mxu0 %v7481_v20  ;;  %6038 = vmatprep.subr.bf16.mxu1 %v7931_v58 }
 0xcd2   :  { %6016 = vmatpush1.bf16.msra.mxu0 %v7487_v56  ;;  %6040 = vmatpush3.bf16.msra.mxu1 %v7514_v49 }
 0xcd3   :  { %6042 = vmatprep.subr.bf16.mxu0 %v7438_v55  ;;  %6073 = vmatprep.subr.bf16.mxu1 %v7931_v58 }
 0xd88   :  { %v3172_v59 = vpop.f32.mrb[30].mxu0  ;;  %v3243_v36 = vpop.f32.mrb[54].mxu1 }
 0xd89   :  { %v6279_v53 = vadd.f32 %v3172_v59, %v7584_v51  ;;  %v3174_v44 = vpop.f32.mrb[31].mxu0  ;;  %v5000_v45 = vpop.f32.mrb[55].mxu1  ;;  %v3261_v42 = vadd.f32 %v7596_v62, %v3243_v36 }
 0xd8a   :  { %v6280_v7 = vadd.f32 %v3174_v44, %v7589_v1 }
 0xd8b   :  { %v4138_v32 = vmul.f32 -1.442695, %v6279_v53 }
 0xd8c   :  { %v4139_v24 = vmul.f32 -1.442695, %v6280_v7 }
 0xd8d   :  { %6431 = vpow2.f32 %v4138_v32 }
 0xd8e   :  { %6433 = vpow2.f32 %v4139_v24 }
 0xd97   :  { %v6432_v4 = vpop.eup %6431 }
 0xd98   :  { %v3251_v2 = vadd.f32 1.0, %v6432_v4  ;;  %v6434_v60 = vpop.eup %6433 }
 0xd99   :  { %v3258_v13 = vadd.f32 1.0, %v6434_v60  ;;  %v2554_v60 = vadd.f32 %v7535_v50, %v7599_v23 }
 0xd9a   :  { %6435 = vrcp.f32 %v3251_v2 }
 0xd9b   :  { %6437 = vrcp.f32 %v3258_v13 }
 0xda4   :  { %v6436_v61 = vpop.eup %6435 }
 0xda5   :  { %v3262_v15 = vmul.f32 %v6436_v61, %v3261_v42  ;;  %v6438_v33 = vpop.eup %6437 }
 0xda6   :  { %v3265_v34 = vsub.f32 1.0, %v6438_v33  ;;  %v3267_v11 = vmul.f32 %v6438_v33, %v7694_v43 }
 0xda7   :  { %v3263_v22 = vadd.f32 %v3262_v15, %v2549_v3 }
 0xda9   :  { %6439 = vtanh.f32 %v3263_v22 }
 0xdb3   :  { %v6440_v41 = vpop.eup %6439 }
 0xdb4   :  { %v3266_v48 = vmul.f32 %v6440_v41, %v3265_v34 }
 0xdb6   :  { %v7739_v19 = vadd.f32 %v3267_v11, %v3266_v48 }
 0xdb8   :  { %3338 = vmatmul.mubr.f32.vlgmr.msra.gmra.mrb[32].mxu0 %v7739_v19  ;;  %5034 = vmatmul.mubr.f32.vlgmr.msra.gmra.mrb[56].mxu1 %v7739_v19 }
 0xdb9   :  { %6044 = vmatpush1.bf16.msra.mxu0 %v7440_v57  ;;  %6075 = vmatpush3.bf16.msra.mxu1 %v7478_v8 }
 0xdba   :  { %6046 = vmatprep.subr.bf16.mxu0 %v7444_v28  ;;  %6076 = vmatprep.subr.bf16.mxu1 %v7931_v58 }
 0xdbb   :  { %3504 = vmatprep.mubr.f32.mxu0 %v7932_v63  ;;  %5068 = vmatprep.mubr.msk.f32.mxu1 %vm6706_vm1, %v7932_v63 }
 0xdbd   :  { %6048 = vmatpush1.bf16.msra.mxu0 %v7446_v18  ;;  %6078 = vmatpush3.bf16.msra.mxu1 %v7489_v35 }
 0xdbe   :  { %6050 = vmatprep.subr.bf16.mxu0 %v7450_v21  ;;  %6079 = vmatprep.subr.bf16.mxu1 %v7931_v58 }
 0xdc1   :  { %6052 = vmatpush1.bf16.msra.mxu0 %v7452_v37  ;;  %6081 = vmatpush3.bf16.msra.mxu1 %v7495_v47 }
 0xdc2   :  { %6054 = vmatprep.subr.bf16.mxu0 %v7456_v54  ;;  %6082 = vmatprep.subr.bf16.mxu1 %v7931_v58 }
 0xdc5   :  { %6056 = vmatpush1.bf16.msra.mxu0 %v7458_v10  ;;  %6084 = vmatpush3.bf16.msra.mxu1 %v7498_v40 }
 0xdc6   :  { %6058 = vmatprep.subr.bf16.mxu0 %v7462_v26  ;;  %6085 = vmatprep.subr.bf16.mxu1 %v7931_v58 }
 0xdc9   :  { %6060 = vmatpush1.bf16.msra.mxu0 %v7464_v38  ;;  %6087 = vmatpush3.bf16.msra.mxu1 %v7502_v52 }
 0xdca   :  { %6062 = vmatprep.subr.bf16.mxu0 %v7468_v6  ;;  %6088 = vmatprep.subr.bf16.mxu1 %v7931_v58 }
 0xdcd   :  { %6064 = vmatpush1.bf16.msra.mxu0 %v7470_v16  ;;  %6090 = vmatpush3.bf16.msra.mxu1 %v7506_v39 }
 0xdce   :  { %6066 = vmatprep.subr.bf16.mxu0 %v7474_v31  ;;  %6091 = vmatprep.subr.bf16.mxu1 %v7931_v58 }
 0xdd1   :  { %6068 = vmatpush1.bf16.msra.mxu0 %v7476_v17  ;;  %6093 = vmatpush3.bf16.msra.mxu1 %v7510_v12 }
 0xdd2   :  { %6070 = vmatprep.subr.bf16.mxu0 %v7481_v20  ;;  %6094 = vmatprep.subr.bf16.mxu1 %v7931_v58 }
 0xdd5   :  { %6072 = vmatpush1.bf16.msra.mxu0 %v7487_v56  ;;  %6096 = vmatpush3.bf16.msra.mxu1 %v7514_v49 }
 0xdd6   :  { %6098 = vmatprep.subr.bf16.mxu0 %v7438_v55  ;;  %6129 = vmatprep.subr.bf16.mxu1 %v7931_v58 }
 0xe8b   :  { %v3339_v9 = vpop.f32.mrb[32].mxu0  ;;  %v3410_v27 = vpop.f32.mrb[56].mxu1 }
 0xe8c   :  { %v6281_v25 = vadd.f32 %v3339_v9, %v7584_v51  ;;  %v3341_v30 = vpop.f32.mrb[33].mxu0  ;;  %v5035_v59 = vpop.f32.mrb[57].mxu1  ;;  %v3428_v4 = vadd.f32 %v7596_v62, %v3410_v27 }
 0xe8d   :  { %v6282_v53 = vadd.f32 %v3341_v30, %v7589_v1 }
 0xe8e   :  { %v4140_v36 = vmul.f32 -1.442695, %v6281_v25 }
 0xe8f   :  { %v4141_v44 = vmul.f32 -1.442695, %v6282_v53 }
 0xe90   :  { %6441 = vpow2.f32 %v4140_v36 }
 0xe91   :  { %6443 = vpow2.f32 %v4141_v44 }
 0xe9a   :  { %v6442_v45 = vpop.eup %6441 }
 0xe9b   :  { %v3418_v32 = vadd.f32 1.0, %v6442_v45  ;;  %v6444_v7 = vpop.eup %6443 }
 0xe9c   :  { %v3425_v24 = vadd.f32 1.0, %v6444_v7 }
 0xe9d   :  { %6445 = vrcp.f32 %v3418_v32  ;;  %v2559_v32 = vadd.f32 %v7533_v5, %v7599_v23 }
 0xe9e   :  { %6447 = vrcp.f32 %v3425_v24 }
 0xea7   :  { %v6446_v2 = vpop.eup %6445 }
 0xea8   :  { %v3429_v13 = vmul.f32 %v6446_v2, %v3428_v4  ;;  %v6448_v61 = vpop.eup %6447 }
 0xea9   :  { %v3432_v3 = vsub.f32 1.0, %v6448_v61  ;;  %v3434_v33 = vmul.f32 %v6448_v61, %v7739_v19 }
 0xeaa   :  { %v3430_v42 = vadd.f32 %v3429_v13, %v2554_v60 }
 0xeac   :  { %6449 = vtanh.f32 %v3430_v42 }
 0xeb6   :  { %v6450_v15 = vpop.eup %6449 }
 0xeb7   :  { %v3433_v22 = vmul.f32 %v6450_v15, %v3432_v3 }
 0xeb9   :  { %v7784_v34 = vadd.f32 %v3434_v33, %v3433_v22  ;;  %v3950_v33 = vld [vmem:[#allocation16 + $0x20] sm:$0xff] }
 0xebb   :  { %3505 = vmatmul.mubr.f32.vlgmr.msra.gmra.mrb[34].mxu0 %v7784_v34  ;;  %5069 = vmatmul.mubr.f32.vlgmr.msra.gmra.mrb[58].mxu1 %v7784_v34 }
 0xebc   :  { %6100 = vmatpush1.bf16.msra.mxu0 %v7440_v57  ;;  %6131 = vmatpush3.bf16.msra.mxu1 %v7478_v8 }
 0xebd   :  { %6102 = vmatprep.subr.bf16.mxu0 %v7444_v28  ;;  %6132 = vmatprep.subr.bf16.mxu1 %v7931_v58 }
 0xebe   :  { %3671 = vmatprep.mubr.f32.mxu0 %v7932_v63  ;;  %5103 = vmatprep.mubr.msk.f32.mxu1 %vm6706_vm1, %v7932_v63 }
 0xec0   :  { %6104 = vmatpush1.bf16.msra.mxu0 %v7446_v18  ;;  %6134 = vmatpush3.bf16.msra.mxu1 %v7489_v35 }
 0xec1   :  { %6106 = vmatprep.subr.bf16.mxu0 %v7450_v21  ;;  %6135 = vmatprep.subr.bf16.mxu1 %v7931_v58 }
 0xec4   :  { %6108 = vmatpush1.bf16.msra.mxu0 %v7452_v37  ;;  %6137 = vmatpush3.bf16.msra.mxu1 %v7495_v47 }
 0xec5   :  { %6110 = vmatprep.subr.bf16.mxu0 %v7456_v54  ;;  %6138 = vmatprep.subr.bf16.mxu1 %v7931_v58 }
 0xec8   :  { %6112 = vmatpush1.bf16.msra.mxu0 %v7458_v10  ;;  %6140 = vmatpush3.bf16.msra.mxu1 %v7498_v40 }
 0xec9   :  { %6114 = vmatprep.subr.bf16.mxu0 %v7462_v26  ;;  %6141 = vmatprep.subr.bf16.mxu1 %v7931_v58 }
 0xecc   :  { %6116 = vmatpush1.bf16.msra.mxu0 %v7464_v38  ;;  %6143 = vmatpush3.bf16.msra.mxu1 %v7502_v52 }
 0xecd   :  { %6118 = vmatprep.subr.bf16.mxu0 %v7468_v6  ;;  %6144 = vmatprep.subr.bf16.mxu1 %v7931_v58 }
 0xed0   :  { %6120 = vmatpush1.bf16.msra.mxu0 %v7470_v16  ;;  %6146 = vmatpush3.bf16.msra.mxu1 %v7506_v39 }
 0xed1   :  { %6122 = vmatprep.subr.bf16.mxu0 %v7474_v31  ;;  %6147 = vmatprep.subr.bf16.mxu1 %v7931_v58 }
 0xed4   :  { %6124 = vmatpush1.bf16.msra.mxu0 %v7476_v17  ;;  %6149 = vmatpush3.bf16.msra.mxu1 %v7510_v12 }
 0xed5   :  { %6126 = vmatprep.subr.bf16.mxu0 %v7481_v20  ;;  %6150 = vmatprep.subr.bf16.mxu1 %v7931_v58 }
 0xed8   :  { %6128 = vmatpush1.bf16.msra.mxu0 %v7487_v56  ;;  %6152 = vmatpush3.bf16.msra.mxu1 %v7514_v49 }
 0xed9   :  { %6154 = vmatprep.subr.bf16.mxu0 %v7438_v55  ;;  %6185 = vmatprep.subr.bf16.mxu1 %v7931_v58 }
 0xf8e   :  { %v3506_v50 = vpop.f32.mrb[34].mxu0  ;;  %v3577_v41 = vpop.f32.mrb[58].mxu1 }
 0xf8f   :  { %v6283_v48 = vadd.f32 %v3506_v50, %v7584_v51  ;;  %v3508_v11 = vpop.f32.mrb[35].mxu0  ;;  %v5070_v9 = vpop.f32.mrb[59].mxu1  ;;  %v3595_v55 = vadd.f32 %v7596_v62, %v3577_v41  ;;  %v3951_v50 = vld [vmem:[#allocation16 + $0x28] sm:$0xff]  ;;  %v3952_v41 = vld [vmem:[#allocation16 + $0x30] sm:$0xff] }
 0xf90   :  { %v6284_v25 = vadd.f32 %v3508_v11, %v7589_v1  ;;  %v3954_v9 = vld [vmem:[#allocation16 + $0x40] sm:$0xff] }
 0xf91   :  { %v4142_v27 = vmul.f32 -1.442695, %v6283_v48  ;;  %v3953_v48 = vld [vmem:[#allocation16 + $0x38] sm:$0xff] }
 0xf92   :  { %v4143_v30 = vmul.f32 -1.442695, %v6284_v25  ;;  %v6221_v11 = vpack.c.bf16 %v3953_v48, %v3952_v41 }
 0xf93   :  { %6451 = vpow2.f32 %v4142_v27  ;;  %v3955_v27 = vld [vmem:[#allocation16 + $0x48] sm:$0xff] }
 0xf94   :  { %6453 = vpow2.f32 %v4143_v30  ;;  %v6225_v25 = vpack.c.bf16 %v3955_v27, %v3954_v9  ;;  %v3956_v30 = vld [vmem:[#allocation16 + $0x50] sm:$0xff] }
 0xf9d   :  { %v6452_v59 = vpop.eup %6451 }
 0xf9e   :  { %v3585_v36 = vadd.f32 1.0, %v6452_v59  ;;  %v6454_v53 = vpop.eup %6453  ;;  %v3957_v59 = vld [vmem:[#allocation16 + $0x58] sm:$0xff] }
 0xf9f   :  { %v3592_v44 = vadd.f32 1.0, %v6454_v53  ;;  %v3958_v53 = vld [vmem:[#allocation16 + $0x60] sm:$0xff] }
 0xfa0   :  { %6455 = vrcp.f32 %v3585_v36  ;;  %v6229_v36 = vpack.c.bf16 %v3957_v59, %v3956_v30 }
 0xfa1   :  { %6457 = vrcp.f32 %v3592_v44  ;;  %v3959_v44 = vld [vmem:[#allocation16 + $0x68] sm:$0xff] }
 0xfaa   :  { %v6456_v45 = vpop.eup %6455 }
 0xfab   :  { %v3596_v7 = vmul.f32 %v6456_v45, %v3595_v55  ;;  %v6458_v4 = vpop.eup %6457  ;;  %v3960_v55 = vld [vmem:[#allocation16 + $0x70] sm:$0xff]  ;;  %v3961_v45 = vld [vmem:[#allocation16 + $0x78] sm:$0xff] }
 0xfac   :  { %v3599_v2 = vsub.f32 1.0, %v6458_v4  ;;  %v3601_v42 = vmul.f32 %v6458_v4, %v7784_v34 }
 0xfad   :  { %v3597_v24 = vadd.f32 %v3596_v7, %v2559_v32  ;;  %v6237_v32 = vpack.c.bf16 %v3961_v45, %v3960_v55 }
 0xfaf   :  { %6459 = vtanh.f32 %v3597_v24 }
 0xfb9   :  { %v6460_v60 = vpop.eup %6459 }
 0xfba   :  { %v3600_v13 = vmul.f32 %v6460_v60, %v3599_v2 }
 0xfbc   :  { %v7829_v61 = vadd.f32 %v3601_v42, %v3600_v13 }
 0xfbe   :  { %3672 = vmatmul.mubr.f32.vlgmr.msra.gmra.mrb[36].mxu0 %v7829_v61  ;;  %5104 = vmatmul.mubr.f32.vlgmr.msra.gmra.mrb[60].mxu1 %v7829_v61 }
 0xfbf   :  { %6156 = vmatpush1.bf16.msra.mxu0 %v7440_v57  ;;  %6187 = vmatpush3.bf16.msra.mxu1 %v7478_v8  ;;  %v3947_v57 = vld [vmem:[#allocation16 + $0x8] sm:$0xff] }
 0xfc0   :  { %6158 = vmatprep.subr.bf16.mxu0 %v7444_v28  ;;  %6188 = vmatprep.subr.bf16.mxu1 %v7931_v58 }
 0xfc1   :  { %3838 = vmatprep.mubr.f32.mxu0 %v7932_v63  ;;  %5138 = vmatprep.mubr.msk.f32.mxu1 %vm6706_vm1, %v7932_v63  ;;  %v3946_v63 = vld [vmem:[#allocation16] sm:$0xff] }
 0xfc2   :  { %v6209_v28 = vpack.c.bf16 %v3947_v57, %v3946_v63 }
 0xfc3   :  { %6160 = vmatpush1.bf16.msra.mxu0 %v7446_v18  ;;  %6190 = vmatpush3.bf16.msra.mxu1 %v7489_v35 }
 0xfc4   :  { %6162 = vmatprep.subr.bf16.mxu0 %v7450_v21  ;;  %6191 = vmatprep.subr.bf16.mxu1 %v7931_v58 }
 0xfc7   :  { %6164 = vmatpush1.bf16.msra.mxu0 %v7452_v37  ;;  %6193 = vmatpush3.bf16.msra.mxu1 %v7495_v47 }
 0xfc8   :  { %6166 = vmatprep.subr.bf16.mxu0 %v7456_v54  ;;  %6194 = vmatprep.subr.bf16.mxu1 %v7931_v58 }
 0xfcb   :  { %6168 = vmatpush1.bf16.msra.mxu0 %v7458_v10  ;;  %6196 = vmatpush3.bf16.msra.mxu1 %v7498_v40 }
 0xfcc   :  { %6170 = vmatprep.subr.bf16.mxu0 %v7462_v26  ;;  %6197 = vmatprep.subr.bf16.mxu1 %v7931_v58 }
 0xfcf   :  { %6172 = vmatpush1.bf16.msra.mxu0 %v7464_v38  ;;  %6199 = vmatpush3.bf16.msra.mxu1 %v7502_v52 }
 0xfd0   :  { %6174 = vmatprep.subr.bf16.mxu0 %v7468_v6  ;;  %6200 = vmatprep.subr.bf16.mxu1 %v7931_v58 }
 0xfd3   :  { %6176 = vmatpush1.bf16.msra.mxu0 %v7470_v16  ;;  %6202 = vmatpush3.bf16.msra.mxu1 %v7506_v39 }
 0xfd4   :  { %6178 = vmatprep.subr.bf16.mxu0 %v7474_v31  ;;  %6203 = vmatprep.subr.bf16.mxu1 %v7931_v58 }
 0xfd7   :  { %6180 = vmatpush1.bf16.msra.mxu0 %v7476_v17  ;;  %6205 = vmatpush3.bf16.msra.mxu1 %v7510_v12  ;;  %v3948_v12 = vld [vmem:[#allocation16 + $0x10] sm:$0xff] }
 0xfd8   :  { %6182 = vmatprep.subr.bf16.mxu0 %v7481_v20  ;;  %6206 = vmatprep.subr.bf16.mxu1 %v7931_v58 }
 0xfdb   :  { %6184 = vmatpush1.bf16.msra.mxu0 %v7487_v56  ;;  %6208 = vmatpush3.bf16.msra.mxu1 %v7514_v49  ;;  %v2564_v56 = vadd.f32 %v7586_v0, %v7599_v23  ;;  %v3949_v49 = vld [vmem:[#allocation16 + $0x18] sm:$0xff]  ;;  %v6217_v0 = vpack.c.bf16 %v3951_v50, %v3950_v33 }
 0xfdc   :  { %6210 = vmatprep.subr.bf16.mxu0 %v6209_v28  ;;  %v6213_v22 = vpack.c.bf16 %v3949_v49, %v3948_v12 }
0x1091   :  { %v3673_v18 = vpop.f32.mrb[36].mxu0  ;;  %v3744_v21 = vpop.f32.mrb[60].mxu1 }
0x1092   :  { %v6285_v37 = vadd.f32 %v3673_v18, %v7584_v51  ;;  %v3675_v54 = vpop.f32.mrb[37].mxu0  ;;  %v5105_v10 = vpop.f32.mrb[61].mxu1  ;;  %v3762_v8 = vadd.f32 %v7596_v62, %v3744_v21 }
0x1093   :  { %v6286_v38 = vadd.f32 %v3675_v54, %v7589_v1 }
0x1094   :  { %v4144_v26 = vmul.f32 -1.442695, %v6285_v37 }
0x1095   :  { %v4145_v6 = vmul.f32 -1.442695, %v6286_v38 }
0x1096   :  { %6461 = vpow2.f32 %v4144_v26 }
0x1097   :  { %6463 = vpow2.f32 %v4145_v6 }
0x10a0   :  { %v6462_v58 = vpop.eup %6461 }
0x10a1   :  { %v3752_v16 = vadd.f32 1.0, %v6462_v58  ;;  %v6464_v31 = vpop.eup %6463 }
0x10a2   :  { %v3759_v17 = vadd.f32 1.0, %v6464_v31 }
0x10a3   :  { %6465 = vrcp.f32 %v3752_v16 }
0x10a4   :  { %6467 = vrcp.f32 %v3759_v17 }
0x10ad   :  { %v6466_v20 = vpop.eup %6465 }
0x10ae   :  { %v3763_v35 = vmul.f32 %v6466_v20, %v3762_v8  ;;  %v6468_v40 = vpop.eup %6467 }
0x10af   :  { %v3766_v52 = vsub.f32 1.0, %v6468_v40  ;;  %v3768_v3 = vmul.f32 %v6468_v40, %v7829_v61 }
0x10b0   :  { %v3764_v47 = vadd.f32 %v3763_v35, %v2564_v56 }
0x10b2   :  { %6469 = vtanh.f32 %v3764_v47 }
0x10bc   :  { %v6470_v39 = vpop.eup %6469 }
0x10bd   :  { %v3767_v5 = vmul.f32 %v6470_v39, %v3766_v52 }
0x10bf   :  { %v7872_v15 = vadd.f32 %v3768_v3, %v3767_v5 }
0x10c1   :  { %3839 = vmatmul.mubr.f32.vlgmr.msra.gmra.mrb[38].mxu0 %v7872_v15  ;;  %5139 = vmatmul.mubr.f32.vlgmr.msra.gmra.mrb[62].mxu1 %v7872_v15 }
0x10c2   :  { %6212 = vmatpush3.bf16.msra.mxu0 %v6209_v28  ;;  %5173 = vmatprep.mubr.f32.mxu0 %v7604_v14  ;;  %v6233_v14 = vpack.c.bf16 %v3959_v44, %v3958_v53  ;;  %v2569_v28 = vadd.f32 %v7581_v46, %v7599_v23 }
0x10c3   :  { %6214 = vmatprep.subr.bf16.mxu0 %v6213_v22 }
0x10c6   :  { %6216 = vmatpush3.bf16.msra.mxu0 %v6213_v22 }
0x10c7   :  { %6218 = vmatprep.subr.bf16.mxu0 %v6217_v0 }
0x10ca   :  { %6220 = vmatpush3.bf16.msra.mxu0 %v6217_v0 }
0x10cb   :  { %6222 = vmatprep.subr.bf16.mxu0 %v6221_v11 }
0x10ce   :  { %6224 = vmatpush3.bf16.msra.mxu0 %v6221_v11 }
0x10cf   :  { %6226 = vmatprep.subr.bf16.mxu0 %v6225_v25 }
0x10d2   :  { %6228 = vmatpush3.bf16.msra.mxu0 %v6225_v25 }
0x10d3   :  { %6230 = vmatprep.subr.bf16.mxu0 %v6229_v36 }
0x10d6   :  { %6232 = vmatpush3.bf16.msra.mxu0 %v6229_v36 }
0x10d7   :  { %6234 = vmatprep.subr.bf16.mxu0 %v6233_v14 }
0x10da   :  { %6236 = vmatpush3.bf16.msra.mxu0 %v6233_v14 }
0x10db   :  { %6238 = vmatprep.subr.bf16.mxu0 %v6237_v32 }
0x10de   :  { %6240 = vmatpush3.bf16.msra.mxu0 %v6237_v32 }
0x10e1   :  { %5174 = vmatmul.mubr.f32.vlgmr.msra.gmra.mrb[40].mxu0 %v7649_v29 }
0x10e2   :  { %5176 = vmatprep.mubr.f32.mxu0 %v7694_v43 }
0x10e5   :  { %5177 = vmatmul.mubr.f32.gmra.mrb[42].mxu0 %v7739_v19 }
0x10e6   :  { %5179 = vmatprep.mubr.f32.mxu0 %v7784_v34 }
0x10e9   :  { %5180 = vmatmul.mubr.f32.gmra.mrb[44].mxu0 %v7829_v61 }
0x10ea   :  { %5182 = vmatprep.mubr.f32.mxu0 %v7872_v15 }
0x1194   :  { %v3840_v7 = vpop.f32.mrb[38].mxu0  ;;  %v3911_v24 = vpop.f32.mrb[62].mxu1 }
0x1195   :  { %v6287_v4 = vadd.f32 %v3840_v7, %v7584_v51  ;;  %v3842_v2 = vpop.f32.mrb[39].mxu0  ;;  %v5140_v60 = vpop.f32.mrb[63].mxu1  ;;  %v3929_v61 = vadd.f32 %v7596_v62, %v3911_v24 }
0x1196   :  { %v6288_v42 = vadd.f32 %v3842_v2, %v7589_v1  ;;  %v4148_v1 = vld [vmem:[%s7919_s12] ss:$0 sm:$0xff]  ;;  %s6707_s12 = smov [#allocation18]  }
0x1197   :  { %v4146_v13 = vmul.f32 -1.442695, %v6287_v4  ;;  %s4087_s21 = sshll.u32 %s6707_s12, 4  ;;  %s4088_s21 = int_to_ptr.vmem [resolvable:$true] %s4087_s21 }
0x1198   :  { %v4147_v29 = vmul.f32 -1.442695, %v6288_v42  ;;  %s6658_s22 = scalar_lea.vmem %s4088_s21, 1024  ;;  %p6663_p9 = scmp.lt.s32.totalorder %s4088_s21, %s4088_s21 }
0x1199   :  { %6471 = vpow2.f32 %v4146_v13  ;;  %p6659_p8 = scmp.ne.s32.totalorder %s4088_s21, %s6658_s22  ;;  %p6664_p10 = scmp.lt.s32.totalorder %s6658_s22, %s6658_s22 }
0x119a   :  { %6473 = vpow2.f32 %v4147_v29 }
0x119b   :  { %p6665_p11 = por %p6664_p10, %p6663_p9 }
0x119d   :  { %p6666_p12 = pnand %p6665_p11, %p6659_p8 }
0x11a3   :  { %v6472_v43 = vpop.eup %6471 }
0x11a4   :  { %v3919_v19 = vadd.f32 1.0, %v6472_v43  ;;  %v6474_v34 = vpop.eup %6473 }
0x11a5   :  { %v3926_v63 = vadd.f32 1.0, %v6474_v34 }
0x11a6   :  { %6475 = vrcp.f32 %v3919_v19 }
0x11a7   :  { %6477 = vrcp.f32 %v3926_v63 }
0x11b0   :  { %v6476_v57 = vpop.eup %6475 }
0x11b1   :  { %v3930_v51 = vmul.f32 %v6476_v57, %v3929_v61  ;;  %v6478_v58 = vpop.eup %6477 }
0x11b2   :  { %v3933_v17 = vsub.f32 1.0, %v6478_v58  ;;  %v3935_v56 = vmul.f32 %v6478_v58, %v7872_v15 }
0x11b3   :  { %v3931_v18 = vadd.f32 %v3930_v51, %v2569_v28 }
0x11b4   :  { %v5175_v21 = vpop.f32.mrb[40].mxu0 }
0x11b5   :  { %6479 = vtanh.f32 %v3931_v18  ;;  %v4041_v37 = vadd.f32 %v5175_v21, %v4148_v1  ;;  %v4035_v54 = vpop.f32.mrb[41].mxu0 }
0x11b6   :  { %v4036_v10 = vadd.f32 %v4148_v1, %v4035_v54 }
0x11b7   :  { %4075 = vst [vmem:[#allocation18 + $0x8] sm:$0xff] %v4041_v37 }
0x11b8   :  { %4074 = vst [vmem:[#allocation18] sm:$0xff] %v4036_v10  ;;  %v5178_v26 = vpop.f32.mrb[42].mxu0 }
0x11b9   :  { %v4051_v62 = vadd.f32 %v5178_v26, %v4148_v1  ;;  %v4045_v38 = vpop.f32.mrb[43].mxu0 }
0x11ba   :  { %v4046_v6 = vadd.f32 %v4148_v1, %v4045_v38 }
0x11bb   :  { %4077 = vst [vmem:[#allocation18 + $0x18] sm:$0xff] %v4051_v62 }
0x11bc   :  { %4076 = vst [vmem:[#allocation18 + $0x10] sm:$0xff] %v4046_v6  ;;  %v5181_v46 = vpop.f32.mrb[44].mxu0 }
0x11bd   :  { %v4061_v23 = vadd.f32 %v5181_v46, %v4148_v1  ;;  %v4055_v16 = vpop.f32.mrb[45].mxu0 }
0x11be   :  { %v4056_v31 = vadd.f32 %v4148_v1, %v4055_v16 }
0x11bf   :  { %v6480_v8 = vpop.eup %6479  ;;  %4079 = vst [vmem:[#allocation18 + $0x28] sm:$0xff] %v4061_v23 }
0x11c0   :  { %4078 = vst [vmem:[#allocation18 + $0x20] sm:$0xff] %v4056_v31  ;;  %v3934_v20 = vmul.f32 %v6480_v8, %v3933_v17 }
0x11c2   :  { %v3936_v35 = vadd.f32 %v3935_v56, %v3934_v20 }
0x11c4   :  { %5183 = vmatmul.mubr.f32.gmra.mrb[46].mxu0 %v3936_v35 }
0x1297   :  { %v5184_v47 = vpop.f32.mrb[46].mxu0 }
0x1298   :  { %v4071_v40 = vadd.f32 %v5184_v47, %v4148_v1  ;;  %v4065_v52 = vpop.f32.mrb[47].mxu0 }
0x1299   :  { %v4066_v39 = vadd.f32 %v4148_v1, %v4065_v52 }
0x129a   :  { %4081 = vst [vmem:[#allocation18 + $0x38] sm:$0xff] %v4071_v40 }
0x129b   :  { %4080 = vst [vmem:[#allocation18 + $0x30] sm:$0xff] %v4066_v39 }
0x129c   :  { %6669 = shalt.err (!%p6666_p12)
}
0x129d   :  { %s6670_s23 = scalar_lea.hbm %s7920_s13, 1024 }
0x129e   :  { %p6671_p13 = scmp.ne.s32.totalorder %s7920_s13, %s6670_s23  ;;  %p6674_p0 = scmp.lt.u32.totalorder %s6670_s23, %s7920_s13 }
0x12a0   :  { %p6676_p1 = pnand %p6674_p0, %p6671_p13 }
0x12a2   :  { %6679 = shalt.err (!%p6676_p1)
}
0x12a3   :  { %4093 = dma.vmem_to_hbm [thread:$0]  %s4088_s21, 1024, %s7920_s13, [#allocation6], %s6702_s8, %s6702_s8, %s6703_s1  }
0x12a4   :  { %6690 = dma.done.wait [#allocation6], 1024  }
0x12a5   :  { %6691 = vsyncadd [#allocation6], 4294966272 }
0x12a6   :  { %4097 = vsyncpa [#allocation5], 1 }
0x12a7   :  { %4098 = vsyncpa [#allocation8], 1 }
0x12a8   :  { %4099 = vsyncpa [#allocation11], 1 }
0x12a9   :  { %4100 = vsyncpa [#allocation14], 1 }
0x12aa   :  { %4101 = vsyncpa [#allocation17], 1 }
0x12ab   :  { %4102 = vsyncpa [#allocation6], 1 }

</bundles_post_ra>
